<compile_context>
chip_gen: v6e
topology: v6e:2x2x1
jax: 0.10.0
libtpu: 0.0.40
codegen_flags: <defaults>
</compile_context>

<pallas_src>
import math

import jax
import jax.numpy as jnp
from jax import lax
from jax.experimental import pallas as pl
from jax.experimental.pallas import tpu as pltpu

# ---------------- toy config (scaled-down analogue of all-mpnet-base-v2 + fc head) ------------
B = 2          # sentences per side (pos / neg)
S = 8          # sequence length
H = 32         # hidden size (stands in for 768)
NH = 4         # attention heads
HD = H // NH   # head dim
FF = 64        # FFN intermediate
L = 2          # encoder layers
VOCAB = 100
TWO_B = 2 * B  # pos + neg batched through the encoder together

# fc head: 1536->1250->1000->1000->768 scaled down to 2H->D1->D2->D2->DOUT
D1, D2, DOUT = 48, 40, H

# packed per-layer small-param slab: (L, 8, 128) f32
#   row 0: bqkv(3H)  1: bo(H)  2: ln1_g  3: ln1_b  4: b1(FF)  5: b2  6: ln2_g  7: ln2_b
LP_ROWS, LP_LANES = 8, 128

# packed fc-weight slab: rows stacked, cols padded to D1
FCW_ROWS = 2 * H + D1 + D2 + D2          # 192
FCW_COLS = D1                            # 48
R0, R1, R2, R3 = 0, 2 * H, 2 * H + D1, 2 * H + D1 + D2


def _layer_norm(x, gamma, beta, eps=1e-5):
    mu = jnp.mean(x, axis=-1, keepdims=True)
    d = x - mu
    var = jnp.mean(d * d, axis=-1, keepdims=True)
    return d * lax.rsqrt(var + eps) * gamma + beta


# ---------------- the one fused kernel ----------------
def codegiver_kernel(x_ref, mask_ref, wqkv_ref, wo_ref, w1_ref, w2_ref,
                     lp_ref, fcw_ref, fcb_ref, out_ref):
    f32, bf16 = jnp.float32, jnp.bfloat16

    h = x_ref[...].astype(f32)                 # (2B*S, H) residual stream (f32 for LN/softmax)
    mask = mask_ref[...]                       # (2B, S), 1.0 = valid token

    # attention mask bias built once, broadcast over heads -> (2B*NH, 1, S)
    mb = (1.0 - mask) * (-1e9)
    mask_bias = jnp.broadcast_to(mb[:, None, None, :],
                                 (TWO_B, NH, 1, S)).reshape(TWO_B * NH, 1, S)

    def to_heads(a2d):                         # (2B*S, H) -> (2B*NH, S, HD), head-batched view
        return jnp.swapaxes(a2d.reshape(TWO_B, S, NH, HD), 1, 2).reshape(TWO_B * NH, S, HD)

    # ---------------- transformer encoder: static unrolled layers, weights resident in VMEM ----
    for l in range(L):
        bqkv = lp_ref[l, 0:1, 0:3 * H]
        bo   = lp_ref[l, 1:2, 0:H]
        ln1g = lp_ref[l, 2:3, 0:H]
        ln1b = lp_ref[l, 3:4, 0:H]
        b1   = lp_ref[l, 4:5, 0:FF]
        b2   = lp_ref[l, 5:6, 0:H]
        ln2g = lp_ref[l, 6:7, 0:H]
        ln2b = lp_ref[l, 7:8, 0:H]

        # fused Q|K|V projection on the flat 2D stream; 1/sqrt(HD) folded into Q cols+bias
        qkv = jnp.dot(h.astype(bf16), wqkv_ref[l], preferred_element_type=f32) + bqkv  # (2B*S,3H)

        qb = to_heads(qkv[:, 0:H])             # (2B*NH, S, HD)
        kb = to_heads(qkv[:, H:2 * H])
        vb = to_heads(qkv[:, 2 * H:3 * H])

        # one batched score contraction + one batched PV contraction for ALL heads
        s = jnp.einsum('bqd,bkd->bqk', qb, kb, preferred_element_type=f32) + mask_bias
        s = s - jnp.max(s, axis=-1, keepdims=True)
        p = jnp.exp(s)
        p = p * pl.reciprocal(jnp.sum(p, axis=-1, keepdims=True), approx=True)      # EUP slot
        ctx = jnp.einsum('bqk,bkd->bqd', p.astype(bf16), vb.astype(bf16),
                         preferred_element_type=f32)                                # (2B*NH,S,HD)
        ctx = jnp.swapaxes(ctx.reshape(TWO_B, NH, S, HD), 1, 2).reshape(TWO_B * S, H)

        attn = jnp.dot(ctx.astype(bf16), wo_ref[l], preferred_element_type=f32) + bo
        h1 = _layer_norm(h + attn, ln1g, ln1b)

        ff = jnp.dot(h1.astype(bf16), w1_ref[l], preferred_element_type=f32) + b1
        ff = jax.nn.gelu(ff, approximate=True)      # TODO(synk): torch nn.GELU default is erf
        ff = jnp.dot(ff.astype(bf16), w2_ref[l], preferred_element_type=f32) + b2
        h = _layer_norm(h1 + ff, ln2g, ln2b)

    # ---------------- attention-mask mean pooling + L2 normalize (SentenceTransformer tail) ----
    h3 = h.reshape(TWO_B, S, H)
    summed = jnp.sum(h3 * mask[:, :, None], axis=1)                     # (2B, H)
    counts = jnp.maximum(jnp.sum(mask, axis=1, keepdims=True), 1e-9)    # (2B, 1)
    mean = summed * pl.reciprocal(counts, approx=True)
    emb = mean * lax.rsqrt(jnp.sum(mean * mean, axis=-1, keepdims=True) + 1e-24)

    # ---------------- fc head: lane-concat(pos, neg) then 4 small matmuls on a serial chain ----
    emb2 = jnp.concatenate([emb[0:B, :], emb[B:2 * B, :]], axis=-1).astype(bf16)    # (B, 2H)

    fw0 = fcw_ref[R0:R0 + 2 * H, 0:D1]
    fw1 = fcw_ref[R1:R1 + D1, 0:D2]
    fw2 = fcw_ref[R2:R2 + D2, 0:D2]
    fw3 = fcw_ref[R3:R3 + D2, 0:DOUT]
    fb0 = fcb_ref[0:1, 0:D1]
    fb1 = fcb_ref[1:2, 0:D2]
    fb2 = fcb_ref[2:3, 0:D2]
    fb3 = fcb_ref[3:4, 0:DOUT]

    z = jnp.maximum(jnp.dot(emb2, fw0, preferred_element_type=f32) + fb0, 0.0)
    z = jnp.maximum(jnp.dot(z.astype(bf16), fw1, preferred_element_type=f32) + fb1, 0.0)
    z = jnp.maximum(jnp.dot(z.astype(bf16), fw2, preferred_element_type=f32) + fb2, 0.0)
    z = jnp.dot(z.astype(bf16), fw3, preferred_element_type=f32) + fb3

    out_ref[...] = z * lax.rsqrt(jnp.sum(z * z, axis=-1, keepdims=True) + 1e-24)


# ---------------- wrapper ----------------
def simple_code_giver_forward(pos_ids, neg_ids, pos_mask, neg_mask, params):
    # glue: batch pos+neg together, embedding lookup (gather stays in XLA)
    ids = jnp.concatenate([pos_ids, neg_ids], axis=0)                   # (2B, S)
    mask = jnp.concatenate([pos_mask, neg_mask], axis=0).astype(jnp.float32)
    x = params['tok_emb'][ids] + params['pos_emb'][None, :S, :]
    x = x.astype(jnp.bfloat16).reshape(TWO_B * S, H)                    # bf16 in: half the DMA bytes

    def full(shape):
        return pl.BlockSpec(shape, lambda i, _n=len(shape): (0,) * _n)

    in_specs = [
        full((TWO_B * S, H)),            # x (flattened residual stream)
        full((TWO_B, S)),                # attention mask
        full((L, H, 3 * H)),             # wqkv
        full((L, H, H)),                 # wo
        full((L, H, FF)),                # w1
        full((L, FF, H)),                # w2
        full((L, LP_ROWS, LP_LANES)),    # per-layer biases + LN params (one slab)
        full((FCW_ROWS, FCW_COLS)),      # all 4 fc weights (one slab)
        full((4, FCW_COLS)),             # all 4 fc biases (one slab)
    ]

    out = pl.pallas_call(
        codegiver_kernel,
        out_shape=jax.ShapeDtypeStruct((B, DOUT), jnp.float32),
        grid_spec=pltpu.PrefetchScalarGridSpec(
            num_scalar_prefetch=0,
            grid=(1,),                   # single step: every tensor DMA'd exactly once
            in_specs=in_specs,
            out_specs=full((B, DOUT)),
        ),
        compiler_params=pltpu.CompilerParams(dimension_semantics=("arbitrary",)),
    )(x, mask,
      params['wqkv'], params['wo'], params['w1'], params['w2'],
      params['lp'], params['fcw'], params['fcb'])
    return out


def init_params(key):
    ks = jax.random.split(key, 16)
    n = lambda k, shape, s=0.05: jax.random.normal(k, shape, jnp.float32) * s
    bf16 = jnp.bfloat16
    f32 = jnp.float32

    # fold the 1/sqrt(HD) attention scale into BOTH the Q weight columns and the Q bias slice
    scale = 1.0 / math.sqrt(HD)
    wq = n(ks[0], (L, H, H)) * scale
    wk = n(ks[1], (L, H, H))
    wv = n(ks[2], (L, H, H))
    wqkv = jnp.concatenate([wq, wk, wv], axis=-1)                       # (L, H, 3H)
    bqkv = jnp.concatenate([jnp.zeros((L, H), f32) * scale,
                            jnp.zeros((L, H), f32),
                            jnp.zeros((L, H), f32)], axis=-1)           # (L, 3H)

    # per-layer small-param slab
    lp = jnp.zeros((L, LP_ROWS, LP_LANES), f32)
    lp = lp.at[:, 0, :3 * H].set(bqkv)
    lp = lp.at[:, 1, :H].set(jnp.zeros((L, H), f32))     # bo
    lp = lp.at[:, 2, :H].set(jnp.ones((L, H), f32))      # ln1_g
    lp = lp.at[:, 3, :H].set(jnp.zeros((L, H), f32))     # ln1_b
    lp = lp.at[:, 4, :FF].set(jnp.zeros((L, FF), f32))   # b1
    lp = lp.at[:, 5, :H].set(jnp.zeros((L, H), f32))     # b2
    lp = lp.at[:, 6, :H].set(jnp.ones((L, H), f32))      # ln2_g
    lp = lp.at[:, 7, :H].set(jnp.zeros((L, H), f32))     # ln2_b

    # fc-head weight slab (Linear(2H->D1), D1->D2, D2->D2, D2->DOUT) and bias slab
    fw0 = n(ks[5], (2 * H, D1))
    fw1 = n(ks[9], (D1, D2))
    fw2 = n(ks[10], (D2, D2))
    fw3 = n(ks[11], (D2, DOUT))
    fcw = jnp.zeros((FCW_ROWS, FCW_COLS), f32)
    fcw = fcw.at[R0:R0 + 2 * H, 0:D1].set(fw0)
    fcw = fcw.at[R1:R1 + D1, 0:D2].set(fw1)
    fcw = fcw.at[R2:R2 + D2, 0:D2].set(fw2)
    fcw = fcw.at[R3:R3 + D2, 0:DOUT].set(fw3)

    fcb = jnp.zeros((4, FCW_COLS), f32)
    fcb = fcb.at[0, 0:D1].set(n(ks[12], (D1,)))
    fcb = fcb.at[1, 0:D2].set(n(ks[13], (D2,)))
    fcb = fcb.at[2, 0:D2].set(n(ks[14], (D2,)))
    fcb = fcb.at[3, 0:DOUT].set(n(ks[15], (DOUT,)))

    return {
        'tok_emb': n(ks[3], (VOCAB, H), 0.02),
        'pos_emb': n(ks[4], (S, H), 0.02),
        'wqkv': wqkv.astype(bf16),
        'wo': n(ks[6], (L, H, H)).astype(bf16),
        'w1': n(ks[7], (L, H, FF)).astype(bf16),
        'w2': n(ks[8], (L, FF, H)).astype(bf16),
        'lp': lp,
        'fcw': fcw.astype(bf16),
        'fcb': fcb,
    }


if __name__ == "__main__":
    key = jax.random.PRNGKey(0)
    k_pos, k_neg, k_par = jax.random.split(key, 3)

    # TODO(synk): string tokenization has no Pallas equivalent; pos/neg texts enter as token ids.
    pos_ids = jax.random.randint(k_pos, (B, S), 0, VOCAB, dtype=jnp.int32)
    neg_ids = jax.random.randint(k_neg, (B, S), 0, VOCAB, dtype=jnp.int32)
    attn_mask = jnp.ones((B, S), jnp.float32)            # all tokens valid

    params = init_params(k_par)

    out = simple_code_giver_forward(pos_ids, neg_ids, attn_mask, attn_mask, params)
    out = jax.block_until_ready(out)

    assert out.shape == (B, DOUT), out.shape
    assert bool(jnp.all(jnp.isfinite(out)))
    norms = jnp.sqrt(jnp.sum(out * out, axis=-1))        # F.normalize(p=2, dim=1) check
    assert bool(jnp.all(jnp.abs(norms - 1.0) < 1e-3))

    print("KERNEL_OK")
</pallas_src>

<mosaic_0001>
module attributes {stable_mosaic.version = 11 : i64} {
  func.func @codegiver_kernel(%arg0: i32, %arg1: memref<32x32xbf16, #tpu.memory_space<vmem>>, %arg2: memref<4x8xf32, #tpu.memory_space<vmem>>, %arg3: memref<2x32x96xbf16, #tpu.memory_space<vmem>>, %arg4: memref<2x32x32xbf16, #tpu.memory_space<vmem>>, %arg5: memref<2x32x64xbf16, #tpu.memory_space<vmem>>, %arg6: memref<2x64x32xbf16, #tpu.memory_space<vmem>>, %arg7: memref<2x8x128xf32, #tpu.memory_space<vmem>>, %arg8: memref<192x48xbf16, #tpu.memory_space<vmem>>, %arg9: memref<4x48xf32, #tpu.memory_space<vmem>>, %arg10: memref<2x32xf32, #tpu.memory_space<vmem>>) attributes {dimension_semantics = [#tpu.dimension_semantics<arbitrary>], iteration_bounds = array<i64: 1>, scalar_prefetch = 0 : i64, scratch_operands = 0 : i64, tpu.core_type = #tpu.core_type<tc>, window_params = [{pipeline_mode = #tpu.pipeline_mode<synchronous>, transform_indices = @transform_0, window_bounds = array<i64: 32, 32>}, {pipeline_mode = #tpu.pipeline_mode<synchronous>, transform_indices = @transform_1, window_bounds = array<i64: 4, 8>}, {pipeline_mode = #tpu.pipeline_mode<synchronous>, transform_indices = @transform_2, window_bounds = array<i64: 2, 32, 96>}, {pipeline_mode = #tpu.pipeline_mode<synchronous>, transform_indices = @transform_3, window_bounds = array<i64: 2, 32, 32>}, {pipeline_mode = #tpu.pipeline_mode<synchronous>, transform_indices = @transform_4, window_bounds = array<i64: 2, 32, 64>}, {pipeline_mode = #tpu.pipeline_mode<synchronous>, transform_indices = @transform_5, window_bounds = array<i64: 2, 64, 32>}, {pipeline_mode = #tpu.pipeline_mode<synchronous>, transform_indices = @transform_6, window_bounds = array<i64: 2, 8, 128>}, {pipeline_mode = #tpu.pipeline_mode<synchronous>, transform_indices = @transform_7, window_bounds = array<i64: 192, 48>}, {pipeline_mode = #tpu.pipeline_mode<synchronous>, transform_indices = @transform_8, window_bounds = array<i64: 4, 48>}, {pipeline_mode = #tpu.pipeline_mode<synchronous>, transform_indices = @transform_9, window_bounds = array<i64: 2, 32>}]} {
    %c0 = arith.constant 0 : index
    %c0_0 = arith.constant 0 : index
    %0 = vector.load %arg1[%c0, %c0_0] : memref<32x32xbf16, #tpu.memory_space<vmem>>, vector<32x32xbf16>
    %1 = arith.extf %0 : vector<32x32xbf16> to vector<32x32xf32>
    %c0_1 = arith.constant 0 : index
    %c0_2 = arith.constant 0 : index
    %2 = vector.load %arg2[%c0_1, %c0_2] : memref<4x8xf32, #tpu.memory_space<vmem>>, vector<4x8xf32>
    %cst = arith.constant 1.000000e+00 : f32
    %3 = vector.broadcast %cst : f32 to vector<4x8xf32>
    %4 = arith.subf %3, %2 : vector<4x8xf32>
    %cst_3 = arith.constant -1.000000e+09 : f32
    %5 = vector.broadcast %cst_3 : f32 to vector<4x8xf32>
    %6 = arith.mulf %4, %5 : vector<4x8xf32>
    %7 = vector.shape_cast %6 : vector<4x8xf32> to vector<4x1x1x8xf32>
    %8 = vector.shape_cast %7 : vector<4x1x1x8xf32> to vector<4x1x1x8xf32>
    %9 = vector.broadcast %8 : vector<4x1x1x8xf32> to vector<4x4x1x8xf32>
    %10 = vector.shape_cast %9 : vector<4x4x1x8xf32> to vector<16x1x8xf32>
    %c0_4 = arith.constant 0 : index
    %c0_5 = arith.constant 0 : index
    %c0_6 = arith.constant 0 : index
    %11 = vector.load %arg7[%c0_4, %c0_5, %c0_6] : memref<2x8x128xf32, #tpu.memory_space<vmem>>, vector<1x1x96xf32>
    %12 = vector.shape_cast %11 : vector<1x1x96xf32> to vector<1x96xf32>
    %c0_7 = arith.constant 0 : index
    %c1 = arith.constant 1 : index
    %c0_8 = arith.constant 0 : index
    %13 = vector.load %arg7[%c0_7, %c1, %c0_8] : memref<2x8x128xf32, #tpu.memory_space<vmem>>, vector<1x1x32xf32>
    %14 = vector.shape_cast %13 : vector<1x1x32xf32> to vector<1x32xf32>
    %c0_9 = arith.constant 0 : index
    %c2 = arith.constant 2 : index
    %c0_10 = arith.constant 0 : index
    %15 = vector.load %arg7[%c0_9, %c2, %c0_10] : memref<2x8x128xf32, #tpu.memory_space<vmem>>, vector<1x1x32xf32>
    %16 = vector.shape_cast %15 : vector<1x1x32xf32> to vector<1x32xf32>
    %c0_11 = arith.constant 0 : index
    %c3 = arith.constant 3 : index
    %c0_12 = arith.constant 0 : index
    %17 = vector.load %arg7[%c0_11, %c3, %c0_12] : memref<2x8x128xf32, #tpu.memory_space<vmem>>, vector<1x1x32xf32>
    %18 = vector.shape_cast %17 : vector<1x1x32xf32> to vector<1x32xf32>
    %c0_13 = arith.constant 0 : index
    %c4 = arith.constant 4 : index
    %c0_14 = arith.constant 0 : index
    %19 = vector.load %arg7[%c0_13, %c4, %c0_14] : memref<2x8x128xf32, #tpu.memory_space<vmem>>, vector<1x1x64xf32>
    %20 = vector.shape_cast %19 : vector<1x1x64xf32> to vector<1x64xf32>
    %c0_15 = arith.constant 0 : index
    %c5 = arith.constant 5 : index
    %c0_16 = arith.constant 0 : index
    %21 = vector.load %arg7[%c0_15, %c5, %c0_16] : memref<2x8x128xf32, #tpu.memory_space<vmem>>, vector<1x1x32xf32>
    %22 = vector.shape_cast %21 : vector<1x1x32xf32> to vector<1x32xf32>
    %c0_17 = arith.constant 0 : index
    %c6 = arith.constant 6 : index
    %c0_18 = arith.constant 0 : index
    %23 = vector.load %arg7[%c0_17, %c6, %c0_18] : memref<2x8x128xf32, #tpu.memory_space<vmem>>, vector<1x1x32xf32>
    %24 = vector.shape_cast %23 : vector<1x1x32xf32> to vector<1x32xf32>
    %c0_19 = arith.constant 0 : index
    %c7 = arith.constant 7 : index
    %c0_20 = arith.constant 0 : index
    %25 = vector.load %arg7[%c0_19, %c7, %c0_20] : memref<2x8x128xf32, #tpu.memory_space<vmem>>, vector<1x1x32xf32>
    %26 = vector.shape_cast %25 : vector<1x1x32xf32> to vector<1x32xf32>
    %27 = arith.truncf %1 : vector<32x32xf32> to vector<32x32xbf16>
    %c0_21 = arith.constant 0 : index
    %c0_22 = arith.constant 0 : index
    %c0_23 = arith.constant 0 : index
    %28 = vector.load %arg3[%c0_21, %c0_22, %c0_23] : memref<2x32x96xbf16, #tpu.memory_space<vmem>>, vector<1x32x96xbf16>
    %29 = vector.shape_cast %28 : vector<1x32x96xbf16> to vector<32x96xbf16>
    %cst_24 = arith.constant dense<0.000000e+00> : vector<32x96xf32>
    %30 = tpu.matmul %27, %29, %cst_24 {dimension_numbers = #tpu.dot_dimension_numbers<[1], [0], [0], [1], [0, 0, 1, 1], [], []>} : vector<32x32xbf16>, vector<32x96xbf16>, vector<32x96xf32> -> vector<32x96xf32>
    %31 = vector.broadcast %12 : vector<1x96xf32> to vector<32x96xf32>
    %32 = arith.addf %30, %31 : vector<32x96xf32>
    %33 = vector.extract_strided_slice %32 {offsets = [0, 0], sizes = [32, 32], strides = [1, 1]} : vector<32x96xf32> to vector<32x32xf32>
    %34 = vector.shape_cast %33 : vector<32x32xf32> to vector<4x8x4x8xf32>
    %35 = tpu.transpose %34, [0, 2, 1, 3] : vector<4x8x4x8xf32> -> vector<4x4x8x8xf32>
    %36 = vector.shape_cast %35 : vector<4x4x8x8xf32> to vector<16x8x8xf32>
    %37 = vector.extract_strided_slice %32 {offsets = [0, 32], sizes = [32, 32], strides = [1, 1]} : vector<32x96xf32> to vector<32x32xf32>
    %38 = vector.shape_cast %37 : vector<32x32xf32> to vector<4x8x4x8xf32>
    %39 = tpu.transpose %38, [0, 2, 1, 3] : vector<4x8x4x8xf32> -> vector<4x4x8x8xf32>
    %40 = vector.shape_cast %39 : vector<4x4x8x8xf32> to vector<16x8x8xf32>
    %41 = vector.extract_strided_slice %32 {offsets = [0, 64], sizes = [32, 32], strides = [1, 1]} : vector<32x96xf32> to vector<32x32xf32>
    %42 = vector.shape_cast %41 : vector<32x32xf32> to vector<4x8x4x8xf32>
    %43 = tpu.transpose %42, [0, 2, 1, 3] : vector<4x8x4x8xf32> -> vector<4x4x8x8xf32>
    %44 = vector.shape_cast %43 : vector<4x4x8x8xf32> to vector<16x8x8xf32>
    "tpu.trace_start"() <{level = 10 : i32, message = "bqd,bkd->bqk"}> : () -> ()
    %cst_25 = arith.constant dense<0.000000e+00> : vector<16x8x8xf32>
    %45 = tpu.matmul %36, %40, %cst_25 {dimension_numbers = #tpu.dot_dimension_numbers<[2], [2], [1], [1], [0, 0, 0, 1, 1, 1], [0], [0]>} : vector<16x8x8xf32>, vector<16x8x8xf32>, vector<16x8x8xf32> -> vector<16x8x8xf32>
    "tpu.trace_stop"() : () -> ()
    %46 = vector.broadcast %10 : vector<16x1x8xf32> to vector<16x8x8xf32>
    %47 = arith.addf %45, %46 : vector<16x8x8xf32>
    %cst_26 = arith.constant dense<0xFF800000> : vector<16x8xf32>
    %48 = vector.multi_reduction <maximumf>, %47, %cst_26 [2] : vector<16x8x8xf32> to vector<16x8xf32>
    %49 = vector.shape_cast %48 : vector<16x8xf32> to vector<16x8x1xf32>
    %50 = vector.broadcast %49 : vector<16x8x1xf32> to vector<16x8x8xf32>
    %51 = arith.subf %47, %50 : vector<16x8x8xf32>
    %52 = math.exp %51 : vector<16x8x8xf32>
    %cst_27 = arith.constant dense<0.000000e+00> : vector<16x8xf32>
    %53 = vector.multi_reduction <add>, %52, %cst_27 [2] : vector<16x8x8xf32> to vector<16x8xf32>
    %54 = vector.shape_cast %53 : vector<16x8xf32> to vector<16x8x1xf32>
    %55 = tpu.reciprocal %54 {approx = true} : vector<16x8x1xf32> -> vector<16x8x1xf32>
    %56 = vector.broadcast %55 : vector<16x8x1xf32> to vector<16x8x8xf32>
    %57 = arith.mulf %52, %56 : vector<16x8x8xf32>
    %58 = arith.truncf %57 : vector<16x8x8xf32> to vector<16x8x8xbf16>
    %59 = arith.truncf %44 : vector<16x8x8xf32> to vector<16x8x8xbf16>
    "tpu.trace_start"() <{level = 10 : i32, message = "bqk,bkd->bqd"}> : () -> ()
    %cst_28 = arith.constant dense<0.000000e+00> : vector<16x8x8xf32>
    %60 = tpu.matmul %58, %59, %cst_28 {dimension_numbers = #tpu.dot_dimension_numbers<[2], [1], [1], [2], [0, 0, 0, 1, 1, 2], [0], [0]>} : vector<16x8x8xbf16>, vector<16x8x8xbf16>, vector<16x8x8xf32> -> vector<16x8x8xf32>
    "tpu.trace_stop"() : () -> ()
    %61 = vector.shape_cast %60 : vector<16x8x8xf32> to vector<4x4x8x8xf32>
    %62 = tpu.transpose %61, [0, 2, 1, 3] : vector<4x4x8x8xf32> -> vector<4x8x4x8xf32>
    %63 = vector.shape_cast %62 : vector<4x8x4x8xf32> to vector<32x32xf32>
    %64 = arith.truncf %63 : vector<32x32xf32> to vector<32x32xbf16>
    %c0_29 = arith.constant 0 : index
    %c0_30 = arith.constant 0 : index
    %c0_31 = arith.constant 0 : index
    %65 = vector.load %arg4[%c0_29, %c0_30, %c0_31] : memref<2x32x32xbf16, #tpu.memory_space<vmem>>, vector<1x32x32xbf16>
    %66 = vector.shape_cast %65 : vector<1x32x32xbf16> to vector<32x32xbf16>
    %cst_32 = arith.constant dense<0.000000e+00> : vector<32x32xf32>
    %67 = tpu.matmul %64, %66, %cst_32 {dimension_numbers = #tpu.dot_dimension_numbers<[1], [0], [0], [1], [0, 0, 1, 1], [], []>} : vector<32x32xbf16>, vector<32x32xbf16>, vector<32x32xf32> -> vector<32x32xf32>
    %68 = vector.broadcast %14 : vector<1x32xf32> to vector<32x32xf32>
    %69 = arith.addf %67, %68 : vector<32x32xf32>
    %70 = arith.addf %1, %69 : vector<32x32xf32>
    %cst_33 = arith.constant dense<0.000000e+00> : vector<32xf32>
    %71 = vector.multi_reduction <add>, %70, %cst_33 [1] : vector<32x32xf32> to vector<32xf32>
    %72 = vector.shape_cast %71 : vector<32xf32> to vector<32x1xf32>
    %cst_34 = arith.constant 3.200000e+01 : f32
    %73 = vector.broadcast %cst_34 : f32 to vector<32x1xf32>
    %74 = arith.divf %72, %73 : vector<32x1xf32>
    %75 = vector.broadcast %74 : vector<32x1xf32> to vector<32x32xf32>
    %76 = arith.subf %70, %75 : vector<32x32xf32>
    %77 = arith.mulf %76, %76 : vector<32x32xf32>
    %cst_35 = arith.constant dense<0.000000e+00> : vector<32xf32>
    %78 = vector.multi_reduction <add>, %77, %cst_35 [1] : vector<32x32xf32> to vector<32xf32>
    %79 = vector.shape_cast %78 : vector<32xf32> to vector<32x1xf32>
    %cst_36 = arith.constant 3.200000e+01 : f32
    %80 = vector.broadcast %cst_36 : f32 to vector<32x1xf32>
    %81 = arith.divf %79, %80 : vector<32x1xf32>
    %cst_37 = arith.constant 9.99999974E-6 : f32
    %82 = vector.broadcast %cst_37 : f32 to vector<32x1xf32>
    %83 = arith.addf %81, %82 : vector<32x1xf32>
    %84 = math.rsqrt %83 : vector<32x1xf32>
    %85 = vector.broadcast %84 : vector<32x1xf32> to vector<32x32xf32>
    %86 = arith.mulf %76, %85 : vector<32x32xf32>
    %87 = vector.broadcast %16 : vector<1x32xf32> to vector<32x32xf32>
    %88 = arith.mulf %86, %87 : vector<32x32xf32>
    %89 = vector.broadcast %18 : vector<1x32xf32> to vector<32x32xf32>
    %90 = arith.addf %88, %89 : vector<32x32xf32>
    %91 = arith.truncf %90 : vector<32x32xf32> to vector<32x32xbf16>
    %c0_38 = arith.constant 0 : index
    %c0_39 = arith.constant 0 : index
    %c0_40 = arith.constant 0 : index
    %92 = vector.load %arg5[%c0_38, %c0_39, %c0_40] : memref<2x32x64xbf16, #tpu.memory_space<vmem>>, vector<1x32x64xbf16>
    %93 = vector.shape_cast %92 : vector<1x32x64xbf16> to vector<32x64xbf16>
    %cst_41 = arith.constant dense<0.000000e+00> : vector<32x64xf32>
    %94 = tpu.matmul %91, %93, %cst_41 {dimension_numbers = #tpu.dot_dimension_numbers<[1], [0], [0], [1], [0, 0, 1, 1], [], []>} : vector<32x32xbf16>, vector<32x64xbf16>, vector<32x64xf32> -> vector<32x64xf32>
    %95 = vector.broadcast %20 : vector<1x64xf32> to vector<32x64xf32>
    %96 = arith.addf %94, %95 : vector<32x64xf32>
    %97 = arith.mulf %96, %96 : vector<32x64xf32>
    %98 = arith.mulf %96, %97 : vector<32x64xf32>
    %cst_42 = arith.constant 4.471500e-02 : f32
    %99 = vector.broadcast %cst_42 : f32 to vector<32x64xf32>
    %100 = arith.mulf %99, %98 : vector<32x64xf32>
    %101 = arith.addf %96, %100 : vector<32x64xf32>
    %cst_43 = arith.constant 0.797884583 : f32
    %102 = vector.broadcast %cst_43 : f32 to vector<32x64xf32>
    %103 = arith.mulf %102, %101 : vector<32x64xf32>
    %104 = math.tanh %103 : vector<32x64xf32>
    %cst_44 = arith.constant 1.000000e+00 : f32
    %105 = vector.broadcast %cst_44 : f32 to vector<32x64xf32>
    %106 = arith.addf %105, %104 : vector<32x64xf32>
    %cst_45 = arith.constant 5.000000e-01 : f32
    %107 = vector.broadcast %cst_45 : f32 to vector<32x64xf32>
    %108 = arith.mulf %107, %106 : vector<32x64xf32>
    %109 = arith.mulf %96, %108 : vector<32x64xf32>
    %110 = arith.truncf %109 : vector<32x64xf32> to vector<32x64xbf16>
    %c0_46 = arith.constant 0 : index
    %c0_47 = arith.constant 0 : index
    %c0_48 = arith.constant 0 : index
    %111 = vector.load %arg6[%c0_46, %c0_47, %c0_48] : memref<2x64x32xbf16, #tpu.memory_space<vmem>>, vector<1x64x32xbf16>
    %112 = vector.shape_cast %111 : vector<1x64x32xbf16> to vector<64x32xbf16>
    %cst_49 = arith.constant dense<0.000000e+00> : vector<32x32xf32>
    %113 = tpu.matmul %110, %112, %cst_49 {dimension_numbers = #tpu.dot_dimension_numbers<[1], [0], [0], [1], [0, 0, 1, 1], [], []>} : vector<32x64xbf16>, vector<64x32xbf16>, vector<32x32xf32> -> vector<32x32xf32>
    %114 = vector.broadcast %22 : vector<1x32xf32> to vector<32x32xf32>
    %115 = arith.addf %113, %114 : vector<32x32xf32>
    %116 = arith.addf %90, %115 : vector<32x32xf32>
    %cst_50 = arith.constant dense<0.000000e+00> : vector<32xf32>
    %117 = vector.multi_reduction <add>, %116, %cst_50 [1] : vector<32x32xf32> to vector<32xf32>
    %118 = vector.shape_cast %117 : vector<32xf32> to vector<32x1xf32>
    %cst_51 = arith.constant 3.200000e+01 : f32
    %119 = vector.broadcast %cst_51 : f32 to vector<32x1xf32>
    %120 = arith.divf %118, %119 : vector<32x1xf32>
    %121 = vector.broadcast %120 : vector<32x1xf32> to vector<32x32xf32>
    %122 = arith.subf %116, %121 : vector<32x32xf32>
    %123 = arith.mulf %122, %122 : vector<32x32xf32>
    %cst_52 = arith.constant dense<0.000000e+00> : vector<32xf32>
    %124 = vector.multi_reduction <add>, %123, %cst_52 [1] : vector<32x32xf32> to vector<32xf32>
    %125 = vector.shape_cast %124 : vector<32xf32> to vector<32x1xf32>
    %cst_53 = arith.constant 3.200000e+01 : f32
    %126 = vector.broadcast %cst_53 : f32 to vector<32x1xf32>
    %127 = arith.divf %125, %126 : vector<32x1xf32>
    %cst_54 = arith.constant 9.99999974E-6 : f32
    %128 = vector.broadcast %cst_54 : f32 to vector<32x1xf32>
    %129 = arith.addf %127, %128 : vector<32x1xf32>
    %130 = math.rsqrt %129 : vector<32x1xf32>
    %131 = vector.broadcast %130 : vector<32x1xf32> to vector<32x32xf32>
    %132 = arith.mulf %122, %131 : vector<32x32xf32>
    %133 = vector.broadcast %24 : vector<1x32xf32> to vector<32x32xf32>
    %134 = arith.mulf %132, %133 : vector<32x32xf32>
    %135 = vector.broadcast %26 : vector<1x32xf32> to vector<32x32xf32>
    %136 = arith.addf %134, %135 : vector<32x32xf32>
    %c1_55 = arith.constant 1 : index
    %c0_56 = arith.constant 0 : index
    %c0_57 = arith.constant 0 : index
    %137 = vector.load %arg7[%c1_55, %c0_56, %c0_57] : memref<2x8x128xf32, #tpu.memory_space<vmem>>, vector<1x1x96xf32>
    %138 = vector.shape_cast %137 : vector<1x1x96xf32> to vector<1x96xf32>
    %c1_58 = arith.constant 1 : index
    %c1_59 = arith.constant 1 : index
    %c0_60 = arith.constant 0 : index
    %139 = vector.load %arg7[%c1_58, %c1_59, %c0_60] : memref<2x8x128xf32, #tpu.memory_space<vmem>>, vector<1x1x32xf32>
    %140 = vector.shape_cast %139 : vector<1x1x32xf32> to vector<1x32xf32>
    %c1_61 = arith.constant 1 : index
    %c2_62 = arith.constant 2 : index
    %c0_63 = arith.constant 0 : index
    %141 = vector.load %arg7[%c1_61, %c2_62, %c0_63] : memref<2x8x128xf32, #tpu.memory_space<vmem>>, vector<1x1x32xf32>
    %142 = vector.shape_cast %141 : vector<1x1x32xf32> to vector<1x32xf32>
    %c1_64 = arith.constant 1 : index
    %c3_65 = arith.constant 3 : index
    %c0_66 = arith.constant 0 : index
    %143 = vector.load %arg7[%c1_64, %c3_65, %c0_66] : memref<2x8x128xf32, #tpu.memory_space<vmem>>, vector<1x1x32xf32>
    %144 = vector.shape_cast %143 : vector<1x1x32xf32> to vector<1x32xf32>
    %c1_67 = arith.constant 1 : index
    %c4_68 = arith.constant 4 : index
    %c0_69 = arith.constant 0 : index
    %145 = vector.load %arg7[%c1_67, %c4_68, %c0_69] : memref<2x8x128xf32, #tpu.memory_space<vmem>>, vector<1x1x64xf32>
    %146 = vector.shape_cast %145 : vector<1x1x64xf32> to vector<1x64xf32>
    %c1_70 = arith.constant 1 : index
    %c5_71 = arith.constant 5 : index
    %c0_72 = arith.constant 0 : index
    %147 = vector.load %arg7[%c1_70, %c5_71, %c0_72] : memref<2x8x128xf32, #tpu.memory_space<vmem>>, vector<1x1x32xf32>
    %148 = vector.shape_cast %147 : vector<1x1x32xf32> to vector<1x32xf32>
    %c1_73 = arith.constant 1 : index
    %c6_74 = arith.constant 6 : index
    %c0_75 = arith.constant 0 : index
    %149 = vector.load %arg7[%c1_73, %c6_74, %c0_75] : memref<2x8x128xf32, #tpu.memory_space<vmem>>, vector<1x1x32xf32>
    %150 = vector.shape_cast %149 : vector<1x1x32xf32> to vector<1x32xf32>
    %c1_76 = arith.constant 1 : index
    %c7_77 = arith.constant 7 : index
    %c0_78 = arith.constant 0 : index
    %151 = vector.load %arg7[%c1_76, %c7_77, %c0_78] : memref<2x8x128xf32, #tpu.memory_space<vmem>>, vector<1x1x32xf32>
    %152 = vector.shape_cast %151 : vector<1x1x32xf32> to vector<1x32xf32>
    %153 = arith.truncf %136 : vector<32x32xf32> to vector<32x32xbf16>
    %c1_79 = arith.constant 1 : index
    %c0_80 = arith.constant 0 : index
    %c0_81 = arith.constant 0 : index
    %154 = vector.load %arg3[%c1_79, %c0_80, %c0_81] : memref<2x32x96xbf16, #tpu.memory_space<vmem>>, vector<1x32x96xbf16>
    %155 = vector.shape_cast %154 : vector<1x32x96xbf16> to vector<32x96xbf16>
    %cst_82 = arith.constant dense<0.000000e+00> : vector<32x96xf32>
    %156 = tpu.matmul %153, %155, %cst_82 {dimension_numbers = #tpu.dot_dimension_numbers<[1], [0], [0], [1], [0, 0, 1, 1], [], []>} : vector<32x32xbf16>, vector<32x96xbf16>, vector<32x96xf32> -> vector<32x96xf32>
    %157 = vector.broadcast %138 : vector<1x96xf32> to vector<32x96xf32>
    %158 = arith.addf %156, %157 : vector<32x96xf32>
    %159 = vector.extract_strided_slice %158 {offsets = [0, 0], sizes = [32, 32], strides = [1, 1]} : vector<32x96xf32> to vector<32x32xf32>
    %160 = vector.shape_cast %159 : vector<32x32xf32> to vector<4x8x4x8xf32>
    %161 = tpu.transpose %160, [0, 2, 1, 3] : vector<4x8x4x8xf32> -> vector<4x4x8x8xf32>
    %162 = vector.shape_cast %161 : vector<4x4x8x8xf32> to vector<16x8x8xf32>
    %163 = vector.extract_strided_slice %158 {offsets = [0, 32], sizes = [32, 32], strides = [1, 1]} : vector<32x96xf32> to vector<32x32xf32>
    %164 = vector.shape_cast %163 : vector<32x32xf32> to vector<4x8x4x8xf32>
    %165 = tpu.transpose %164, [0, 2, 1, 3] : vector<4x8x4x8xf32> -> vector<4x4x8x8xf32>
    %166 = vector.shape_cast %165 : vector<4x4x8x8xf32> to vector<16x8x8xf32>
    %167 = vector.extract_strided_slice %158 {offsets = [0, 64], sizes = [32, 32], strides = [1, 1]} : vector<32x96xf32> to vector<32x32xf32>
    %168 = vector.shape_cast %167 : vector<32x32xf32> to vector<4x8x4x8xf32>
    %169 = tpu.transpose %168, [0, 2, 1, 3] : vector<4x8x4x8xf32> -> vector<4x4x8x8xf32>
    %170 = vector.shape_cast %169 : vector<4x4x8x8xf32> to vector<16x8x8xf32>
    "tpu.trace_start"() <{level = 10 : i32, message = "bqd,bkd->bqk"}> : () -> ()
    %cst_83 = arith.constant dense<0.000000e+00> : vector<16x8x8xf32>
    %171 = tpu.matmul %162, %166, %cst_83 {dimension_numbers = #tpu.dot_dimension_numbers<[2], [2], [1], [1], [0, 0, 0, 1, 1, 1], [0], [0]>} : vector<16x8x8xf32>, vector<16x8x8xf32>, vector<16x8x8xf32> -> vector<16x8x8xf32>
    "tpu.trace_stop"() : () -> ()
    %172 = vector.broadcast %10 : vector<16x1x8xf32> to vector<16x8x8xf32>
    %173 = arith.addf %171, %172 : vector<16x8x8xf32>
    %cst_84 = arith.constant dense<0xFF800000> : vector<16x8xf32>
    %174 = vector.multi_reduction <maximumf>, %173, %cst_84 [2] : vector<16x8x8xf32> to vector<16x8xf32>
    %175 = vector.shape_cast %174 : vector<16x8xf32> to vector<16x8x1xf32>
    %176 = vector.broadcast %175 : vector<16x8x1xf32> to vector<16x8x8xf32>
    %177 = arith.subf %173, %176 : vector<16x8x8xf32>
    %178 = math.exp %177 : vector<16x8x8xf32>
    %cst_85 = arith.constant dense<0.000000e+00> : vector<16x8xf32>
    %179 = vector.multi_reduction <add>, %178, %cst_85 [2] : vector<16x8x8xf32> to vector<16x8xf32>
    %180 = vector.shape_cast %179 : vector<16x8xf32> to vector<16x8x1xf32>
    %181 = tpu.reciprocal %180 {approx = true} : vector<16x8x1xf32> -> vector<16x8x1xf32>
    %182 = vector.broadcast %181 : vector<16x8x1xf32> to vector<16x8x8xf32>
    %183 = arith.mulf %178, %182 : vector<16x8x8xf32>
    %184 = arith.truncf %183 : vector<16x8x8xf32> to vector<16x8x8xbf16>
    %185 = arith.truncf %170 : vector<16x8x8xf32> to vector<16x8x8xbf16>
    "tpu.trace_start"() <{level = 10 : i32, message = "bqk,bkd->bqd"}> : () -> ()
    %cst_86 = arith.constant dense<0.000000e+00> : vector<16x8x8xf32>
    %186 = tpu.matmul %184, %185, %cst_86 {dimension_numbers = #tpu.dot_dimension_numbers<[2], [1], [1], [2], [0, 0, 0, 1, 1, 2], [0], [0]>} : vector<16x8x8xbf16>, vector<16x8x8xbf16>, vector<16x8x8xf32> -> vector<16x8x8xf32>
    "tpu.trace_stop"() : () -> ()
    %187 = vector.shape_cast %186 : vector<16x8x8xf32> to vector<4x4x8x8xf32>
    %188 = tpu.transpose %187, [0, 2, 1, 3] : vector<4x4x8x8xf32> -> vector<4x8x4x8xf32>
    %189 = vector.shape_cast %188 : vector<4x8x4x8xf32> to vector<32x32xf32>
    %190 = arith.truncf %189 : vector<32x32xf32> to vector<32x32xbf16>
    %c1_87 = arith.constant 1 : index
    %c0_88 = arith.constant 0 : index
    %c0_89 = arith.constant 0 : index
    %191 = vector.load %arg4[%c1_87, %c0_88, %c0_89] : memref<2x32x32xbf16, #tpu.memory_space<vmem>>, vector<1x32x32xbf16>
    %192 = vector.shape_cast %191 : vector<1x32x32xbf16> to vector<32x32xbf16>
    %cst_90 = arith.constant dense<0.000000e+00> : vector<32x32xf32>
    %193 = tpu.matmul %190, %192, %cst_90 {dimension_numbers = #tpu.dot_dimension_numbers<[1], [0], [0], [1], [0, 0, 1, 1], [], []>} : vector<32x32xbf16>, vector<32x32xbf16>, vector<32x32xf32> -> vector<32x32xf32>
    %194 = vector.broadcast %140 : vector<1x32xf32> to vector<32x32xf32>
    %195 = arith.addf %193, %194 : vector<32x32xf32>
    %196 = arith.addf %136, %195 : vector<32x32xf32>
    %cst_91 = arith.constant dense<0.000000e+00> : vector<32xf32>
    %197 = vector.multi_reduction <add>, %196, %cst_91 [1] : vector<32x32xf32> to vector<32xf32>
    %198 = vector.shape_cast %197 : vector<32xf32> to vector<32x1xf32>
    %cst_92 = arith.constant 3.200000e+01 : f32
    %199 = vector.broadcast %cst_92 : f32 to vector<32x1xf32>
    %200 = arith.divf %198, %199 : vector<32x1xf32>
    %201 = vector.broadcast %200 : vector<32x1xf32> to vector<32x32xf32>
    %202 = arith.subf %196, %201 : vector<32x32xf32>
    %203 = arith.mulf %202, %202 : vector<32x32xf32>
    %cst_93 = arith.constant dense<0.000000e+00> : vector<32xf32>
    %204 = vector.multi_reduction <add>, %203, %cst_93 [1] : vector<32x32xf32> to vector<32xf32>
    %205 = vector.shape_cast %204 : vector<32xf32> to vector<32x1xf32>
    %cst_94 = arith.constant 3.200000e+01 : f32
    %206 = vector.broadcast %cst_94 : f32 to vector<32x1xf32>
    %207 = arith.divf %205, %206 : vector<32x1xf32>
    %cst_95 = arith.constant 9.99999974E-6 : f32
    %208 = vector.broadcast %cst_95 : f32 to vector<32x1xf32>
    %209 = arith.addf %207, %208 : vector<32x1xf32>
    %210 = math.rsqrt %209 : vector<32x1xf32>
    %211 = vector.broadcast %210 : vector<32x1xf32> to vector<32x32xf32>
    %212 = arith.mulf %202, %211 : vector<32x32xf32>
    %213 = vector.broadcast %142 : vector<1x32xf32> to vector<32x32xf32>
    %214 = arith.mulf %212, %213 : vector<32x32xf32>
    %215 = vector.broadcast %144 : vector<1x32xf32> to vector<32x32xf32>
    %216 = arith.addf %214, %215 : vector<32x32xf32>
    %217 = arith.truncf %216 : vector<32x32xf32> to vector<32x32xbf16>
    %c1_96 = arith.constant 1 : index
    %c0_97 = arith.constant 0 : index
    %c0_98 = arith.constant 0 : index
    %218 = vector.load %arg5[%c1_96, %c0_97, %c0_98] : memref<2x32x64xbf16, #tpu.memory_space<vmem>>, vector<1x32x64xbf16>
    %219 = vector.shape_cast %218 : vector<1x32x64xbf16> to vector<32x64xbf16>
    %cst_99 = arith.constant dense<0.000000e+00> : vector<32x64xf32>
    %220 = tpu.matmul %217, %219, %cst_99 {dimension_numbers = #tpu.dot_dimension_numbers<[1], [0], [0], [1], [0, 0, 1, 1], [], []>} : vector<32x32xbf16>, vector<32x64xbf16>, vector<32x64xf32> -> vector<32x64xf32>
    %221 = vector.broadcast %146 : vector<1x64xf32> to vector<32x64xf32>
    %222 = arith.addf %220, %221 : vector<32x64xf32>
    %223 = arith.mulf %222, %222 : vector<32x64xf32>
    %224 = arith.mulf %222, %223 : vector<32x64xf32>
    %cst_100 = arith.constant 4.471500e-02 : f32
    %225 = vector.broadcast %cst_100 : f32 to vector<32x64xf32>
    %226 = arith.mulf %225, %224 : vector<32x64xf32>
    %227 = arith.addf %222, %226 : vector<32x64xf32>
    %cst_101 = arith.constant 0.797884583 : f32
    %228 = vector.broadcast %cst_101 : f32 to vector<32x64xf32>
    %229 = arith.mulf %228, %227 : vector<32x64xf32>
    %230 = math.tanh %229 : vector<32x64xf32>
    %cst_102 = arith.constant 1.000000e+00 : f32
    %231 = vector.broadcast %cst_102 : f32 to vector<32x64xf32>
    %232 = arith.addf %231, %230 : vector<32x64xf32>
    %cst_103 = arith.constant 5.000000e-01 : f32
    %233 = vector.broadcast %cst_103 : f32 to vector<32x64xf32>
    %234 = arith.mulf %233, %232 : vector<32x64xf32>
    %235 = arith.mulf %222, %234 : vector<32x64xf32>
    %236 = arith.truncf %235 : vector<32x64xf32> to vector<32x64xbf16>
    %c1_104 = arith.constant 1 : index
    %c0_105 = arith.constant 0 : index
    %c0_106 = arith.constant 0 : index
    %237 = vector.load %arg6[%c1_104, %c0_105, %c0_106] : memref<2x64x32xbf16, #tpu.memory_space<vmem>>, vector<1x64x32xbf16>
    %238 = vector.shape_cast %237 : vector<1x64x32xbf16> to vector<64x32xbf16>
    %cst_107 = arith.constant dense<0.000000e+00> : vector<32x32xf32>
    %239 = tpu.matmul %236, %238, %cst_107 {dimension_numbers = #tpu.dot_dimension_numbers<[1], [0], [0], [1], [0, 0, 1, 1], [], []>} : vector<32x64xbf16>, vector<64x32xbf16>, vector<32x32xf32> -> vector<32x32xf32>
    %240 = vector.broadcast %148 : vector<1x32xf32> to vector<32x32xf32>
    %241 = arith.addf %239, %240 : vector<32x32xf32>
    %242 = arith.addf %216, %241 : vector<32x32xf32>
    %cst_108 = arith.constant dense<0.000000e+00> : vector<32xf32>
    %243 = vector.multi_reduction <add>, %242, %cst_108 [1] : vector<32x32xf32> to vector<32xf32>
    %244 = vector.shape_cast %243 : vector<32xf32> to vector<32x1xf32>
    %cst_109 = arith.constant 3.200000e+01 : f32
    %245 = vector.broadcast %cst_109 : f32 to vector<32x1xf32>
    %246 = arith.divf %244, %245 : vector<32x1xf32>
    %247 = vector.broadcast %246 : vector<32x1xf32> to vector<32x32xf32>
    %248 = arith.subf %242, %247 : vector<32x32xf32>
    %249 = arith.mulf %248, %248 : vector<32x32xf32>
    %cst_110 = arith.constant dense<0.000000e+00> : vector<32xf32>
    %250 = vector.multi_reduction <add>, %249, %cst_110 [1] : vector<32x32xf32> to vector<32xf32>
    %251 = vector.shape_cast %250 : vector<32xf32> to vector<32x1xf32>
    %cst_111 = arith.constant 3.200000e+01 : f32
    %252 = vector.broadcast %cst_111 : f32 to vector<32x1xf32>
    %253 = arith.divf %251, %252 : vector<32x1xf32>
    %cst_112 = arith.constant 9.99999974E-6 : f32
    %254 = vector.broadcast %cst_112 : f32 to vector<32x1xf32>
    %255 = arith.addf %253, %254 : vector<32x1xf32>
    %256 = math.rsqrt %255 : vector<32x1xf32>
    %257 = vector.broadcast %256 : vector<32x1xf32> to vector<32x32xf32>
    %258 = arith.mulf %248, %257 : vector<32x32xf32>
    %259 = vector.broadcast %150 : vector<1x32xf32> to vector<32x32xf32>
    %260 = arith.mulf %258, %259 : vector<32x32xf32>
    %261 = vector.broadcast %152 : vector<1x32xf32> to vector<32x32xf32>
    %262 = arith.addf %260, %261 : vector<32x32xf32>
    %263 = vector.shape_cast %262 : vector<32x32xf32> to vector<4x8x32xf32>
    %264 = vector.shape_cast %2 : vector<4x8xf32> to vector<4x8x1xf32>
    %265 = vector.broadcast %264 : vector<4x8x1xf32> to vector<4x8x32xf32>
    %266 = arith.mulf %263, %265 : vector<4x8x32xf32>
    %cst_113 = arith.constant dense<0.000000e+00> : vector<4x32xf32>
    %267 = vector.multi_reduction <add>, %266, %cst_113 [1] : vector<4x8x32xf32> to vector<4x32xf32>
    %cst_114 = arith.constant dense<0.000000e+00> : vector<4xf32>
    %268 = vector.multi_reduction <add>, %2, %cst_114 [1] : vector<4x8xf32> to vector<4xf32>
    %269 = vector.shape_cast %268 : vector<4xf32> to vector<4x1xf32>
    %cst_115 = arith.constant 9.99999971E-10 : f32
    %270 = vector.broadcast %cst_115 : f32 to vector<4x1xf32>
    %271 = arith.maximumf %269, %270 : vector<4x1xf32>
    %272 = tpu.reciprocal %271 {approx = true} : vector<4x1xf32> -> vector<4x1xf32>
    %273 = vector.broadcast %272 : vector<4x1xf32> to vector<4x32xf32>
    %274 = arith.mulf %267, %273 : vector<4x32xf32>
    %275 = arith.mulf %274, %274 : vector<4x32xf32>
    %cst_116 = arith.constant dense<0.000000e+00> : vector<4xf32>
    %276 = vector.multi_reduction <add>, %275, %cst_116 [1] : vector<4x32xf32> to vector<4xf32>
    %277 = vector.shape_cast %276 : vector<4xf32> to vector<4x1xf32>
    %cst_117 = arith.constant 1.000000e-24 : f32
    %278 = vector.broadcast %cst_117 : f32 to vector<4x1xf32>
    %279 = arith.addf %277, %278 : vector<4x1xf32>
    %280 = math.rsqrt %279 : vector<4x1xf32>
    %281 = vector.broadcast %280 : vector<4x1xf32> to vector<4x32xf32>
    %282 = arith.mulf %274, %281 : vector<4x32xf32>
    %283 = vector.extract_strided_slice %282 {offsets = [0, 0], sizes = [2, 32], strides = [1, 1]} : vector<4x32xf32> to vector<2x32xf32>
    %284 = vector.extract_strided_slice %282 {offsets = [2, 0], sizes = [2, 32], strides = [1, 1]} : vector<4x32xf32> to vector<2x32xf32>
    %285 = tpu.concatenate %283, %284 in 1 : vector<2x32xf32>, vector<2x32xf32> -> vector<2x64xf32>
    %286 = arith.truncf %285 : vector<2x64xf32> to vector<2x64xbf16>
    %c0_118 = arith.constant 0 : index
    %c0_119 = arith.constant 0 : index
    %287 = vector.load %arg8[%c0_118, %c0_119] : memref<192x48xbf16, #tpu.memory_space<vmem>>, vector<64x48xbf16>
    %c64 = arith.constant 64 : index
    %c0_120 = arith.constant 0 : index
    %288 = vector.load %arg8[%c64, %c0_120] : memref<192x48xbf16, #tpu.memory_space<vmem>>, vector<48x40xbf16>
    %c112 = arith.constant 112 : index
    %c0_121 = arith.constant 0 : index
    %289 = vector.load %arg8[%c112, %c0_121] : memref<192x48xbf16, #tpu.memory_space<vmem>>, vector<40x40xbf16>
    %c152 = arith.constant 152 : index
    %c0_122 = arith.constant 0 : index
    %290 = vector.load %arg8[%c152, %c0_122] : memref<192x48xbf16, #tpu.memory_space<vmem>>, vector<40x32xbf16>
    %c0_123 = arith.constant 0 : index
    %c0_124 = arith.constant 0 : index
    %291 = vector.load %arg9[%c0_123, %c0_124] : memref<4x48xf32, #tpu.memory_space<vmem>>, vector<1x48xf32>
    %c1_125 = arith.constant 1 : index
    %c0_126 = arith.constant 0 : index
    %292 = vector.load %arg9[%c1_125, %c0_126] : memref<4x48xf32, #tpu.memory_space<vmem>>, vector<1x40xf32>
    %c2_127 = arith.constant 2 : index
    %c0_128 = arith.constant 0 : index
    %293 = vector.load %arg9[%c2_127, %c0_128] : memref<4x48xf32, #tpu.memory_space<vmem>>, vector<1x40xf32>
    %c3_129 = arith.constant 3 : index
    %c0_130 = arith.constant 0 : index
    %294 = vector.load %arg9[%c3_129, %c0_130] : memref<4x48xf32, #tpu.memory_space<vmem>>, vector<1x32xf32>
    %cst_131 = arith.constant dense<0.000000e+00> : vector<2x48xf32>
    %295 = tpu.matmul %286, %287, %cst_131 {dimension_numbers = #tpu.dot_dimension_numbers<[1], [0], [0], [1], [0, 0, 1, 1], [], []>} : vector<2x64xbf16>, vector<64x48xbf16>, vector<2x48xf32> -> vector<2x48xf32>
    %296 = vector.broadcast %291 : vector<1x48xf32> to vector<2x48xf32>
    %297 = arith.addf %295, %296 : vector<2x48xf32>
    %cst_132 = arith.constant 0.000000e+00 : f32
    %298 = vector.broadcast %cst_132 : f32 to vector<2x48xf32>
    %299 = arith.maximumf %297, %298 : vector<2x48xf32>
    %300 = arith.truncf %299 : vector<2x48xf32> to vector<2x48xbf16>
    %cst_133 = arith.constant dense<0.000000e+00> : vector<2x40xf32>
    %301 = tpu.matmul %300, %288, %cst_133 {dimension_numbers = #tpu.dot_dimension_numbers<[1], [0], [0], [1], [0, 0, 1, 1], [], []>} : vector<2x48xbf16>, vector<48x40xbf16>, vector<2x40xf32> -> vector<2x40xf32>
    %302 = vector.broadcast %292 : vector<1x40xf32> to vector<2x40xf32>
    %303 = arith.addf %301, %302 : vector<2x40xf32>
    %cst_134 = arith.constant 0.000000e+00 : f32
    %304 = vector.broadcast %cst_134 : f32 to vector<2x40xf32>
    %305 = arith.maximumf %303, %304 : vector<2x40xf32>
    %306 = arith.truncf %305 : vector<2x40xf32> to vector<2x40xbf16>
    %cst_135 = arith.constant dense<0.000000e+00> : vector<2x40xf32>
    %307 = tpu.matmul %306, %289, %cst_135 {dimension_numbers = #tpu.dot_dimension_numbers<[1], [0], [0], [1], [0, 0, 1, 1], [], []>} : vector<2x40xbf16>, vector<40x40xbf16>, vector<2x40xf32> -> vector<2x40xf32>
    %308 = vector.broadcast %293 : vector<1x40xf32> to vector<2x40xf32>
    %309 = arith.addf %307, %308 : vector<2x40xf32>
    %cst_136 = arith.constant 0.000000e+00 : f32
    %310 = vector.broadcast %cst_136 : f32 to vector<2x40xf32>
    %311 = arith.maximumf %309, %310 : vector<2x40xf32>
    %312 = arith.truncf %311 : vector<2x40xf32> to vector<2x40xbf16>
    %cst_137 = arith.constant dense<0.000000e+00> : vector<2x32xf32>
    %313 = tpu.matmul %312, %290, %cst_137 {dimension_numbers = #tpu.dot_dimension_numbers<[1], [0], [0], [1], [0, 0, 1, 1], [], []>} : vector<2x40xbf16>, vector<40x32xbf16>, vector<2x32xf32> -> vector<2x32xf32>
    %314 = vector.broadcast %294 : vector<1x32xf32> to vector<2x32xf32>
    %315 = arith.addf %313, %314 : vector<2x32xf32>
    %316 = arith.mulf %315, %315 : vector<2x32xf32>
    %cst_138 = arith.constant dense<0.000000e+00> : vector<2xf32>
    %317 = vector.multi_reduction <add>, %316, %cst_138 [1] : vector<2x32xf32> to vector<2xf32>
    %318 = vector.shape_cast %317 : vector<2xf32> to vector<2x1xf32>
    %cst_139 = arith.constant 1.000000e-24 : f32
    %319 = vector.broadcast %cst_139 : f32 to vector<2x1xf32>
    %320 = arith.addf %318, %319 : vector<2x1xf32>
    %321 = math.rsqrt %320 : vector<2x1xf32>
    %322 = vector.broadcast %321 : vector<2x1xf32> to vector<2x32xf32>
    %323 = arith.mulf %315, %322 : vector<2x32xf32>
    %c0_140 = arith.constant 0 : index
    %c0_141 = arith.constant 0 : index
    %324 = vector.load %arg10[%c0_140, %c0_141] : memref<2x32xf32, #tpu.memory_space<vmem>>, vector<2x32xf32>
    tpu.vector_store %arg10[%c0_140, %c0_141], %323 {strides = array<i32>} : memref<2x32xf32, #tpu.memory_space<vmem>>, vector<2x32xf32>,
    return
  }
  func.func @transform_0(%arg0: i32) -> (i32, i32) {
    %c0_i32 = arith.constant 0 : i32
    %c0_i32_0 = arith.constant 0 : i32
    %c0_i32_1 = arith.constant 0 : i32
    return %c0_i32, %c0_i32_0 : i32, i32
  }
  func.func @transform_1(%arg0: i32) -> (i32, i32) {
    %c0_i32 = arith.constant 0 : i32
    %c0_i32_0 = arith.constant 0 : i32
    %c0_i32_1 = arith.constant 0 : i32
    return %c0_i32, %c0_i32_0 : i32, i32
  }
  func.func @transform_2(%arg0: i32) -> (i32, i32, i32) {
    %c0_i32 = arith.constant 0 : i32
    %c0_i32_0 = arith.constant 0 : i32
    %c0_i32_1 = arith.constant 0 : i32
    %c0_i32_2 = arith.constant 0 : i32
    return %c0_i32, %c0_i32_0, %c0_i32_1 : i32, i32, i32
  }
  func.func @transform_3(%arg0: i32) -> (i32, i32, i32) {
    %c0_i32 = arith.constant 0 : i32
    %c0_i32_0 = arith.constant 0 : i32
    %c0_i32_1 = arith.constant 0 : i32
    %c0_i32_2 = arith.constant 0 : i32
    return %c0_i32, %c0_i32_0, %c0_i32_1 : i32, i32, i32
  }
  func.func @transform_4(%arg0: i32) -> (i32, i32, i32) {
    %c0_i32 = arith.constant 0 : i32
    %c0_i32_0 = arith.constant 0 : i32
    %c0_i32_1 = arith.constant 0 : i32
    %c0_i32_2 = arith.constant 0 : i32
    return %c0_i32, %c0_i32_0, %c0_i32_1 : i32, i32, i32
  }
  func.func @transform_5(%arg0: i32) -> (i32, i32, i32) {
    %c0_i32 = arith.constant 0 : i32
    %c0_i32_0 = arith.constant 0 : i32
    %c0_i32_1 = arith.constant 0 : i32
    %c0_i32_2 = arith.constant 0 : i32
    return %c0_i32, %c0_i32_0, %c0_i32_1 : i32, i32, i32
  }
  func.func @transform_6(%arg0: i32) -> (i32, i32, i32) {
    %c0_i32 = arith.constant 0 : i32
    %c0_i32_0 = arith.constant 0 : i32
    %c0_i32_1 = arith.constant 0 : i32
    %c0_i32_2 = arith.constant 0 : i32
    return %c0_i32, %c0_i32_0, %c0_i32_1 : i32, i32, i32
  }
  func.func @transform_7(%arg0: i32) -> (i32, i32) {
    %c0_i32 = arith.constant 0 : i32
    %c0_i32_0 = arith.constant 0 : i32
    %c0_i32_1 = arith.constant 0 : i32
    return %c0_i32, %c0_i32_0 : i32, i32
  }
  func.func @transform_8(%arg0: i32) -> (i32, i32) {
    %c0_i32 = arith.constant 0 : i32
    %c0_i32_0 = arith.constant 0 : i32
    %c0_i32_1 = arith.constant 0 : i32
    return %c0_i32, %c0_i32_0 : i32, i32
  }
  func.func @transform_9(%arg0: i32) -> (i32, i32) {
    %c0_i32 = arith.constant 0 : i32
    %c0_i32_0 = arith.constant 0 : i32
    %c0_i32_1 = arith.constant 0 : i32
    return %c0_i32, %c0_i32_0 : i32, i32
  }
}

</mosaic_0001>

<bundles_post_ra>
// kernel: tpu_custom_call.1
= control target key start
LH: loop header
LB: loop body
LE: loop exit
PB: predicated region body
PF: predicated region fallthrough
CT: control target
= control target key end

     0   :  { %vm108_vm0 = vcmask 261120   ;;  %s14303_s0 = inlined_call_operand.vmem [shape: bf16[32,32], index: 0, kind: input, shape index: {}]   ;;  %s14304_s1 = inlined_call_operand.vmem [shape: f32[4,8], index: 1, kind: input, shape index: {}]   ;;  %s14305_s2 = inlined_call_operand.vmem [shape: bf16[2,32,96], index: 2, kind: input, shape index: {}]   ;;  %s14306_s3 = inlined_call_operand.vmem [shape: bf16[2,32,32], index: 3, kind: input, shape index: {}]   ;;  %s14307_s4 = inlined_call_operand.vmem [shape: bf16[2,32,64], index: 4, kind: input, shape index: {}]   ;;  %s14308_s5 = inlined_call_operand.vmem [shape: bf16[2,64,32], index: 5, kind: input, shape index: {}]   ;;  %s14309_s6 = inlined_call_operand.vmem [shape: f32[2,8,128], index: 6, kind: input, shape index: {}]   ;;  %s14310_s7 = inlined_call_operand.vmem [shape: bf16[192,48], index: 7, kind: input, shape index: {}]   ;;  %s14311_s8 = inlined_call_operand.vmem [shape: f32[4,48], index: 8, kind: input, shape index: {}]   ;;  %s14312_s9 = inlined_call_operand.hbm [shape: f32[2,32], index: 9, kind: output, shape index: {}]  }
   0x1   :  { %v11636_v0 = vld [vmem:[%s14305_s2 + $0x8] sm:$0xff]   ;;  %v11637_v1 = vld [vmem:[%s14305_s2] sm:$0xff]  }
   0x2   :  { %11095 = vmatprep.subr.bf16.mxu0 %v11636_v0  ;;  %v34_v2 = vld [vmem:[%s14303_s0] sm:$0xff]   ;;  %v36_v3 = vld [vmem:[%s14303_s0 + $0x8] sm:$0xff]  }
   0x3   :  { %11096 = vmatpush3.bf16.msra.mxu0 %v11636_v0  ;;  %11099 = vmatprep.mubr.msk.bf16.mxu0 %vm108_vm0, %v34_v2 }
   0x4   :  { %11097 = vmatprep.subr.bf16.mxu0 %v11637_v1 }
   0x7   :  { %11098 = vmatpush3.bf16.msra.mxu0 %v11637_v1 }
   0xa   :  { %11100 = vmatmul.mubr.msk.bf16.vlgmr.msra.gmra.mxu0 %vm108_vm0, %v36_v3 }
   0xb   :  { %14 = vsyncpa [#allocation3], 0  ;;  %v10651_v5 = vld [vmem:[%s14309_s6] ss:$0 sm:$0xff]  ;;  %s11880_s19 = smov 104   ;;  %s11881_s20 = smov 120   ;;  %v49_v26 = vlaneseq }
   0xc   :  { %s11882_s21 = smov 112   ;;  %s11883_s22 = smov 96   ;;  %v11884_v21 = vmov 0.0   ;;  %vm11885_vm1 = vmmov 0   ;;  %v11887_v27 = vmov 1983009808  }
   0xd   :  { %11103 = vmatprep.subr.mxu0 %v11884_v21  ;;  %11108 = vmatprep.subr.mxu1 %v11884_v21  ;;  %s11886_s23 = smov 64   ;;  %v207_v28 = vunpack.c.l.s4 %v11887_v27  ;;  %v12070_v29 = vshrl.u32 %v49_v26, 7  ;;  %v11888_v31 = vmov 1934713408   ;;  %vm1952_vm2 = vcmask 64512   ;;  %s11890_s26 = smov 8  }
   0xe   :  { %11105 = vmatprep.mubr.msk.f32.mxu0 %vm11885_vm1, %v11884_v21  ;;  %11110 = vmatprep.mubr.msk.f32.mxu1 %vm11885_vm1, %v11884_v21  ;;  %v239_v32 = vunpack.c.l.s4 %v11888_v31  ;;  %vm3380_vm3 = vcmask 1043456   ;;  %s11891_s27 = smov 16   ;;  %s11892_s28 = smov 24   ;;  %vm4710_vm4 = vcmask 130048   ;;  %vm4715_vm5 = vcmask 195584  }
   0xf   :  { %v208_v30 = vunpack.c.0.s8 %v207_v28  ;;  %vm5021_vm6 = vcmask 523264   ;;  %vm10258_vm7 = vcmask 60416   ;;  %vm10285_vm8 = vcmask 1041409   ;;  %s11893_s30 = smov 32  }
  0x10   :  { %v240_v38 = vunpack.c.0.s8 %v239_v32  ;;  %vm10288_vm9 = vcmask 1042434   ;;  %vm10291_vm10 = vcmask 1043459   ;;  %vm10294_vm11 = vcmask 257024  }
  0x11   :  { %v12075_v35 = vsub.s32 %v208_v30, %v12070_v29  ;;  %vm10449_vm12 = vcmask 392192   ;;  %vm10514_vm13 = vcmask 326656   ;;  %vm10629_vm14 = vcmask 254976  }
  0x12   :  { %v12094_v47 = vsub.s32 %v240_v38, %v12070_v29 }
  0xca   :  { %v11101_v4 = vpop.f32.mrf.mxu0 }
  0xcb   :  { %v11978_v11 = vadd.f32 %v11101_v4, %v10651_v5 }
  0xcc   :  { %v149_v6 = vpop.f32.mrf.mxu0 }
  0xcd   :  { %v11962_v7 = vadd.f32 %v10651_v5, %v149_v6 }
  0xce   :  { %v11102_v8 = vpop.f32.mrf.mxu0 }
  0xcf   :  { %192 = vrot.lane.b32.xlu1 %v11962_v7, %s11880_s19  ;;  %168 = vrot.lane.b32.xlu0 %v11962_v7, %s11881_s20  ;;  %v11984_v12 = vadd.f32 %v11102_v8, %v10651_v5 }
  0xd0   :  { %v152_v9 = vpop.f32.mrf.mxu0 }
  0xd1   :  { %v11968_v10 = vadd.f32 %v10651_v5, %v152_v9 }
  0xd3   :  { %170 = vrot.lane.b32.xlu1 %v11968_v10, %s11881_s20  ;;  %180 = vrot.lane.b32.xlu0 %v11962_v7, %s11882_s21 }
  0xd7   :  { %194 = vrot.lane.b32.xlu1 %v11968_v10, %s11880_s19  ;;  %182 = vrot.lane.b32.xlu0 %v11968_v10, %s11882_s21 }
  0xdb   :  { %184 = vrot.lane.b32.xlu1 %v11978_v11, %s11882_s21  ;;  %172 = vrot.lane.b32.xlu0 %v11978_v11, %s11881_s20 }
  0xdf   :  { %174 = vrot.lane.b32.xlu1 %v11984_v12, %s11881_s20  ;;  %196 = vrot.lane.b32.xlu0 %v11978_v11, %s11880_s19 }
  0xe3   :  { %198 = vrot.lane.b32.xlu1 %v11984_v12, %s11880_s19  ;;  %186 = vrot.lane.b32.xlu0 %v11984_v12, %s11882_s21 }
  0xe7   :  { %748 = vrot.lane.b32.xlu0 %v11962_v7, %s11883_s22 }
 0x141   :  { %v11996_v13 = vpop.permute.xlu1 %192  ;;  %v11998_v14 = vpop.permute.xlu0 %168 }
 0x142   :  { %756 = vrot.lane.b32.xlu1 %v11998_v14, %s11883_s22  ;;  %v220_v36 = vcombine.low %v11998_v14, %v11996_v13  ;;  %v221_v37 = vcombine.high %v11998_v14, %v11996_v13 }
 0x144   :  { %v228_v43 = vrot.slane %v220_v36, %v12075_v35  ;;  %v235_v46 = vrot.slane %v221_v37, %v12075_v35 }
 0x145   :  { %v12002_v15 = vpop.permute.xlu1 %170  ;;  %v181_v16 = vpop.permute.xlu0 %180 }
 0x146   :  { %772 = vrot.lane.b32.xlu1 %v11996_v13, %s11883_s22  ;;  %764 = vrot.lane.b32.xlu0 %v181_v16, %s11883_s22  ;;  %v204_v33 = vcombine.low %v11962_v7, %v181_v16  ;;  %v205_v34 = vcombine.high %v11962_v7, %v181_v16 }
 0x148   :  { %v212_v39 = vrot.slane %v204_v33, %v12075_v35  ;;  %v219_v40 = vrot.slane %v205_v34, %v12075_v35 }
 0x149   :  { %v12007_v17 = vpop.permute.xlu0 %182  ;;  %v12011_v18 = vpop.permute.xlu1 %194 }
 0x14a   :  { %758 = vrot.lane.b32.xlu1 %v12002_v15, %s11883_s22  ;;  %750 = vrot.lane.b32.xlu0 %v11968_v10, %s11883_s22  ;;  %v288_v41 = vcombine.low %v12002_v15, %v12011_v18  ;;  %v272_v42 = vcombine.low %v11968_v10, %v12007_v17  ;;  %v289_v44 = vcombine.high %v12002_v15, %v12011_v18 }
 0x14b   :  { %v273_v45 = vcombine.high %v11968_v10, %v12007_v17  ;;  %v236_v48 = vcombine.low %v212_v39, %v228_v43  ;;  %v237_v49 = vcombine.high %v212_v39, %v228_v43  ;;  %v252_v52 = vcombine.low %v219_v40, %v235_v46 }
 0x14c   :  { %v253_v53 = vcombine.high %v219_v40, %v235_v46  ;;  %v296_v54 = vrot.slane %v288_v41, %v12075_v35  ;;  %v280_v55 = vrot.slane %v272_v42, %v12075_v35  ;;  %v303_v56 = vrot.slane %v289_v44, %v12075_v35 }
 0x14d   :  { %v12017_v19 = vpop.permute.xlu0 %172  ;;  %v12021_v20 = vpop.permute.xlu1 %184  ;;  %v287_v57 = vrot.slane %v273_v45, %v12075_v35  ;;  %v244_v60 = vrot.slane %v236_v48, %v12094_v47  ;;  %v251_v61 = vrot.slane %v237_v49, %v12094_v47  ;;  %v260_v0 = vrot.slane %v252_v52, %v12094_v47 }
 0x14e   :  { %774 = vrot.lane.b32.xlu1 %v12011_v18, %s11883_s22  ;;  %766 = vrot.lane.b32.xlu0 %v12007_v17, %s11883_s22  ;;  %v340_v58 = vcombine.low %v11978_v11, %v12021_v20  ;;  %v341_v59 = vcombine.high %v11978_v11, %v12021_v20  ;;  %v267_v1 = vrot.slane %v253_v53, %v12094_v47 }
 0x14f   :  { %v304_v2 = vcombine.low %v280_v55, %v296_v54  ;;  %v305_v3 = vcombine.high %v280_v55, %v296_v54  ;;  %v320_v4 = vcombine.low %v287_v57, %v303_v56  ;;  %v321_v5 = vcombine.high %v287_v57, %v303_v56 }
 0x150   :  { %v348_v6 = vrot.slane %v340_v58, %v12075_v35  ;;  %v492_v26 = vcombine.low %v260_v0, %v267_v1  ;;  %v10659_v27 = vcombine.high %v260_v0, %v267_v1 }
 0x151   :  { %v12029_v22 = vpop.permute.xlu0 %196  ;;  %v12037_v23 = vpop.permute.xlu1 %174  ;;  %v312_v28 = vrot.slane %v304_v2, %v12094_v47  ;;  %v319_v30 = vrot.slane %v305_v3, %v12094_v47  ;;  %v328_v31 = vrot.slane %v320_v4, %v12094_v47  ;;  %v335_v32 = vrot.slane %v321_v5, %v12094_v47 }
 0x152   :  { %760 = vrot.lane.b32.xlu1 %v12017_v19, %s11883_s22  ;;  %752 = vrot.lane.b32.xlu0 %v11978_v11, %s11883_s22  ;;  %v356_v50 = vcombine.low %v12017_v19, %v12029_v22  ;;  %v357_v51 = vcombine.high %v12017_v19, %v12029_v22  ;;  %v499_v44 = vrot.slane %v492_v26, %v12075_v35 }
 0x153   :  { %v507_v45 = vrot.slane %v10659_v27, %v12075_v35  ;;  %v544_v46 = vcombine.low %v312_v28, %v319_v30  ;;  %v10660_v48 = vcombine.high %v312_v28, %v319_v30  ;;  %v560_v49 = vcombine.low %v328_v31, %v335_v32 }
 0x154   :  { %v364_v62 = vrot.slane %v356_v50, %v12075_v35  ;;  %v371_v63 = vrot.slane %v357_v51, %v12075_v35  ;;  %v10661_v50 = vcombine.high %v328_v31, %v335_v32 }
 0x155   :  { %v12045_v24 = vpop.permute.xlu1 %198  ;;  %v12047_v25 = vpop.permute.xlu0 %186  ;;  %v559_v0 = vrot.slane %v10660_v48, %v12075_v35  ;;  %v567_v1 = vrot.slane %v560_v49, %v12075_v35 }
 0x156   :  { %776 = vrot.lane.b32.xlu1 %v12029_v22, %s11883_s22  ;;  %768 = vrot.lane.b32.xlu0 %v12021_v20, %s11883_s22  ;;  %v424_v8 = vcombine.low %v12037_v23, %v12045_v24  ;;  %v425_v9 = vcombine.high %v12037_v23, %v12045_v24  ;;  %v575_v2 = vrot.slane %v10661_v50, %v12075_v35 }
 0x158   :  { %v432_v33 = vrot.slane %v424_v8, %v12075_v35  ;;  %v439_v34 = vrot.slane %v425_v9, %v12075_v35  ;;  %v592_v26 = vcombine.low %v567_v1, %v575_v2  ;;  %v593_v32 = vcombine.high %v567_v1, %v575_v2 }
 0x15a   :  { %762 = vrot.lane.b32.xlu1 %v12037_v23, %s11883_s22  ;;  %754 = vrot.lane.b32.xlu0 %v11984_v12, %s11883_s22 }
 0x15e   :  { %778 = vrot.lane.b32.xlu1 %v12045_v24, %s11883_s22  ;;  %770 = vrot.lane.b32.xlu0 %v12047_v25, %s11883_s22 }
 0x162   :  { %1340 = vrot.lane.b32.xlu1 %v11962_v7, %s11886_s23  ;;  %1348 = vrot.lane.b32.xlu0 %v11998_v14, %s11886_s23  ;;  %v355_v7 = vrot.slane %v341_v59, %v12075_v35  ;;  %v373_v14 = vcombine.high %v348_v6, %v364_v62 }
 0x164   :  { %v387_v39 = vrot.slane %v373_v14, %v12094_v47 }
 0x166   :  { %1356 = vrot.lane.b32.xlu1 %v181_v16, %s11886_s23  ;;  %1350 = vrot.lane.b32.xlu0 %v12002_v15, %s11886_s23  ;;  %v388_v15 = vcombine.low %v355_v7, %v371_v63  ;;  %v389_v16 = vcombine.high %v355_v7, %v371_v63  ;;  %v551_v63 = vrot.slane %v544_v46, %v12075_v35 }
 0x168   :  { %v396_v40 = vrot.slane %v388_v15, %v12094_v47  ;;  %v403_v41 = vrot.slane %v389_v16, %v12094_v47  ;;  %v749_v16 = vpop.permute.xlu0 %748  ;;  %v577_v31 = vcombine.high %v551_v63, %v559_v0 }
 0x16a   :  { %1364 = vrot.lane.b32.xlu1 %v11996_v13, %s11886_s23  ;;  %v372_v13 = vcombine.low %v348_v6, %v364_v62  ;;  %v628_v57 = vcombine.low %v396_v40, %v403_v41  ;;  %v10663_v58 = vcombine.high %v396_v40, %v403_v41  ;;  %v525_v62 = vcombine.high %v499_v44, %v507_v45 }
 0x16c   :  { %v380_v38 = vrot.slane %v372_v13, %v12094_v47  ;;  %v635_v9 = vrot.slane %v628_v57, %v12075_v35  ;;  %v12170_v15 = vrot.slane %v525_v62, %v12094_v47 }
 0x16e   :  { %1342 = vrot.lane.b32.xlu1 %v11968_v10, %s11886_s23  ;;  %v408_v10 = vcombine.low %v11984_v12, %v12047_v25  ;;  %v612_v55 = vcombine.low %v380_v38, %v387_v39  ;;  %v10662_v56 = vcombine.high %v380_v38, %v387_v39 }
 0x170   :  { %v416_v36 = vrot.slane %v408_v10, %v12075_v35  ;;  %v619_v7 = vrot.slane %v612_v55, %v12075_v35  ;;  %v627_v8 = vrot.slane %v10662_v56, %v12075_v35  ;;  %v643_v10 = vrot.slane %v10663_v58, %v12075_v35 }
 0x172   :  { %1344 = vrot.lane.b32.xlu1 %v11978_v11, %s11886_s23  ;;  %v409_v11 = vcombine.high %v11984_v12, %v12047_v25  ;;  %v440_v51 = vcombine.low %v416_v36, %v432_v33  ;;  %v441_v52 = vcombine.high %v416_v36, %v432_v33  ;;  %v644_v33 = vcombine.low %v619_v7, %v627_v8 }
 0x174   :  { %v423_v37 = vrot.slane %v409_v11, %v12075_v35  ;;  %v12145_v3 = vrot.slane %v440_v51, %v12094_v47  ;;  %v12148_v4 = vrot.slane %v441_v52, %v12094_v47  ;;  %v12193_v51 = vrot.slane %v577_v31, %v12094_v47 }
 0x175   :  { %v12196_v52 = vrot.slane %v593_v32, %v12094_v47 }
 0x176   :  { %1358 = vrot.lane.b32.xlu1 %v12007_v17, %s11886_s23  ;;  %v476_v17 = vcombine.low %v244_v60, %v251_v61  ;;  %v456_v53 = vcombine.low %v423_v37, %v439_v34  ;;  %v457_v54 = vcombine.high %v423_v37, %v439_v34  ;;  %v680_v27 = vcombine.low %v12145_v3, %v12148_v4 }
 0x177   :  { %v10664_v28 = vcombine.high %v12145_v3, %v12148_v4  ;;  %v660_v34 = vcombine.low %v635_v9, %v643_v10 }
 0x178   :  { %v483_v42 = vrot.slane %v476_v17, %v12075_v35  ;;  %v12151_v5 = vrot.slane %v456_v53, %v12094_v47  ;;  %v12154_v6 = vrot.slane %v457_v54, %v12094_v47  ;;  %v12199_v53 = vrot.slane %v644_v33, %v12094_v47 }
 0x179   :  { %v12202_v54 = vrot.slane %v660_v34, %v12094_v47  ;;  %v12235_v34 = vrot.slane %v680_v27, %v12075_v35 }
 0x17a   :  { %1366 = vrot.lane.b32.xlu1 %v12011_v18, %s11886_s23  ;;  %v10658_v18 = vcombine.high %v244_v60, %v251_v61  ;;  %v524_v60 = vcombine.low %v499_v44, %v507_v45  ;;  %v696_v30 = vcombine.low %v12151_v5, %v12154_v6  ;;  %v10665_v36 = vcombine.high %v12151_v5, %v12154_v6 }
 0x17b   :  { %v645_v44 = vcombine.high %v619_v7, %v627_v8  ;;  %v661_v45 = vcombine.high %v635_v9, %v643_v10  ;;  %v610_v8 = vcombine.low %v12193_v51, %v12196_v52  ;;  %v611_v9 = vcombine.high %v12193_v51, %v12196_v52 }
 0x17c   :  { %v491_v43 = vrot.slane %v10658_v18, %v12075_v35  ;;  %v12164_v13 = vrot.slane %v524_v60, %v12094_v47  ;;  %v576_v18 = vcombine.low %v551_v63, %v559_v0  ;;  %v676_v10 = vcombine.low %v12199_v53, %v12202_v54 }
 0x17d   :  { %v12213_v62 = vrot.slane %v645_v44, %v12094_v47  ;;  %v12216_v63 = vrot.slane %v661_v45, %v12094_v47 }
 0x17e   :  { %v508_v59 = vcombine.low %v483_v42, %v491_v43  ;;  %v509_v61 = vcombine.high %v483_v42, %v491_v43  ;;  %v12187_v42 = vrot.slane %v576_v18, %v12094_v47  ;;  %v12190_v43 = vrot.slane %v592_v26, %v12094_v47 }
 0x180   :  { %v12161_v11 = vrot.slane %v508_v59, %v12094_v47  ;;  %v12167_v14 = vrot.slane %v509_v61, %v12094_v47  ;;  %v608_v61 = vcombine.low %v12187_v42, %v12190_v43  ;;  %v609_v7 = vcombine.high %v12187_v42, %v12190_v43 }
 0x182   :  { %v540_v37 = vcombine.low %v12161_v11, %v12164_v13  ;;  %v541_v38 = vcombine.high %v12161_v11, %v12164_v13  ;;  %v542_v39 = vcombine.low %v12167_v14, %v12170_v15  ;;  %v543_v60 = vcombine.high %v12167_v14, %v12170_v15 }
 0x183   :  { %v12342_v14 = vrot.slane %v696_v30, %v12075_v35  ;;  %v12348_v15 = vrot.slane %v10665_v36, %v12075_v35 }
 0x1b4   :  { %v757_v17 = vpop.permute.xlu1 %756 }
 0x1b8   :  { %v773_v40 = vpop.permute.xlu1 %772  ;;  %v765_v41 = vpop.permute.xlu0 %764 }
 0x1b9   :  { %v812_v46 = vcombine.low %v757_v17, %v773_v40  ;;  %v813_v48 = vcombine.high %v757_v17, %v773_v40  ;;  %v796_v49 = vcombine.low %v749_v16, %v765_v41  ;;  %v797_v50 = vcombine.high %v749_v16, %v765_v41 }
 0x1ba   :  { %v12238_v40 = vrot.slane %v10664_v28, %v12075_v35 }
 0x1bb   :  { %v820_v55 = vrot.slane %v812_v46, %v12075_v35  ;;  %v827_v56 = vrot.slane %v813_v48, %v12075_v35  ;;  %v804_v57 = vrot.slane %v796_v49, %v12075_v35  ;;  %v811_v58 = vrot.slane %v797_v50, %v12075_v35 }
 0x1bc   :  { %v759_v59 = vpop.permute.xlu1 %758  ;;  %v751_v4 = vpop.permute.xlu0 %750 }
 0x1bd   :  { %v828_v0 = vcombine.low %v804_v57, %v820_v55  ;;  %v829_v1 = vcombine.high %v804_v57, %v820_v55  ;;  %v844_v2 = vcombine.low %v811_v58, %v827_v56  ;;  %v845_v3 = vcombine.high %v811_v58, %v827_v56 }
 0x1bf   :  { %v836_v16 = vrot.slane %v828_v0, %v12094_v47  ;;  %v843_v17 = vrot.slane %v829_v1, %v12094_v47  ;;  %v852_v18 = vrot.slane %v844_v2, %v12094_v47  ;;  %v859_v26 = vrot.slane %v845_v3, %v12094_v47 }
 0x1c0   :  { %v775_v31 = vpop.permute.xlu1 %774  ;;  %v767_v48 = vpop.permute.xlu0 %766 }
 0x1c1   :  { %v1068_v41 = vcombine.low %v836_v16, %v843_v17  ;;  %v10666_v44 = vcombine.high %v836_v16, %v843_v17  ;;  %v1084_v45 = vcombine.low %v852_v18, %v859_v26  ;;  %v10667_v46 = vcombine.high %v852_v18, %v859_v26 }
 0x1c2   :  { %v880_v49 = vcombine.low %v759_v59, %v775_v31  ;;  %v881_v50 = vcombine.high %v759_v59, %v775_v31  ;;  %v864_v55 = vcombine.low %v751_v4, %v767_v48  ;;  %v865_v56 = vcombine.high %v751_v4, %v767_v48 }
 0x1c3   :  { %v1075_v57 = vrot.slane %v1068_v41, %v12075_v35  ;;  %v1083_v58 = vrot.slane %v10666_v44, %v12075_v35  ;;  %v1091_v0 = vrot.slane %v1084_v45, %v12075_v35  ;;  %v1099_v27 = vrot.slane %v10667_v46, %v12075_v35 }
 0x1c4   :  { %v888_v28 = vrot.slane %v880_v49, %v12075_v35  ;;  %v895_v1 = vrot.slane %v881_v50, %v12075_v35  ;;  %v872_v2 = vrot.slane %v864_v55, %v12075_v35  ;;  %v879_v3 = vrot.slane %v865_v56, %v12075_v35  ;;  %v761_v16 = vpop.permute.xlu1 %760  ;;  %v753_v26 = vpop.permute.xlu0 %752 }
 0x1c5   :  { %v1100_v59 = vcombine.low %v1075_v57, %v1083_v58  ;;  %v1101_v17 = vcombine.high %v1075_v57, %v1083_v58  ;;  %v1116_v4 = vcombine.low %v1091_v0, %v1099_v27  ;;  %v1117_v18 = vcombine.high %v1091_v0, %v1099_v27 }
 0x1c6   :  { %v896_v31 = vcombine.low %v872_v2, %v888_v28  ;;  %v897_v41 = vcombine.high %v872_v2, %v888_v28  ;;  %v912_v44 = vcombine.low %v879_v3, %v895_v1  ;;  %v913_v45 = vcombine.high %v879_v3, %v895_v1 }
 0x1c7   :  { %v1108_v46 = vrot.slane %v1100_v59, %v12094_v47  ;;  %v1124_v48 = vrot.slane %v1116_v4, %v12094_v47  ;;  %v1115_v49 = vrot.slane %v1101_v17, %v12094_v47  ;;  %v1131_v50 = vrot.slane %v1117_v18, %v12094_v47 }
 0x1c8   :  { %v904_v55 = vrot.slane %v896_v31, %v12094_v47  ;;  %v911_v56 = vrot.slane %v897_v41, %v12094_v47  ;;  %v920_v57 = vrot.slane %v912_v44, %v12094_v47  ;;  %v927_v58 = vrot.slane %v913_v45, %v12094_v47  ;;  %v777_v0 = vpop.permute.xlu1 %776  ;;  %v769_v1 = vpop.permute.xlu0 %768 }
 0x1c9   :  { %v948_v27 = vcombine.low %v761_v16, %v777_v0  ;;  %v949_v28 = vcombine.high %v761_v16, %v777_v0  ;;  %v1132_v2 = vcombine.low %v1108_v46, %v1124_v48  ;;  %v1133_v3 = vcombine.high %v1108_v46, %v1124_v48 }
 0x1ca   :  { %v1136_v59 = vcombine.low %v904_v55, %v911_v56  ;;  %v10668_v4 = vcombine.high %v904_v55, %v911_v56  ;;  %v1152_v33 = vcombine.low %v920_v57, %v927_v58  ;;  %v10669_v17 = vcombine.high %v920_v57, %v927_v58 }
 0x1cb   :  { %v956_v18 = vrot.slane %v948_v27, %v12075_v35  ;;  %v963_v31 = vrot.slane %v949_v28, %v12075_v35  ;;  %v932_v32 = vcombine.low %v753_v26, %v769_v1  ;;  %v933_v41 = vcombine.high %v753_v26, %v769_v1  ;;  %11104 = vmatpush3.xpose.msk.msra.mxu0 %vm1952_vm2, %v1132_v2 }
 0x1cc   :  { %v12260_v44 = vrot.slane %v1136_v59, %v12075_v35  ;;  %v12263_v16 = vrot.slane %v10668_v4, %v12075_v35  ;;  %v12266_v45 = vrot.slane %v1152_v33, %v12075_v35  ;;  %v12269_v46 = vrot.slane %v10669_v17, %v12075_v35  ;;  %11109 = vmatpush3.xpose.msk.msra.mxu1 %vm1952_vm2, %v1133_v3  ;;  %v763_v48 = vpop.permute.xlu1 %762  ;;  %v755_v56 = vpop.permute.xlu0 %754 }
 0x1cd   :  { %v940_v55 = vrot.slane %v932_v32, %v12075_v35  ;;  %v947_v26 = vrot.slane %v933_v41, %v12075_v35  ;;  %11113 = vmatprep.subr.mxu1 %v11884_v21  ;;  %11118 = vmatprep.subr.mxu0 %v11884_v21  ;;  %v1134_v57 = vcombine.low %v1115_v49, %v1131_v50 }
 0x1ce   :  { %v1168_v33 = vcombine.low %v12260_v44, %v12263_v16  ;;  %v1169_v58 = vcombine.high %v12260_v44, %v12263_v16  ;;  %v1184_v0 = vcombine.low %v12266_v45, %v12269_v46  ;;  %v1185_v32 = vcombine.high %v12266_v45, %v12269_v46  ;;  %11106 = vmatmul.mubr.msk.f32.vlgmr.msra.gmra.mxu0 %vm1952_vm2, %v540_v37 }
 0x1cf   :  { %v964_v27 = vcombine.low %v940_v55, %v956_v18  ;;  %v965_v28 = vcombine.high %v940_v55, %v956_v18  ;;  %v980_v1 = vcombine.low %v947_v26, %v963_v31  ;;  %v981_v2 = vcombine.high %v947_v26, %v963_v31  ;;  %11111 = vmatmul.mubr.msk.f32.vlgmr.msra.gmra.mxu1 %vm1952_vm2, %v541_v38 }
 0x1d0   :  { %11114 = vmatpush3.xpose.msk.msra.mxu1 %vm1952_vm2, %v1134_v57  ;;  %v1135_v3 = vcombine.high %v1115_v49, %v1131_v50  ;;  %v779_v59 = vpop.permute.xlu1 %778  ;;  %11115 = vmatprep.mubr.msk.f32.mxu1 %vm11885_vm1, %v11884_v21  ;;  %v1176_v4 = vrot.slane %v1168_v33, %v12094_v47  ;;  %v1192_v37 = vrot.slane %v1184_v0, %v12094_v47  ;;  %v771_v13 = vpop.permute.xlu0 %770 }
 0x1d1   :  { %v972_v17 = vrot.slane %v964_v27, %v12094_v47  ;;  %v979_v18 = vrot.slane %v965_v28, %v12094_v47  ;;  %v988_v31 = vrot.slane %v980_v1, %v12094_v47  ;;  %v995_v11 = vrot.slane %v981_v2, %v12094_v47  ;;  %11120 = vmatprep.mubr.msk.f32.mxu0 %vm11885_vm1, %v11884_v21 }
 0x1d2   :  { %11119 = vmatpush3.xpose.msk.msra.mxu0 %vm1952_vm2, %v1135_v3  ;;  %v1016_v38 = vcombine.low %v763_v48, %v779_v59  ;;  %v1017_v49 = vcombine.high %v763_v48, %v779_v59  ;;  %v1000_v50 = vcombine.low %v755_v56, %v771_v13  ;;  %v1001_v41 = vcombine.high %v755_v56, %v771_v13 }
 0x1d3   :  { %v1204_v44 = vcombine.low %v972_v17, %v979_v18  ;;  %v10670_v16 = vcombine.high %v972_v17, %v979_v18  ;;  %v1220_v45 = vcombine.low %v988_v31, %v995_v11  ;;  %v10671_v46 = vcombine.high %v988_v31, %v995_v11  ;;  %11116 = vmatmul.mubr.msk.f32.vlgmr.msra.gmra.mxu1 %vm1952_vm2, %v542_v39 }
 0x1d4   :  { %v1024_v55 = vrot.slane %v1016_v38, %v12075_v35  ;;  %v1031_v26 = vrot.slane %v1017_v49, %v12075_v35  ;;  %v1008_v57 = vrot.slane %v1000_v50, %v12075_v35  ;;  %v1015_v33 = vrot.slane %v1001_v41, %v12075_v35  ;;  %11123 = vmatprep.subr.mxu1 %v11884_v21  ;;  %v12313_v48 = vpop.permute.xlu1 %1340 }
 0x1d5   :  { %v12316_v56 = vrot.slane %v1204_v44, %v12075_v35  ;;  %v12319_v0 = vrot.slane %v10670_v16, %v12075_v35  ;;  %v12322_v39 = vrot.slane %v1220_v45, %v12075_v35  ;;  %v12325_v27 = vrot.slane %v10671_v46, %v12075_v35  ;;  %11121 = vmatmul.mubr.msk.f32.vlgmr.msra.gmra.mxu0 %vm1952_vm2, %v543_v60 }
 0x1d6   :  { %v1032_v28 = vcombine.low %v1008_v57, %v1024_v55  ;;  %v1033_v1 = vcombine.high %v1008_v57, %v1024_v55  ;;  %v1048_v2 = vcombine.low %v1015_v33, %v1031_v26  ;;  %v1049_v3 = vcombine.high %v1015_v33, %v1031_v26  ;;  %11128 = vmatprep.subr.mxu0 %v11884_v21 }
 0x1d7   :  { %v1236_v59 = vcombine.low %v12316_v56, %v12319_v0  ;;  %v1252_v17 = vcombine.low %v12322_v39, %v12325_v27  ;;  %11125 = vmatprep.mubr.msk.f32.mxu1 %vm11885_vm1, %v11884_v21  ;;  %11130 = vmatprep.mubr.msk.f32.mxu0 %vm11885_vm1, %v11884_v21  ;;  %v1200_v30 = vcombine.low %v1176_v4, %v1192_v37 }
 0x1d8   :  { %v1040_v60 = vrot.slane %v1032_v28, %v12094_v47  ;;  %v1047_v18 = vrot.slane %v1033_v1, %v12094_v47  ;;  %v1056_v31 = vrot.slane %v1048_v2, %v12094_v47  ;;  %v1063_v11 = vrot.slane %v1049_v3, %v12094_v47  ;;  %v1357_v13 = vpop.permute.xlu1 %1356 }
 0x1d9   :  { %v1201_v38 = vcombine.high %v1176_v4, %v1192_v37  ;;  %v1183_v49 = vrot.slane %v1169_v58, %v12094_v47  ;;  %v1199_v5 = vrot.slane %v1185_v32, %v12094_v47  ;;  %11124 = vmatpush3.xpose.msk.msra.mxu1 %vm1952_vm2, %v1200_v30  ;;  %v679_v44 = vcombine.high %v12213_v62, %v12216_v63 }
 0x1da   :  { %v1272_v6 = vcombine.low %v1040_v60, %v1047_v18  ;;  %v10672_v36 = vcombine.high %v1040_v60, %v1047_v18  ;;  %v1288_v50 = vcombine.low %v1056_v31, %v1063_v11  ;;  %v10673_v41 = vcombine.high %v1056_v31, %v1063_v11  ;;  %11133 = vmatprep.subr.mxu1 %v11884_v21  ;;  %v1349_v60 = vpop.permute.xlu0 %1348 }
 0x1db   :  { %11129 = vmatpush3.xpose.msk.msra.mxu0 %vm1952_vm2, %v1201_v38  ;;  %v712_v16 = vcombine.low %v12235_v34, %v12238_v40  ;;  %v728_v4 = vcombine.low %v12342_v14, %v12348_v15  ;;  %v1202_v37 = vcombine.low %v1183_v49, %v1199_v5  ;;  %v1388_v45 = vcombine.low %v12313_v48, %v1357_v13 }
 0x1dc   :  { %v12367_v58 = vrot.slane %v1272_v6, %v12075_v35  ;;  %v12370_v32 = vrot.slane %v10672_v36, %v12075_v35  ;;  %v12375_v46 = vrot.slane %v1288_v50, %v12075_v35  ;;  %v12378_v55 = vrot.slane %v10673_v41, %v12075_v35  ;;  %11138 = vmatprep.subr.mxu0 %v11884_v21  ;;  %v1365_v33 = vpop.permute.xlu1 %1364 }
 0x1dd   :  { %v1244_v26 = vrot.slane %v1236_v59, %v12094_v47  ;;  %v1260_v57 = vrot.slane %v1252_v17, %v12094_v47  ;;  %11126 = vmatmul.mubr.msk.f32.vlgmr.msra.gmra.mxu1 %vm1952_vm2, %v608_v61  ;;  %v1203_v28 = vcombine.high %v1183_v49, %v1199_v5  ;;  %v1389_v1 = vcombine.high %v12313_v48, %v1357_v13 }
 0x1de   :  { %v713_v2 = vcombine.high %v12235_v34, %v12238_v40  ;;  %v729_v3 = vcombine.high %v12342_v14, %v12348_v15  ;;  %v1237_v59 = vcombine.high %v12316_v56, %v12319_v0  ;;  %v1253_v17 = vcombine.high %v12322_v39, %v12325_v27  ;;  %11131 = vmatmul.mubr.msk.f32.vlgmr.msra.gmra.mxu0 %vm1952_vm2, %v609_v7 }
 0x1df   :  { %11134 = vmatpush3.xpose.msk.msra.mxu1 %vm1952_vm2, %v1202_v37  ;;  %v1268_v61 = vcombine.low %v1244_v26, %v1260_v57  ;;  %11139 = vmatpush3.xpose.msk.msra.mxu0 %vm1952_vm2, %v1203_v28  ;;  %v1269_v48 = vcombine.high %v1244_v26, %v1260_v57  ;;  %v1404_v18 = vcombine.low %v1349_v60, %v1365_v33 }
 0x1e0   :  { %11135 = vmatprep.mubr.msk.f32.mxu1 %vm11885_vm1, %v11884_v21  ;;  %v1405_v56 = vcombine.high %v1349_v60, %v1365_v33  ;;  %v1304_v0 = vcombine.low %v12367_v58, %v12370_v32  ;;  %v1320_v39 = vcombine.low %v12375_v46, %v12378_v55  ;;  %v1396_v42 = vrot.slane %v1388_v45, %v12075_v35 }
 0x1e1   :  { %11140 = vmatprep.mubr.msk.f32.mxu0 %vm11885_vm1, %v11884_v21  ;;  %11143 = vmatprep.subr.mxu1 %v11884_v21  ;;  %v1403_v43 = vrot.slane %v1389_v1, %v12075_v35  ;;  %v1412_v7 = vrot.slane %v1404_v18, %v12075_v35  ;;  %v1251_v31 = vrot.slane %v1237_v59, %v12094_v47 }
 0x1e2   :  { %11136 = vmatmul.mubr.msk.f32.vlgmr.msra.gmra.mxu1 %vm1952_vm2, %v610_v8  ;;  %11148 = vmatprep.subr.mxu0 %v11884_v21  ;;  %v1419_v27 = vrot.slane %v1405_v56, %v12075_v35  ;;  %v1267_v11 = vrot.slane %v1253_v17, %v12094_v47  ;;  %v12428_v13 = vrot.slane %v712_v16, %v12094_v47 }
 0x1e3   :  { %11141 = vmatmul.mubr.msk.f32.vlgmr.msra.gmra.mxu0 %vm1952_vm2, %v611_v9  ;;  %11144 = vmatpush3.xpose.msk.msra.mxu1 %vm1952_vm2, %v1268_v61  ;;  %v1420_v8 = vcombine.low %v1396_v42, %v1412_v7  ;;  %v1421_v30 = vcombine.high %v1396_v42, %v1412_v7  ;;  %v1305_v51 = vcombine.high %v12367_v58, %v12370_v32 }
 0x1e4   :  { %11149 = vmatpush3.xpose.msk.msra.mxu0 %vm1952_vm2, %v1269_v48  ;;  %v1436_v38 = vcombine.low %v1403_v43, %v1419_v27  ;;  %v1437_v49 = vcombine.high %v1403_v43, %v1419_v27  ;;  %11145 = vmatprep.mubr.msk.f32.mxu1 %vm11885_vm1, %v11884_v21  ;;  %v1312_v52 = vrot.slane %v1304_v0, %v12094_v47 }
 0x1e5   :  { %11150 = vmatprep.mubr.msk.f32.mxu0 %vm11885_vm1, %v11884_v21  ;;  %v1328_v9 = vrot.slane %v1320_v39, %v12094_v47  ;;  %v1428_v5 = vrot.slane %v1420_v8, %v12094_v47  ;;  %v1435_v6 = vrot.slane %v1421_v30, %v12094_v47  ;;  %v1321_v41 = vcombine.high %v12375_v46, %v12378_v55 }
 0x1e6   :  { %v1444_v36 = vrot.slane %v1436_v38, %v12094_v47  ;;  %v1451_v50 = vrot.slane %v1437_v49, %v12094_v47  ;;  %11146 = vmatmul.mubr.msk.f32.vlgmr.msra.gmra.mxu1 %vm1952_vm2, %v676_v10  ;;  %v14313_v16 = vcombine.high %v12199_v53, %v12202_v54  ;;  %11153 = vmatprep.subr.mxu1 %v11884_v21  ;;  %v11889_v8 = vmov 1966171168   ;;  %v42_v38 = vld [vmem:[%s14304_s1] sm:$0xf] }
 0x1e7   :  { %v1270_v58 = vcombine.low %v1251_v31, %v1267_v11  ;;  %v1271_v32 = vcombine.high %v1251_v31, %v1267_v11  ;;  %v1660_v37 = vcombine.low %v1428_v5, %v1435_v6  ;;  %v10674_v45 = vcombine.high %v1428_v5, %v1435_v6  ;;  %11158 = vmatprep.subr.mxu0 %v11884_v21 }
 0x1e8   :  { %11151 = vmatmul.mubr.msk.f32.vlgmr.msra.gmra.mxu0 %vm1952_vm2, %v14313_v16  ;;  %v1676_v26 = vcombine.low %v1444_v36, %v1451_v50  ;;  %v10675_v57 = vcombine.high %v1444_v36, %v1451_v50  ;;  %v1336_v10 = vcombine.low %v1312_v52, %v1328_v9  ;;  %v1337_v46 = vcombine.high %v1312_v52, %v1328_v9 }
 0x1e9   :  { %11154 = vmatpush3.xpose.msk.msra.mxu1 %vm1952_vm2, %v1270_v58  ;;  %11159 = vmatpush3.xpose.msk.msra.mxu0 %vm1952_vm2, %v1271_v32  ;;  %v736_v53 = vrot.slane %v728_v4, %v12094_v47  ;;  %v1667_v54 = vrot.slane %v1660_v37, %v12075_v35  ;;  %v1675_v55 = vrot.slane %v10674_v45, %v12075_v35  ;;  %v47_v30 = vunpack.c.l.s4 %v11889_v8 }
 0x1ea   :  { %11155 = vmatprep.mubr.msk.f32.mxu1 %vm11885_vm1, %v11884_v21  ;;  %11160 = vmatprep.mubr.msk.f32.mxu0 %vm11885_vm1, %v11884_v21  ;;  %v1683_v33 = vrot.slane %v1676_v26, %v12075_v35  ;;  %v1319_v28 = vrot.slane %v1305_v51, %v12094_v47  ;;  %v1335_v4 = vrot.slane %v1321_v41, %v12094_v47  ;;  %v43_v49 = vsub.f32 1.0, %v42_v38 }
 0x1eb   :  { %11163 = vmatprep.subr.mxu1 %v11884_v21  ;;  %11168 = vmatprep.subr.mxu0 %v11884_v21  ;;  %v1691_v1 = vrot.slane %v10675_v57, %v12075_v35  ;;  %v14314_v59 = vcombine.low %v12213_v62, %v12216_v63  ;;  %v727_v17 = vrot.slane %v713_v2, %v12094_v47  ;;  %v48_v51 = vunpack.c.0.s8 %v47_v30 }
 0x1ec   :  { %11161 = vmatmul.mubr.msk.f32.vlgmr.msra.gmra.mxu0 %vm1952_vm2, %v679_v44  ;;  %v1692_v60 = vcombine.low %v1667_v54, %v1675_v55  ;;  %v1693_v61 = vcombine.high %v1667_v54, %v1675_v55  ;;  %v744_v48 = vcombine.low %v12428_v13, %v736_v53  ;;  %v743_v62 = vrot.slane %v729_v3, %v12094_v47 }
 0x1ed   :  { %11156 = vmatmul.mubr.msk.f32.vlgmr.msra.gmra.mxu1 %vm1952_vm2, %v14314_v59  ;;  %11169 = vmatpush3.xpose.msk.msra.mxu0 %vm1952_vm2, %v1337_v46  ;;  %v1708_v63 = vcombine.low %v1683_v33, %v1691_v1  ;;  %v745_v34 = vcombine.high %v12428_v13, %v736_v53  ;;  %v1709_v44 = vcombine.high %v1683_v33, %v1691_v1  ;;  %v44_v52 = vmul.f32 -1e+09, %v43_v49 }
 0x1ee   :  { %11164 = vmatpush3.xpose.msk.msra.mxu1 %vm1952_vm2, %v1336_v10  ;;  %11165 = vmatprep.mubr.msk.f32.mxu1 %vm11885_vm1, %v11884_v21  ;;  %v1700_v40 = vrot.slane %v1692_v60, %v12094_v47  ;;  %v1338_v2 = vcombine.low %v1319_v28, %v1335_v4  ;;  %v1339_v18 = vcombine.high %v1319_v28, %v1335_v4  ;;  %v12532_v36 = vsub.s32 0, %v12070_v29 }
 0x1ef   :  { %11170 = vmatprep.mubr.msk.f32.mxu0 %vm11885_vm1, %v11884_v21  ;;  %11173 = vmatprep.subr.mxu1 %v11884_v21  ;;  %v1716_v14 = vrot.slane %v1708_v63, %v12094_v47  ;;  %v746_v15 = vcombine.low %v727_v17, %v743_v62  ;;  %v1707_v3 = vrot.slane %v1693_v61, %v12094_v47 }
 0x1f0   :  { %11178 = vmatprep.subr.mxu0 %v11884_v21  ;;  %11171 = vmatmul.mubr.msk.f32.vlgmr.msra.gmra.mxu0 %vm1952_vm2, %v745_v34  ;;  %v1723_v56 = vrot.slane %v1709_v44, %v12094_v47  ;;  %v747_v0 = vcombine.high %v727_v17, %v743_v62  ;;  %v51_v9 = vsub.s32 %v48_v51, %v12070_v29 }
 0x1f1   :  { %11166 = vmatmul.mubr.msk.f32.vlgmr.msra.gmra.mxu1 %vm1952_vm2, %v744_v48  ;;  %11179 = vmatpush3.xpose.msk.msra.mxu0 %vm1952_vm2, %v1339_v18  ;;  %v1724_v39 = vcombine.low %v1700_v40, %v1716_v14  ;;  %v1725_v42 = vcombine.high %v1700_v40, %v1716_v14 }
 0x1f2   :  { %11174 = vmatpush3.xpose.msk.msra.mxu1 %vm1952_vm2, %v1338_v2  ;;  %11175 = vmatprep.mubr.msk.f32.mxu1 %vm11885_vm1, %v11884_v21  ;;  %v12519_v27 = vcombine.low %v1707_v3, %v1723_v56  ;;  %v12523_v13 = vcombine.high %v1707_v3, %v1723_v56  ;;  %v52_v5 = vrot.slane %v44_v52, %v51_v9 }
 0x1f3   :  { %11180 = vmatprep.mubr.msk.f32.mxu0 %vm11885_vm1, %v11884_v21  ;;  %11183 = vmatprep.subr.bf16.mxu1 %v11884_v21  ;;  %v3361_v43 = vpack.c.bf16 %v1724_v39, %v1724_v39  ;;  %v3362_v7 = vpack.c.bf16 %v1725_v42, %v1725_v42 }
 0x1f4   :  { %11189 = vmatprep.subr.bf16.mxu0 %v11884_v21  ;;  %11181 = vmatmul.mubr.msk.f32.vlgmr.msra.gmra.mxu0 %vm1952_vm2, %v747_v0  ;;  %v60_v6 = vrot.slane %v52_v5, %v51_v9  ;;  %v53_v46 = vcombine.high %v52_v5, %v52_v5 }
 0x1f5   :  { %11176 = vmatmul.mubr.msk.f32.vlgmr.msra.gmra.mxu1 %vm1952_vm2, %v746_v15  ;;  %11191 = vmatprep.mubr.msk.bf16.mxu0 %vm11885_vm1, %v11884_v21  ;;  %v3382_v31 = vsel %vm3380_vm3, %v3361_v43, 0  ;;  %v3428_v11 = vsel %vm3380_vm3, %v3362_v7, 0 }
 0x1f6   :  { %11185 = vmatprep.mubr.msk.bf16.mxu1 %vm11885_vm1, %v11884_v21  ;;  %11184 = vmatpush3.bf16.msra.mxu1 %v3382_v31  ;;  %v12535_v50 = vrot.slane %v60_v6, %v12532_v36  ;;  %v67_v1 = vrot.slane %v53_v46, %v51_v9  ;;  %v68_v62 = vcombine.high %v60_v6, %v60_v6 }
 0x1f7   :  { %11190 = vmatpush3.bf16.msra.mxu0 %v3428_v11  ;;  %11195 = vmatprep.subr.bf16.mxu1 %v11884_v21 }
 0x1f8   :  { %11201 = vmatprep.subr.bf16.mxu0 %v11884_v21  ;;  %v12558_v17 = vrot.slane %v67_v1, %v12532_v36  ;;  %v12574_v3 = vrot.slane %v68_v62, %v12532_v36 }
 0x28e   :  { %v2025_v41 = vpop.f32.mrf.mxu0 }
 0x28f   :  { %v12538_v16 = vadd.f32 %v2025_v41, %v12535_v50  ;;  %v2101_v58 = vpop.f32.mrf.mxu1 }
 0x290   :  { %v12541_v32 = vadd.f32 %v2101_v58, %v12535_v50  ;;  %v11107_v37 = vpop.f32.mrf.mxu0 }
 0x291   :  { %v11112_v45 = vpop.f32.mrf.mxu1  ;;  %v3169_v26 = vsel %vm1952_vm2, %v12538_v16, -inf }
 0x292   :  { %v3172_v57 = vsel %vm1952_vm2, %v12541_v32, -inf  ;;  %3170 = vmax.xlane.f32.xlu0 %v3169_v26 }
 0x293   :  { %3173 = vmax.xlane.f32.xlu1 %v3172_v57  ;;  %v2177_v10 = vpop.f32.mrf.mxu1 }
 0x294   :  { %v12548_v53 = vadd.f32 %v2177_v10, %v12535_v50 }
 0x295   :  { %v2253_v54 = vpop.f32.mrf.mxu0  ;;  %v11117_v55 = vpop.f32.mrf.mxu1 }
 0x296   :  { %v12551_v33 = vadd.f32 %v2253_v54, %v12535_v50  ;;  %v3175_v28 = vsel %vm1952_vm2, %v12548_v53, -inf }
 0x297   :  { %v11122_v4 = vpop.f32.mrf.mxu0  ;;  %3176 = vmax.xlane.f32.xlu0 %v3175_v28 }
 0x298   :  { %v3178_v59 = vsel %vm1952_vm2, %v12551_v33, -inf }
 0x29b   :  { %3179 = vmax.xlane.f32.xlu0 %v3178_v59  ;;  %v69_v59 = vcombine.high %v67_v1, %v67_v1 }
 0x29d   :  { %v2329_v60 = vpop.f32.mrf.mxu1 }
 0x29e   :  { %v12561_v61 = vadd.f32 %v2329_v60, %v12558_v17  ;;  %v2405_v48 = vpop.f32.mrf.mxu0  ;;  %v12610_v60 = vrot.slane %v69_v59, %v12532_v36 }
 0x29f   :  { %v12564_v63 = vadd.f32 %v2405_v48, %v12558_v17  ;;  %v11127_v34 = vpop.f32.mrf.mxu1 }
 0x2a0   :  { %v11132_v40 = vpop.f32.mrf.mxu0  ;;  %v3181_v44 = vsel %vm1952_vm2, %v12561_v61, -inf }
 0x2a1   :  { %3182 = vmax.xlane.f32.xlu1 %v3181_v44  ;;  %v3184_v18 = vsel %vm1952_vm2, %v12564_v63, -inf  ;;  %v12634_v44 = vpop.permute.xlu1 %1342 }
 0x2a2   :  { %v2481_v2 = vpop.f32.mrf.mxu1  ;;  %3185 = vmax.xlane.f32.xlu0 %v3184_v18 }
 0x2a3   :  { %v2557_v14 = vpop.f32.mrf.mxu0  ;;  %v12571_v15 = vadd.f32 %v2481_v2, %v12558_v17 }
 0x2a4   :  { %v12577_v56 = vadd.f32 %v2557_v14, %v12558_v17  ;;  %v11137_v0 = vpop.f32.mrf.mxu1  ;;  %v12640_v14 = vpop.permute.xlu0 %1350 }
 0x2a5   :  { %v11142_v39 = vpop.f32.mrf.mxu0  ;;  %v3187_v42 = vsel %vm1952_vm2, %v12571_v15, -inf  ;;  %v12636_v2 = vpop.permute.xlu1 %1344 }
 0x2a6   :  { %3188 = vmax.xlane.f32.xlu1 %v3187_v42  ;;  %v2633_v43 = vpop.f32.mrf.mxu1  ;;  %v3190_v7 = vsel %vm1952_vm2, %v12577_v56, -inf }
 0x2a7   :  { %v12584_v31 = vadd.f32 %v2633_v43, %v12574_v3  ;;  %3191 = vmax.xlane.f32.xlu0 %v3190_v7 }
 0x2a8   :  { %v2709_v11 = vpop.f32.mrf.mxu0  ;;  %v11147_v30 = vpop.f32.mrf.mxu1 }
 0x2a9   :  { %v12587_v8 = vadd.f32 %v2709_v11, %v12574_v3  ;;  %v3193_v49 = vsel %vm1952_vm2, %v12584_v31, -inf  ;;  %v12638_v18 = vpop.permute.xlu1 %1358 }
 0x2aa   :  { %v11152_v38 = vpop.f32.mrf.mxu0  ;;  %3194 = vmax.xlane.f32.xlu1 %v3193_v49 }
 0x2ab   :  { %v3196_v51 = vsel %vm1952_vm2, %v12587_v8, -inf }
 0x2ac   :  { %3197 = vmax.xlane.f32.xlu0 %v3196_v51  ;;  %v2861_v52 = vpop.f32.mrf.mxu0 }
 0x2ad   :  { %v2785_v9 = vpop.f32.mrf.mxu1  ;;  %v12594_v5 = vadd.f32 %v2861_v52, %v12574_v3  ;;  %v12642_v0 = vpop.permute.xlu1 %1366 }
 0x2ae   :  { %v12597_v6 = vadd.f32 %v2785_v9, %v12574_v3  ;;  %v11162_v58 = vpop.f32.mrf.mxu0 }
 0x2af   :  { %v11157_v41 = vpop.f32.mrf.mxu1  ;;  %v3202_v45 = vsel %vm1952_vm2, %v12594_v5, -inf }
 0x2b0   :  { %v3199_v37 = vsel %vm1952_vm2, %v12597_v6, -inf  ;;  %v3013_v57 = vpop.f32.mrf.mxu0  ;;  %3203 = vmax.xlane.f32.xlu0 %v3202_v45 }
 0x2b1   :  { %3200 = vmax.xlane.f32.xlu1 %v3199_v37  ;;  %v2937_v26 = vpop.f32.mrf.mxu1  ;;  %v12613_v48 = vadd.f32 %v3013_v57, %v12610_v60 }
 0x2b2   :  { %v11172_v46 = vpop.f32.mrf.mxu0  ;;  %v12616_v62 = vadd.f32 %v2937_v26, %v12610_v60 }
 0x2b3   :  { %v11167_v10 = vpop.f32.mrf.mxu1 }
 0x2b4   :  { %v3165_v55 = vpop.f32.mrf.mxu0 }
 0x2b5   :  { %v3089_v54 = vpop.f32.mrf.mxu1  ;;  %v12619_v34 = vadd.f32 %v3165_v55, %v12610_v60 }
 0x2b6   :  { %v11182_v4 = vpop.f32.mrf.mxu0 }
 0x2b7   :  { %v11177_v28 = vpop.f32.mrf.mxu1  ;;  %v3214_v1 = vsel %vm1952_vm2, %v12619_v34, -inf }
 0x2c2   :  { %1360 = vrot.lane.b32.xlu1 %v12021_v20, %s11886_s23  ;;  %v3208_v20 = vsel %vm1952_vm2, %v12613_v48, -inf }
 0x2c6   :  { %1368 = vrot.lane.b32.xlu1 %v12029_v22, %s11886_s23  ;;  %1352 = vrot.lane.b32.xlu0 %v12017_v19, %s11886_s23  ;;  %v12624_v22 = vadd.f32 %v3089_v54, %v12610_v60  ;;  %v3205_v19 = vsel %vm1952_vm2, %v12616_v62, -inf }
 0x2c8   :  { %v3211_v40 = vsel %vm1952_vm2, %v12624_v22, -inf }
 0x2e5   :  { %3209 = vmax.xlane.f32.xlu0 %v3208_v20 }
 0x2e9   :  { %3215 = vmax.xlane.f32.xlu0 %v3214_v1 }
 0x2ea   :  { %3206 = vmax.xlane.f32.xlu1 %v3205_v19 }
 0x2ee   :  { %3212 = vmax.xlane.f32.xlu1 %v3211_v40 }
 0x2ff   :  { %1346 = vrot.lane.b32.xlu1 %v11984_v12, %s11886_s23 }
 0x31b   :  { %v3171_v39 = vpop.xlane.xlu0 %3170 }
 0x31c   :  { %v3174_v42 = vpop.xlane.xlu1 %3173  ;;  %v3217_v43 = vsub.f32 %v12538_v16, %v3171_v39 }
 0x31d   :  { %v3218_v7 = vsub.f32 %v12541_v32, %v3174_v42 }
 0x31e   :  { %v3233_v11 = vmul.f32 1.442695, %v3217_v43 }
 0x31f   :  { %v3235_v30 = vmul.f32 1.442695, %v3218_v7 }
 0x320   :  { %11673 = vpow2.f32 %v3233_v11  ;;  %v3177_v12 = vpop.xlane.xlu0 %3176 }
 0x321   :  { %11675 = vpow2.f32 %v3235_v30  ;;  %v3219_v38 = vsub.f32 %v12548_v53, %v3177_v12 }
 0x323   :  { %v3237_v49 = vmul.f32 1.442695, %v3219_v38 }
 0x324   :  { %v3180_v51 = vpop.xlane.xlu0 %3179 }
 0x325   :  { %11677 = vpow2.f32 %v3237_v49  ;;  %v3220_v52 = vsub.f32 %v12551_v33, %v3180_v51 }
 0x327   :  { %v3239_v9 = vmul.f32 1.442695, %v3220_v52 }
 0x329   :  { %11679 = vpow2.f32 %v3239_v9 }
 0x32a   :  { %v3183_v41 = vpop.xlane.xlu1 %3182 }
 0x32b   :  { %v3221_v58 = vsub.f32 %v12561_v61, %v3183_v41  ;;  %v3186_v16 = vpop.xlane.xlu0 %3185 }
 0x32c   :  { %v3222_v32 = vsub.f32 %v12564_v63, %v3186_v16 }
 0x32d   :  { %v12649_v37 = vpop.eup %11673  ;;  %v3241_v26 = vmul.f32 1.442695, %v3221_v58 }
 0x32e   :  { %v12652_v45 = vpop.eup %11675  ;;  %v3265_v53 = vsel %vm1952_vm2, %v12649_v37, 0.0  ;;  %v3243_v10 = vmul.f32 1.442695, %v3222_v32 }
 0x32f   :  { %v3189_v57 = vpop.xlane.xlu1 %3188  ;;  %v3268_v33 = vsel %vm1952_vm2, %v12652_v45, 0.0  ;;  %3266 = vadd.xlane.f32.xlu1 %v3265_v53  ;;  %11681 = vpow2.f32 %v3241_v26 }
 0x330   :  { %v3223_v61 = vsub.f32 %v12571_v15, %v3189_v57  ;;  %v3192_v46 = vpop.xlane.xlu0 %3191  ;;  %3269 = vadd.xlane.f32.xlu0 %v3268_v33  ;;  %11683 = vpow2.f32 %v3243_v10 }
 0x331   :  { %v3224_v63 = vsub.f32 %v12577_v56, %v3192_v46 }
 0x332   :  { %v12660_v54 = vpop.eup %11677  ;;  %v3245_v55 = vmul.f32 1.442695, %v3223_v61 }
 0x333   :  { %v3195_v28 = vpop.xlane.xlu1 %3194  ;;  %v3247_v4 = vmul.f32 1.442695, %v3224_v63  ;;  %v3271_v59 = vsel %vm1952_vm2, %v12660_v54, 0.0 }
 0x334   :  { %v3225_v20 = vsub.f32 %v12584_v31, %v3195_v28  ;;  %3272 = vadd.xlane.f32.xlu0 %v3271_v59 }
 0x335   :  { %v3198_v19 = vpop.xlane.xlu0 %3197  ;;  %11685 = vpow2.f32 %v3247_v4 }
 0x336   :  { %v12665_v1 = vpop.eup %11679  ;;  %11687 = vpow2.f32 %v3245_v55  ;;  %v3249_v15 = vmul.f32 1.442695, %v3225_v20  ;;  %v3226_v40 = vsub.f32 %v12587_v8, %v3198_v19 }
 0x337   :  { %v3274_v56 = vsel %vm1952_vm2, %v12665_v1, 0.0 }
 0x338   :  { %3275 = vadd.xlane.f32.xlu1 %v3274_v56  ;;  %11689 = vpow2.f32 %v3249_v15  ;;  %v3251_v7 = vmul.f32 1.442695, %v3226_v40 }
 0x339   :  { %v3204_v42 = vpop.xlane.xlu0 %3203 }
 0x33a   :  { %v3201_v39 = vpop.xlane.xlu1 %3200  ;;  %v3228_v31 = vsub.f32 %v12594_v5, %v3204_v42  ;;  %11691 = vpow2.f32 %v3251_v7  ;;  %v1472_v42 = vcombine.low %v12640_v14, %v12642_v0 }
 0x33b   :  { %v3227_v43 = vsub.f32 %v12597_v6, %v3201_v39 }
 0x33c   :  { %v3255_v11 = vmul.f32 1.442695, %v3228_v31  ;;  %v12672_v30 = vpop.eup %11681  ;;  %v1456_v31 = vcombine.low %v12634_v44, %v12638_v18 }
 0x33d   :  { %v12674_v12 = vpop.eup %11683  ;;  %v3253_v38 = vmul.f32 1.442695, %v3227_v43  ;;  %v3277_v8 = vsel %vm1952_vm2, %v12672_v30, 0.0  ;;  %v12710_v33 = vpop.permute.xlu0 %1352  ;;  %v1473_v43 = vcombine.high %v12640_v14, %v12642_v0 }
 0x33e   :  { %11693 = vpow2.f32 %v3255_v11  ;;  %3278 = vadd.xlane.f32.xlu0 %v3277_v8  ;;  %v3280_v49 = vsel %vm1952_vm2, %v12674_v12, 0.0  ;;  %v12708_v10 = vpop.permute.xlu1 %1360  ;;  %v1457_v11 = vcombine.high %v12634_v44, %v12638_v18 }
 0x33f   :  { %11695 = vpow2.f32 %v3253_v38  ;;  %v1480_v38 = vrot.slane %v1472_v42, %v12075_v35 }
 0x340   :  { %v1471_v8 = vrot.slane %v1457_v11, %v12075_v35 }
 0x342   :  { %v12680_v51 = vpop.eup %11685  ;;  %3281 = vadd.xlane.f32.xlu0 %v3280_v49  ;;  %v12712_v61 = vpop.permute.xlu1 %1368 }
 0x343   :  { %v12682_v6 = vpop.eup %11687  ;;  %v3286_v5 = vsel %vm1952_vm2, %v12680_v51, 0.0 }
 0x344   :  { %3287 = vadd.xlane.f32.xlu1 %v3286_v5  ;;  %v3283_v52 = vsel %vm1952_vm2, %v12682_v6, 0.0 }
 0x345   :  { %v12688_v9 = vpop.eup %11689 }
 0x346   :  { %3284 = vadd.xlane.f32.xlu0 %v3283_v52  ;;  %v3289_v41 = vsel %vm1952_vm2, %v12688_v9, 0.0 }
 0x347   :  { %v12692_v58 = vpop.eup %11691 }
 0x348   :  { %v3292_v26 = vsel %vm1952_vm2, %v12692_v58, 0.0 }
 0x34a   :  { %3290 = vadd.xlane.f32.xlu0 %v3289_v41 }
 0x34b   :  { %v12694_v16 = vpop.eup %11693 }
 0x34c   :  { %v3298_v32 = vsel %vm1952_vm2, %v12694_v16, 0.0  ;;  %v12700_v53 = vpop.eup %11695 }
 0x34d   :  { %3299 = vadd.xlane.f32.xlu1 %v3298_v32  ;;  %v3295_v57 = vsel %vm1952_vm2, %v12700_v53, 0.0 }
 0x34e   :  { %3293 = vadd.xlane.f32.xlu0 %v3292_v26 }
 0x352   :  { %3296 = vadd.xlane.f32.xlu0 %v3295_v57 }
 0x35e   :  { %1362 = vrot.lane.b32.xlu1 %v12047_v25, %s11886_s23 }
 0x362   :  { %1370 = vrot.lane.b32.xlu1 %v12045_v24, %s11886_s23 }
 0x36e   :  { %v3210_v46 = vpop.xlane.xlu0 %3209 }
 0x36f   :  { %v3230_v63 = vsub.f32 %v12613_v48, %v3210_v46 }
 0x371   :  { %v3259_v25 = vmul.f32 1.442695, %v3230_v63 }
 0x372   :  { %v3216_v28 = vpop.xlane.xlu0 %3215 }
 0x373   :  { %v3207_v55 = vpop.xlane.xlu1 %3206  ;;  %v3232_v59 = vsub.f32 %v12619_v34, %v3216_v28 }
 0x374   :  { %v3229_v4 = vsub.f32 %v12616_v62, %v3207_v55 }
 0x375   :  { %v3263_v19 = vmul.f32 1.442695, %v3232_v59 }
 0x376   :  { %v3257_v20 = vmul.f32 1.442695, %v3229_v4  ;;  %v1540_v4 = vcombine.low %v12710_v33, %v12712_v61 }
 0x377   :  { %v3213_v56 = vpop.xlane.xlu1 %3212 }
 0x378   :  { %11697 = vpow2.f32 %v3257_v20  ;;  %v3231_v39 = vsub.f32 %v12624_v22, %v3213_v56  ;;  %v1464_v22 = vrot.slane %v1456_v31, %v12075_v35  ;;  %v1541_v20 = vcombine.high %v12710_v33, %v12712_v61 }
 0x379   :  { %11699 = vpow2.f32 %v3263_v19  ;;  %v1525_v19 = vcombine.high %v12636_v2, %v12708_v10 }
 0x37a   :  { %11701 = vpow2.f32 %v3259_v25  ;;  %v3261_v7 = vmul.f32 1.442695, %v3231_v39  ;;  %v1488_v49 = vcombine.low %v1464_v22, %v1480_v38  ;;  %v1489_v5 = vcombine.high %v1464_v22, %v1480_v38 }
 0x37b   :  { %v12744_v0 = vpop.permute.xlu1 %1346  ;;  %v1524_v25 = vcombine.low %v12636_v2, %v12708_v10  ;;  %v1548_v39 = vrot.slane %v1540_v4, %v12075_v35  ;;  %v1555_v61 = vrot.slane %v1541_v20, %v12075_v35  ;;  %v1539_v10 = vrot.slane %v1525_v19, %v12075_v35 }
 0x37c   :  { %11703 = vpow2.f32 %v3261_v7  ;;  %v1496_v41 = vrot.slane %v1488_v49, %v12094_v47  ;;  %v1503_v32 = vrot.slane %v1489_v5, %v12094_v47 }
 0x37d   :  { %v1532_v2 = vrot.slane %v1524_v25, %v12075_v35  ;;  %v1573_v22 = vcombine.high %v1539_v10, %v1555_v61 }
 0x37e   :  { %v1728_v57 = vcombine.low %v1496_v41, %v1503_v32  ;;  %v10676_v46 = vcombine.high %v1496_v41, %v1503_v32 }
 0x37f   :  { %v1556_v7 = vcombine.low %v1532_v2, %v1548_v39  ;;  %v1557_v38 = vcombine.high %v1532_v2, %v1548_v39 }
 0x381   :  { %v1564_v5 = vrot.slane %v1556_v7, %v12094_v47  ;;  %v1571_v32 = vrot.slane %v1557_v38, %v12094_v47 }
 0x383   :  { %v10678_v39 = vcombine.high %v1564_v5, %v1571_v32 }
 0x385   :  { %v12717_v24 = vpop.eup %11697  ;;  %v1811_v7 = vrot.slane %v10678_v39, %v12075_v35 }
 0x386   :  { %v12719_v15 = vpop.eup %11699  ;;  %v3301_v40 = vsel %vm1952_vm2, %v12717_v24, 0.0 }
 0x387   :  { %v12723_v48 = vpop.eup %11701  ;;  %3302 = vadd.xlane.f32.xlu0 %v3301_v40  ;;  %v3310_v62 = vsel %vm1952_vm2, %v12719_v15, 0.0 }
 0x388   :  { %3311 = vadd.xlane.f32.xlu1 %v3310_v62  ;;  %v3304_v34 = vsel %vm1952_vm2, %v12723_v48, 0.0  ;;  %v1735_v62 = vrot.slane %v1728_v57, %v12075_v35 }
 0x389   :  { %v12752_v59 = vpop.eup %11703 }
 0x38a   :  { %v3307_v42 = vsel %vm1952_vm2, %v12752_v59, 0.0 }
 0x38b   :  { %3305 = vadd.xlane.f32.xlu0 %v3304_v34  ;;  %v1743_v34 = vrot.slane %v10676_v46, %v12075_v35 }
 0x38d   :  { %v1760_v31 = vcombine.low %v1735_v62, %v1743_v34  ;;  %v1761_v20 = vcombine.high %v1735_v62, %v1743_v34 }
 0x3a1   :  { %1354 = vrot.lane.b32.xlu0 %v12037_v23, %s11886_s23  ;;  %v1487_v23 = vrot.slane %v1473_v43, %v12075_v35 }
 0x3a3   :  { %v1504_v52 = vcombine.low %v1471_v8, %v1487_v23  ;;  %v1505_v14 = vcombine.high %v1471_v8, %v1487_v23  ;;  %v1572_v23 = vcombine.low %v1539_v10, %v1555_v61  ;;  %v3363_v8 = vpack.c.bf16 %v12519_v27, %v12519_v27 }
 0x3a4   :  { %v3364_v27 = vpack.c.bf16 %v12523_v13, %v12523_v13 }
 0x3a5   :  { %v1512_v44 = vrot.slane %v1504_v52, %v12094_v47  ;;  %v1519_v18 = vrot.slane %v1505_v14, %v12094_v47  ;;  %v1768_v52 = vrot.slane %v1760_v31, %v12094_v47 }
 0x3a6   :  { %v3520_v13 = vsel %vm3380_vm3, %v3364_v27, 0 }
 0x3a7   :  { %v1744_v63 = vcombine.low %v1512_v44, %v1519_v18  ;;  %v10677_v28 = vcombine.high %v1512_v44, %v1519_v18  ;;  %v1580_v44 = vrot.slane %v1572_v23, %v12094_v47  ;;  %v1587_v18 = vrot.slane %v1573_v22, %v12094_v47 }
 0x3a9   :  { %v1751_v56 = vrot.slane %v1744_v63, %v12075_v35  ;;  %v1759_v33 = vrot.slane %v10677_v28, %v12075_v35  ;;  %v10679_v61 = vcombine.high %v1580_v44, %v1587_v18 }
 0x3ab   :  { %v1776_v11 = vcombine.low %v1751_v56, %v1759_v33  ;;  %v1777_v25 = vcombine.high %v1751_v56, %v1759_v33  ;;  %v1775_v56 = vrot.slane %v1761_v20, %v12094_v47 }
 0x3ad   :  { %v1784_v14 = vrot.slane %v1776_v11, %v12094_v47  ;;  %v1791_v33 = vrot.slane %v1777_v25, %v12094_v47 }
 0x3af   :  { %v1792_v4 = vcombine.low %v1768_v52, %v1784_v14 }
 0x3b1   :  { %v3365_v34 = vpack.c.bf16 %v1792_v4, %v1792_v4 }
 0x3b8   :  { %v3267_v26 = vpop.xlane.xlu1 %3266 }
 0x3b9   :  { %11705 = vrcp.f32 %v3267_v26  ;;  %v3270_v55 = vpop.xlane.xlu0 %3269 }
 0x3ba   :  { %11707 = vrcp.f32 %v3270_v55  ;;  %v3474_v55 = vsel %vm3380_vm3, %v3363_v8, 0 }
 0x3bd   :  { %v3273_v40 = vpop.xlane.xlu0 %3272 }
 0x3be   :  { %11709 = vrcp.f32 %v3273_v40  ;;  %v1796_v40 = vcombine.low %v1564_v5, %v1571_v32  ;;  %v1794_v5 = vcombine.low %v1775_v56, %v1791_v33 }
 0x3c0   :  { %3308 = vadd.xlane.f32.xlu0 %v3307_v42  ;;  %v1812_v42 = vcombine.low %v1580_v44, %v1587_v18  ;;  %v1795_v44 = vcombine.high %v1775_v56, %v1791_v33 }
 0x3c1   :  { %v3276_v43 = vpop.xlane.xlu1 %3275 }
 0x3c2   :  { %11711 = vrcp.f32 %v3276_v43  ;;  %v1803_v43 = vrot.slane %v1796_v40, %v12075_v35  ;;  %v1819_v31 = vrot.slane %v1812_v42, %v12075_v35 }
 0x3c4   :  { %v1829_v4 = vcombine.high %v1803_v43, %v1811_v7 }
 0x3c6   :  { %v11706_v49 = vpop.eup %11705 }
 0x3c7   :  { %v11708_v41 = vpop.eup %11707  ;;  %v3329_v26 = vmul.f32 %v11706_v49, %v12649_v37  ;;  %v3279_v57 = vpop.xlane.xlu0 %3278  ;;  %v3566_v49 = vsel %vm3380_vm3, %v3365_v34, 0 }
 0x3c8   :  { %v3330_v46 = vmul.f32 %v11708_v41, %v12652_v45  ;;  %11713 = vrcp.f32 %v3279_v57  ;;  %v1793_v45 = vcombine.high %v1768_v52, %v1784_v14  ;;  %v1828_v52 = vcombine.low %v1803_v43, %v1811_v7 }
 0x3c9   :  { %v3345_v63 = vpack.c.bf16 %v3329_v26, %v3329_v26  ;;  %v3367_v26 = vpack.c.bf16 %v1794_v5, %v1794_v5 }
 0x3ca   :  { %v3346_v28 = vpack.c.bf16 %v3330_v46, %v3330_v46  ;;  %v3366_v23 = vpack.c.bf16 %v1793_v45, %v1793_v45  ;;  %v1836_v57 = vrot.slane %v1828_v52, %v12094_v47 }
 0x3cb   :  { %v11710_v19 = vpop.eup %11709  ;;  %11186 = vmatmul.mubr.msk.bf16.vlgmr.msra.gmra.mxu1 %vm1952_vm2, %v3345_v63  ;;  %v3282_v37 = vpop.xlane.xlu0 %3281  ;;  %v3658_v25 = vsel %vm3380_vm3, %v3367_v26, 0 }
 0x3cc   :  { %11192 = vmatmul.mubr.msk.bf16.vlgmr.msra.gmra.mxu0 %vm1952_vm2, %v3346_v28  ;;  %11196 = vmatpush3.bf16.msra.mxu1 %v3474_v55  ;;  %11715 = vrcp.f32 %v3282_v37  ;;  %v3331_v62 = vmul.f32 %v11710_v19, %v12660_v54  ;;  %v1827_v54 = vrot.slane %v10679_v61, %v12075_v35  ;;  %v3612_v32 = vsel %vm3380_vm3, %v3366_v23, 0 }
 0x3cd   :  { %v3288_v2 = vpop.xlane.xlu1 %3287  ;;  %11202 = vmatpush3.bf16.msra.mxu0 %v3520_v13  ;;  %11197 = vmatprep.mubr.msk.bf16.mxu1 %vm11885_vm1, %v11884_v21  ;;  %v3368_v28 = vpack.c.bf16 %v1795_v44, %v1795_v44 }
 0x3ce   :  { %11203 = vmatprep.mubr.msk.bf16.mxu0 %vm11885_vm1, %v11884_v21  ;;  %11207 = vmatprep.subr.bf16.mxu1 %v11884_v21  ;;  %11717 = vrcp.f32 %v3288_v2  ;;  %v3347_v22 = vpack.c.bf16 %v3331_v62, %v3331_v62  ;;  %v1844_v14 = vcombine.low %v1819_v31, %v1827_v54  ;;  %v1845_v40 = vcombine.high %v1819_v31, %v1827_v54 }
 0x3cf   :  { %v11712_v10 = vpop.eup %11711  ;;  %11213 = vmatprep.subr.bf16.mxu0 %v11884_v21  ;;  %v3285_v11 = vpop.xlane.xlu0 %3284  ;;  %v3704_v13 = vsel %vm3380_vm3, %v3368_v28, 0 }
 0x3d0   :  { %v3332_v38 = vmul.f32 %v11712_v10, %v12665_v1  ;;  %11719 = vrcp.f32 %v3285_v11  ;;  %v1852_v46 = vrot.slane %v1844_v14, %v12094_v47  ;;  %v1859_v34 = vrot.slane %v1845_v40, %v12094_v47 }
 0x3d2   :  { %v3348_v8 = vpack.c.bf16 %v3332_v38, %v3332_v38  ;;  %v1860_v19 = vcombine.low %v1836_v57, %v1852_v46  ;;  %v1861_v62 = vcombine.high %v1836_v57, %v1852_v46 }
 0x3d3   :  { %11198 = vmatmul.mubr.msk.bf16.vlgmr.msra.gmra.mxu1 %vm1952_vm2, %v3347_v22  ;;  %v3291_v41 = vpop.xlane.xlu0 %3290 }
 0x3d4   :  { %11204 = vmatmul.mubr.msk.bf16.vlgmr.msra.gmra.mxu0 %vm1952_vm2, %v3348_v8  ;;  %11208 = vmatpush3.bf16.msra.mxu1 %v3566_v49  ;;  %11721 = vrcp.f32 %v3291_v41  ;;  %v3369_v2 = vpack.c.bf16 %v1860_v19, %v1860_v19 }
 0x3d5   :  { %11214 = vmatpush3.bf16.msra.mxu0 %v3612_v32  ;;  %11209 = vmatprep.mubr.msk.bf16.mxu1 %vm11885_vm1, %v11884_v21  ;;  %v11714_v1 = vpop.eup %11713 }
 0x3d6   :  { %11215 = vmatprep.mubr.msk.bf16.mxu0 %vm11885_vm1, %v11884_v21  ;;  %11219 = vmatprep.subr.bf16.mxu1 %v11884_v21  ;;  %v3333_v18 = vmul.f32 %v11714_v1, %v12672_v30  ;;  %v3300_v37 = vpop.xlane.xlu1 %3299  ;;  %v3750_v43 = vsel %vm3380_vm3, %v3369_v2, 0 }
 0x3d7   :  { %11225 = vmatprep.subr.bf16.mxu0 %v11884_v21  ;;  %v3294_v27 = vpop.xlane.xlu0 %3293 }
 0x3d8   :  { %11723 = vrcp.f32 %v3294_v27  ;;  %v3349_v63 = vpack.c.bf16 %v3333_v18, %v3333_v18 }
 0x3d9   :  { %v11716_v55 = vpop.eup %11715 }
 0x3da   :  { %v3334_v20 = vmul.f32 %v11716_v55, %v12674_v12  ;;  %v1843_v12 = vrot.slane %v1829_v4, %v12094_v47  ;;  %v1363_v18 = vpop.permute.xlu1 %1362 }
 0x3db   :  { %11210 = vmatmul.mubr.msk.bf16.vlgmr.msra.gmra.mxu1 %vm1952_vm2, %v3349_v63  ;;  %v3297_v30 = vpop.xlane.xlu0 %3296  ;;  %v11718_v39 = vpop.eup %11717  ;;  %v1592_v57 = vcombine.low %v12744_v0, %v1363_v18 }
 0x3dc   :  { %11220 = vmatpush3.bf16.msra.mxu1 %v3658_v25  ;;  %11221 = vmatprep.mubr.msk.bf16.mxu1 %vm11885_vm1, %v11884_v21  ;;  %11725 = vrcp.f32 %v3297_v30  ;;  %v3350_v42 = vpack.c.bf16 %v3334_v20, %v3334_v20  ;;  %v3336_v33 = vmul.f32 %v11718_v39, %v12680_v51  ;;  %v1862_v7 = vcombine.low %v1843_v12, %v1859_v34 }
 0x3dd   :  { %11231 = vmatprep.subr.bf16.mxu1 %v11884_v21  ;;  %v11720_v61 = vpop.eup %11719  ;;  %11727 = vrcp.f32 %v3300_v37  ;;  %v1863_v23 = vcombine.high %v1843_v12, %v1859_v34  ;;  %v1600_v28 = vrot.slane %v1592_v57, %v12075_v35 }
 0x3de   :  { %11216 = vmatmul.mubr.msk.bf16.vlgmr.msra.gmra.mxu0 %vm1952_vm2, %v3350_v42  ;;  %v3335_v45 = vmul.f32 %v11720_v61, %v12682_v6  ;;  %v3370_v6 = vpack.c.bf16 %v1861_v62, %v1861_v62  ;;  %v3352_v31 = vpack.c.bf16 %v3336_v33, %v3336_v33  ;;  %v3371_v38 = vpack.c.bf16 %v1862_v7, %v1862_v7  ;;  %v1371_v46 = vpop.permute.xlu1 %1370 }
 0x3df   :  { %11226 = vmatpush3.bf16.msra.mxu0 %v3704_v13  ;;  %11227 = vmatprep.mubr.msk.bf16.mxu0 %vm11885_vm1, %v11884_v21  ;;  %v3372_v5 = vpack.c.bf16 %v1863_v23, %v1863_v23 }
 0x3e0   :  { %11237 = vmatprep.subr.bf16.mxu0 %v11884_v21  ;;  %v3351_v56 = vpack.c.bf16 %v3335_v45, %v3335_v45  ;;  %v3796_v51 = vsel %vm3380_vm3, %v3370_v6, 0 }
 0x3e1   :  { %v11722_v10 = vpop.eup %11721 }
 0x3e2   :  { %v3337_v54 = vmul.f32 %v11722_v10, %v12688_v9  ;;  %v3842_v9 = vsel %vm3380_vm3, %v3371_v38, 0 }
 0x3e3   :  { %11222 = vmatmul.mubr.msk.bf16.vlgmr.msra.gmra.mxu1 %vm1952_vm2, %v3351_v56 }
 0x3e4   :  { %11232 = vmatpush3.bf16.msra.mxu1 %v3750_v43  ;;  %11233 = vmatprep.mubr.msk.bf16.mxu1 %vm11885_vm1, %v11884_v21  ;;  %v3353_v22 = vpack.c.bf16 %v3337_v54, %v3337_v54 }
 0x3e5   :  { %11243 = vmatprep.subr.bf16.mxu1 %v11884_v21  ;;  %v11724_v11 = vpop.eup %11723 }
 0x3e6   :  { %11228 = vmatmul.mubr.msk.bf16.vlgmr.msra.gmra.mxu0 %vm1952_vm2, %v3352_v31  ;;  %v3338_v8 = vmul.f32 %v11724_v11, %v12692_v58  ;;  %v3888_v58 = vsel %vm3380_vm3, %v3372_v5, 0 }
 0x3e7   :  { %11238 = vmatpush3.bf16.msra.mxu0 %v3796_v51  ;;  %11239 = vmatprep.mubr.msk.bf16.mxu0 %vm11885_vm1, %v11884_v21 }
 0x3e8   :  { %11249 = vmatprep.subr.bf16.mxu0 %v11884_v21  ;;  %v3354_v52 = vpack.c.bf16 %v3338_v8, %v3338_v8 }
 0x3e9   :  { %v11726_v49 = vpop.eup %11725 }
 0x3ea   :  { %v3339_v14 = vmul.f32 %v11726_v49, %v12700_v53  ;;  %v11728_v41 = vpop.eup %11727 }
 0x3eb   :  { %11234 = vmatmul.mubr.msk.bf16.vlgmr.msra.gmra.mxu1 %vm1952_vm2, %v3353_v22  ;;  %v3340_v1 = vmul.f32 %v11728_v41, %v12694_v16  ;;  %v1593_v16 = vcombine.high %v12744_v0, %v1363_v18 }
 0x3ec   :  { %11244 = vmatpush3.bf16.msra.mxu1 %v3842_v9  ;;  %11245 = vmatprep.mubr.msk.bf16.mxu1 %vm11885_vm1, %v11884_v21  ;;  %v3355_v32 = vpack.c.bf16 %v3339_v14, %v3339_v14 }
 0x3ed   :  { %11255 = vmatprep.subr.bf16.mxu1 %v11884_v21  ;;  %v3356_v53 = vpack.c.bf16 %v3340_v1, %v3340_v1  ;;  %v1607_v4 = vrot.slane %v1593_v16, %v12075_v35 }
 0x3ee   :  { %11240 = vmatmul.mubr.msk.bf16.vlgmr.msra.gmra.mxu0 %vm1952_vm2, %v3354_v52 }
 0x3ef   :  { %11250 = vmatpush3.bf16.msra.mxu0 %v3888_v58  ;;  %11251 = vmatprep.mubr.msk.bf16.mxu0 %vm11885_vm1, %v11884_v21 }
 0x3f0   :  { %11261 = vmatprep.subr.bf16.mxu0 %v11884_v21 }
 0x3f3   :  { %11246 = vmatmul.mubr.msk.bf16.vlgmr.msra.gmra.mxu1 %vm1952_vm2, %v3355_v32 }
 0x3f4   :  { %11257 = vmatprep.mubr.msk.bf16.mxu1 %vm11885_vm1, %v11884_v21 }
 0x3f6   :  { %11252 = vmatmul.mubr.msk.bf16.vlgmr.msra.gmra.mxu0 %vm1952_vm2, %v3356_v53 }
 0x3f7   :  { %11263 = vmatprep.mubr.msk.bf16.mxu0 %vm11885_vm1, %v11884_v21 }
 0x410   :  { %v3303_v44 = vpop.xlane.xlu0 %3302 }
 0x411   :  { %11729 = vrcp.f32 %v3303_v44  ;;  %v3312_v42 = vpop.xlane.xlu1 %3311 }
 0x414   :  { %v3306_v26 = vpop.xlane.xlu0 %3305 }
 0x415   :  { %11731 = vrcp.f32 %v3306_v26 }
 0x416   :  { %11733 = vrcp.f32 %v3312_v42 }
 0x418   :  { %v1355_v27 = vpop.permute.xlu0 %1354 }
 0x419   :  { %v1608_v63 = vcombine.low %v1355_v27, %v1371_v46  ;;  %v1609_v55 = vcombine.high %v1355_v27, %v1371_v46 }
 0x41b   :  { %v1616_v20 = vrot.slane %v1608_v63, %v12075_v35  ;;  %v1623_v25 = vrot.slane %v1609_v55, %v12075_v35 }
 0x41d   :  { %v1624_v19 = vcombine.low %v1600_v28, %v1616_v20  ;;  %v1625_v40 = vcombine.high %v1600_v28, %v1616_v20  ;;  %v1640_v30 = vcombine.low %v1607_v4, %v1623_v25  ;;  %v1641_v39 = vcombine.high %v1607_v4, %v1623_v25 }
 0x41e   :  { %v11730_v54 = vpop.eup %11729 }
 0x41f   :  { %v1632_v0 = vrot.slane %v1624_v19, %v12094_v47  ;;  %v1639_v61 = vrot.slane %v1625_v40, %v12094_v47  ;;  %v1648_v37 = vrot.slane %v1640_v30, %v12094_v47  ;;  %v1655_v13 = vrot.slane %v1641_v39, %v12094_v47 }
 0x420   :  { %v3341_v41 = vmul.f32 %v11730_v54, %v12717_v24 }
 0x421   :  { %v1864_v12 = vcombine.low %v1632_v0, %v1639_v61  ;;  %v10680_v45 = vcombine.high %v1632_v0, %v1639_v61  ;;  %v1880_v2 = vcombine.low %v1648_v37, %v1655_v13  ;;  %v10681_v62 = vcombine.high %v1648_v37, %v1655_v13 }
 0x422   :  { %v11732_v22 = vpop.eup %11731  ;;  %v3357_v26 = vpack.c.bf16 %v3341_v41, %v3341_v41 }
 0x423   :  { %v1871_v34 = vrot.slane %v1864_v12, %v12075_v35  ;;  %v1879_v56 = vrot.slane %v10680_v45, %v12075_v35  ;;  %v1887_v33 = vrot.slane %v1880_v2, %v12075_v35  ;;  %v1895_v10 = vrot.slane %v10681_v62, %v12075_v35  ;;  %v11734_v18 = vpop.eup %11733 }
 0x424   :  { %v3342_v58 = vmul.f32 %v11732_v22, %v12723_v48  ;;  %v3344_v16 = vmul.f32 %v11734_v18, %v12719_v15 }
 0x425   :  { %v1896_v43 = vcombine.low %v1871_v34, %v1879_v56  ;;  %v1912_v6 = vcombine.low %v1887_v33, %v1895_v10  ;;  %v1897_v7 = vcombine.high %v1871_v34, %v1879_v56  ;;  %v1913_v31 = vcombine.high %v1887_v33, %v1895_v10 }
 0x426   :  { %v3358_v57 = vpack.c.bf16 %v3342_v58, %v3342_v58  ;;  %v3360_v46 = vpack.c.bf16 %v3344_v16, %v3344_v16 }
 0x427   :  { %v1904_v11 = vrot.slane %v1896_v43, %v12094_v47  ;;  %v1920_v51 = vrot.slane %v1912_v6, %v12094_v47  ;;  %v1911_v38 = vrot.slane %v1897_v7, %v12094_v47  ;;  %v1927_v23 = vrot.slane %v1913_v31, %v12094_v47 }
 0x429   :  { %v1928_v8 = vcombine.low %v1904_v11, %v1920_v51  ;;  %v1929_v49 = vcombine.high %v1904_v11, %v1920_v51  ;;  %v1930_v9 = vcombine.low %v1911_v38, %v1927_v23  ;;  %v1931_v5 = vcombine.high %v1911_v38, %v1927_v23 }
 0x42b   :  { %v3373_v52 = vpack.c.bf16 %v1928_v8, %v1928_v8  ;;  %v3374_v14 = vpack.c.bf16 %v1929_v49, %v1929_v49  ;;  %v3375_v53 = vpack.c.bf16 %v1930_v9, %v1930_v9  ;;  %v3376_v44 = vpack.c.bf16 %v1931_v5, %v1931_v5 }
 0x42d   :  { %v3934_v32 = vsel %vm3380_vm3, %v3373_v52, 0  ;;  %v3980_v1 = vsel %vm3380_vm3, %v3374_v14, 0  ;;  %v4026_v24 = vsel %vm3380_vm3, %v3375_v53, 0  ;;  %v4072_v48 = vsel %vm3380_vm3, %v3376_v44, 0 }
 0x42e   :  { %11256 = vmatpush3.bf16.msra.mxu1 %v3934_v32  ;;  %11262 = vmatpush3.bf16.msra.mxu0 %v3980_v1 }
 0x42f   :  { %11267 = vmatprep.subr.bf16.mxu1 %v11884_v21  ;;  %11273 = vmatprep.subr.bf16.mxu0 %v11884_v21 }
 0x431   :  { %11258 = vmatmul.mubr.msk.bf16.vlgmr.msra.gmra.mxu1 %vm1952_vm2, %v3357_v26  ;;  %11264 = vmatmul.mubr.msk.bf16.vlgmr.msra.gmra.mxu0 %vm1952_vm2, %v3358_v57 }
 0x432   :  { %11268 = vmatpush3.bf16.msra.mxu1 %v4026_v24  ;;  %11274 = vmatpush3.bf16.msra.mxu0 %v4072_v48 }
 0x433   :  { %11275 = vmatprep.mubr.msk.bf16.mxu0 %vm11885_vm1, %v11884_v21  ;;  %11269 = vmatprep.mubr.msk.bf16.mxu1 %vm11885_vm1, %v11884_v21 }
 0x439   :  { %11276 = vmatmul.mubr.msk.bf16.vlgmr.msra.gmra.mxu0 %vm1952_vm2, %v3360_v46 }
 0x449   :  { %v3309_v27 = vpop.xlane.xlu0 %3308 }
 0x44a   :  { %11735 = vrcp.f32 %v3309_v27 }
 0x457   :  { %v11736_v63 = vpop.eup %11735 }
 0x458   :  { %v3343_v55 = vmul.f32 %v11736_v63, %v12752_v59 }
 0x45a   :  { %v3359_v28 = vpack.c.bf16 %v3343_v55, %v3343_v55 }
 0x45c   :  { %11270 = vmatmul.mubr.msk.bf16.vlgmr.msra.gmra.mxu1 %vm1952_vm2, %v3359_v28 }
 0x48b   :  { %v3418_v4 = vpop.f32.mrf.mxu1 }
 0x48c   :  { %v3464_v20 = vpop.f32.mrf.mxu0 }
 0x48d   :  { %v11187_v25 = vpop.f32.mrf.mxu1 }
 0x48e   :  { %v11193_v19 = vpop.f32.mrf.mxu0 }
 0x48f   :  { %v3421_v40 = vpop.f32.mrf.mxu1 }
 0x490   :  { %v3467_v15 = vpop.f32.mrf.mxu0 }
 0x491   :  { %v11188_v30 = vpop.f32.mrf.mxu1 }
 0x492   :  { %v11194_v39 = vpop.f32.mrf.mxu0 }
 0x493   :  { %v3510_v42 = vpop.f32.mrf.mxu1 }
 0x494   :  { %v4114_v0 = vcombine.low %v3418_v4, %v3510_v42  ;;  %v4115_v61 = vcombine.high %v3418_v4, %v3510_v42  ;;  %v3556_v37 = vpop.f32.mrf.mxu0 }
 0x495   :  { %v4130_v13 = vcombine.low %v3464_v20, %v3556_v37  ;;  %v4131_v12 = vcombine.high %v3464_v20, %v3556_v37  ;;  %v11199_v45 = vpop.f32.mrf.mxu1 }
 0x496   :  { %v4122_v59 = vrot.slane %v4114_v0, %v12075_v35  ;;  %v4129_v2 = vrot.slane %v4115_v61, %v12075_v35  ;;  %v11205_v62 = vpop.f32.mrf.mxu0 }
 0x497   :  { %v4138_v34 = vrot.slane %v4130_v13, %v12075_v35  ;;  %v4145_v56 = vrot.slane %v4131_v12, %v12075_v35  ;;  %v3513_v33 = vpop.f32.mrf.mxu1 }
 0x498   :  { %v3559_v10 = vpop.f32.mrf.mxu0 }
 0x499   :  { %v4146_v43 = vcombine.low %v4122_v59, %v4138_v34  ;;  %v4147_v6 = vcombine.high %v4122_v59, %v4138_v34  ;;  %v4162_v7 = vcombine.low %v4129_v2, %v4145_v56  ;;  %v4163_v31 = vcombine.high %v4129_v2, %v4145_v56  ;;  %v11200_v54 = vpop.f32.mrf.mxu1 }
 0x49a   :  { %v11206_v11 = vpop.f32.mrf.mxu0 }
 0x49b   :  { %v4154_v51 = vrot.slane %v4146_v43, %v12094_v47  ;;  %v4161_v38 = vrot.slane %v4147_v6, %v12094_v47  ;;  %v4170_v23 = vrot.slane %v4162_v7, %v12094_v47  ;;  %v4177_v22 = vrot.slane %v4163_v31, %v12094_v47  ;;  %v3602_v8 = vpop.f32.mrf.mxu1 }
 0x49d   :  { %v4386_v49 = vcombine.low %v4154_v51, %v4161_v38  ;;  %v10730_v9 = vcombine.high %v4154_v51, %v4161_v38  ;;  %v4402_v5 = vcombine.low %v4170_v23, %v4177_v22  ;;  %v10731_v52 = vcombine.high %v4170_v23, %v4177_v22  ;;  %v11211_v14 = vpop.f32.mrf.mxu1 }
 0x49e   :  { %v3648_v53 = vpop.f32.mrf.mxu0 }
 0x49f   :  { %v12903_v41 = vrot.slane %v4386_v49, %v12075_v35  ;;  %v12906_v58 = vrot.slane %v10730_v9, %v12075_v35  ;;  %v12909_v32 = vrot.slane %v4402_v5, %v12075_v35  ;;  %v12912_v1 = vrot.slane %v10731_v52, %v12075_v35  ;;  %v3605_v44 = vpop.f32.mrf.mxu1 }
 0x4a0   :  { %v11217_v18 = vpop.f32.mrf.mxu0 }
 0x4a1   :  { %v11212_v26 = vpop.f32.mrf.mxu1  ;;  %v4418_v57 = vcombine.low %v12903_v41, %v12906_v58  ;;  %v4434_v24 = vcombine.low %v12909_v32, %v12912_v1  ;;  %v4435_v49 = vcombine.high %v12909_v32, %v12912_v1 }
 0x4a2   :  { %v3651_v48 = vpop.f32.mrf.mxu0 }
 0x4a3   :  { %v3694_v16 = vpop.f32.mrf.mxu1  ;;  %v12919_v46 = vrot.slane %v4418_v57, %v12094_v47  ;;  %v12922_v27 = vrot.slane %v4434_v24, %v12094_v47 }
 0x4a4   :  { %v4182_v63 = vcombine.low %v3602_v8, %v3694_v16  ;;  %v4183_v55 = vcombine.high %v3602_v8, %v3694_v16  ;;  %v11218_v28 = vpop.f32.mrf.mxu0  ;;  %v4419_v8 = vcombine.high %v12903_v41, %v12906_v58 }
 0x4a5   :  { %v11223_v4 = vpop.f32.mrf.mxu1  ;;  %v4450_v20 = vcombine.low %v12919_v46, %v12922_v27  ;;  %v4451_v1 = vcombine.high %v12919_v46, %v12922_v27  ;;  %v4449_v28 = vrot.slane %v4435_v49, %v12094_v47 }
 0x4a6   :  { %v3740_v25 = vpop.f32.mrf.mxu0  ;;  %v4190_v40 = vrot.slane %v4182_v63, %v12075_v35  ;;  %v4197_v15 = vrot.slane %v4183_v55, %v12075_v35  ;;  %v4433_v41 = vrot.slane %v4419_v8, %v12094_v47 }
 0x4a7   :  { %v3697_v19 = vpop.f32.mrf.mxu1  ;;  %v4198_v30 = vcombine.low %v3648_v53, %v3740_v25  ;;  %v4199_v39 = vcombine.high %v3648_v53, %v3740_v25 }
 0x4a8   :  { %v11229_v42 = vpop.f32.mrf.mxu0 }
 0x4a9   :  { %v11224_v0 = vpop.f32.mrf.mxu1  ;;  %v4206_v61 = vrot.slane %v4198_v30, %v12075_v35  ;;  %v4213_v37 = vrot.slane %v4199_v39, %v12075_v35 }
 0x4aa   :  { %v3743_v13 = vpop.f32.mrf.mxu0 }
 0x4ab   :  { %v3786_v12 = vpop.f32.mrf.mxu1  ;;  %v4214_v45 = vcombine.low %v4190_v40, %v4206_v61  ;;  %v4215_v59 = vcombine.high %v4190_v40, %v4206_v61  ;;  %v4230_v2 = vcombine.low %v4197_v15, %v4213_v37  ;;  %v4231_v62 = vcombine.high %v4197_v15, %v4213_v37 }
 0x4ac   :  { %v11230_v34 = vpop.f32.mrf.mxu0 }
 0x4ad   :  { %v11235_v56 = vpop.f32.mrf.mxu1  ;;  %v4222_v33 = vrot.slane %v4214_v45, %v12094_v47  ;;  %v4229_v10 = vrot.slane %v4215_v59, %v12094_v47  ;;  %v4238_v43 = vrot.slane %v4230_v2, %v12094_v47  ;;  %v4245_v6 = vrot.slane %v4231_v62, %v12094_v47 }
 0x4ae   :  { %v3832_v7 = vpop.f32.mrf.mxu0  ;;  %v4452_v34 = vcombine.low %v4433_v41, %v4449_v28 }
 0x4af   :  { %v3789_v31 = vpop.f32.mrf.mxu1  ;;  %v4454_v54 = vcombine.low %v4222_v33, %v4229_v10  ;;  %v10732_v11 = vcombine.high %v4222_v33, %v4229_v10  ;;  %v4470_v51 = vcombine.low %v4238_v43, %v4245_v6  ;;  %v10733_v38 = vcombine.high %v4238_v43, %v4245_v6 }
 0x4b0   :  { %v11241_v23 = vpop.f32.mrf.mxu0 }
 0x4b1   :  { %v11236_v22 = vpop.f32.mrf.mxu1  ;;  %v4461_v9 = vrot.slane %v4454_v54, %v12075_v35  ;;  %v4469_v5 = vrot.slane %v10732_v11, %v12075_v35  ;;  %v4477_v52 = vrot.slane %v4470_v51, %v12075_v35  ;;  %v4485_v14 = vrot.slane %v10733_v38, %v12075_v35 }
 0x4b2   :  { %v3835_v53 = vpop.f32.mrf.mxu0  ;;  %v4453_v23 = vcombine.high %v4433_v41, %v4449_v28 }
 0x4b3   :  { %v3878_v44 = vpop.f32.mrf.mxu1  ;;  %v4486_v57 = vcombine.low %v4461_v9, %v4469_v5  ;;  %v4502_v24 = vcombine.low %v4477_v52, %v4485_v14  ;;  %v4487_v58 = vcombine.high %v4461_v9, %v4469_v5  ;;  %v4503_v32 = vcombine.high %v4477_v52, %v4485_v14 }
 0x4b4   :  { %v4250_v18 = vcombine.low %v3786_v12, %v3878_v44  ;;  %v4251_v26 = vcombine.high %v3786_v12, %v3878_v44  ;;  %v11242_v48 = vpop.f32.mrf.mxu0 }
 0x4b5   :  { %v11247_v16 = vpop.f32.mrf.mxu1  ;;  %v12946_v63 = vrot.slane %v4486_v57, %v12094_v47  ;;  %v12949_v55 = vrot.slane %v4502_v24, %v12094_v47  ;;  %v4501_v15 = vrot.slane %v4487_v58, %v12094_v47  ;;  %v4517_v30 = vrot.slane %v4503_v32, %v12094_v47 }
 0x4b6   :  { %v4258_v4 = vrot.slane %v4250_v18, %v12075_v35  ;;  %v4265_v25 = vrot.slane %v4251_v26, %v12075_v35  ;;  %v3924_v19 = vpop.f32.mrf.mxu0 }
 0x4b7   :  { %v3881_v40 = vpop.f32.mrf.mxu1  ;;  %v4266_v39 = vcombine.low %v3832_v7, %v3924_v19  ;;  %v4267_v42 = vcombine.high %v3832_v7, %v3924_v19  ;;  %v4519_v0 = vcombine.high %v12946_v63, %v12949_v55  ;;  %v4518_v61 = vcombine.low %v12946_v63, %v12949_v55 }
 0x4b8   :  { %v11253_v37 = vpop.f32.mrf.mxu0  ;;  %v4520_v12 = vcombine.low %v4501_v15, %v4517_v30  ;;  %v4521_v31 = vcombine.high %v4501_v15, %v4517_v30 }
 0x4b9   :  { %v11248_v13 = vpop.f32.mrf.mxu1  ;;  %v4274_v45 = vrot.slane %v4266_v39, %v12075_v35  ;;  %v4281_v59 = vrot.slane %v4267_v42, %v12075_v35  ;;  %v11576_v2 = vpack.i.bf16 %v4519_v0, %v4451_v1 }
 0x4ba   :  { %v3927_v62 = vpop.f32.mrf.mxu0  ;;  %v11581_v7 = vpack.i.bf16 %v4520_v12, %v4452_v34  ;;  %v11586_v5 = vpack.i.bf16 %v4521_v31, %v4453_v23 }
 0x4bb   :  { %v4282_v56 = vcombine.low %v4258_v4, %v4274_v45  ;;  %v4283_v33 = vcombine.high %v4258_v4, %v4274_v45  ;;  %v4298_v10 = vcombine.low %v4265_v25, %v4281_v59  ;;  %v4299_v43 = vcombine.high %v4265_v25, %v4281_v59  ;;  %11577 = vrot.lane.b32.xlu0 %v11576_v2, %s11890_s26 }
 0x4bc   :  { %v11254_v6 = vpop.f32.mrf.mxu0 }
 0x4bd   :  { %v4290_v54 = vrot.slane %v4282_v56, %v12094_v47  ;;  %v4297_v11 = vrot.slane %v4283_v33, %v12094_v47  ;;  %v4306_v51 = vrot.slane %v4298_v10, %v12094_v47  ;;  %v4313_v38 = vrot.slane %v4299_v43, %v12094_v47 }
 0x4bf   :  { %v4522_v22 = vcombine.low %v4290_v54, %v4297_v11  ;;  %v10734_v8 = vcombine.high %v4290_v54, %v4297_v11  ;;  %v4538_v49 = vcombine.low %v4306_v51, %v4313_v38  ;;  %v10735_v9 = vcombine.high %v4306_v51, %v4313_v38  ;;  %11582 = vrot.lane.b32.xlu0 %v11581_v7, %s11891_s27 }
 0x4c1   :  { %v4529_v52 = vrot.slane %v4522_v22, %v12075_v35  ;;  %v4537_v14 = vrot.slane %v10734_v8, %v12075_v35  ;;  %v4545_v53 = vrot.slane %v4538_v49, %v12075_v35  ;;  %v4553_v44 = vrot.slane %v10735_v9, %v12075_v35 }
 0x4c3   :  { %11587 = vrot.lane.b32.xlu0 %v11586_v5, %s11892_s28  ;;  %v4554_v18 = vcombine.low %v4529_v52, %v4537_v14  ;;  %v4570_v26 = vcombine.low %v4545_v53, %v4553_v44  ;;  %v4555_v57 = vcombine.high %v4529_v52, %v4537_v14  ;;  %v4571_v24 = vcombine.high %v4545_v53, %v4553_v44 }
 0x4c5   :  { %v12974_v48 = vrot.slane %v4554_v18, %v12094_v47  ;;  %v12977_v16 = vrot.slane %v4570_v26, %v12094_v47  ;;  %v12980_v41 = vrot.slane %v4555_v57, %v12094_v47  ;;  %v12983_v58 = vrot.slane %v4571_v24, %v12094_v47 }
 0x4c7   :  { %v4586_v32 = vcombine.low %v12974_v48, %v12977_v16  ;;  %v4587_v1 = vcombine.high %v12974_v48, %v12977_v16  ;;  %v4588_v28 = vcombine.low %v12980_v41, %v12983_v58  ;;  %v4589_v4 = vcombine.high %v12980_v41, %v12983_v58  ;;  %v10738_v48 = vld [vmem:[%s14309_s6 + $0x1] ss:$0 sm:$0xff] }
 0x4c8   :  { %v11855_v16 = vld [vmem:[%s14303_s0] sm:$0xff]  }
 0x4f1   :  { %v3970_v25 = vpop.f32.mrf.mxu1  ;;  %v4016_v19 = vpop.f32.mrf.mxu0 }
 0x4f3   :  { %v11259_v40 = vpop.f32.mrf.mxu1  ;;  %v11265_v15 = vpop.f32.mrf.mxu0 }
 0x4f4   :  { %v11640_v15 = vld [vmem:[%s14306_s3 + $0x8] sm:$0xff]  }
 0x4f5   :  { %v3973_v30 = vpop.f32.mrf.mxu1  ;;  %v4019_v39 = vpop.f32.mrf.mxu0  ;;  %11279 = vmatprep.subr.bf16.mxu1 %v11640_v15 }
 0x4f6   :  { %11280 = vmatpush3.bf16.msra.mxu1 %v11640_v15  ;;  %v39_v15 = vunpack.c.h.bf16 %v11855_v16 }
 0x4f7   :  { %v11260_v42 = vpop.f32.mrf.mxu1  ;;  %v11266_v0 = vpop.f32.mrf.mxu0 }
 0x4f9   :  { %v4108_v37 = vpop.f32.mrf.mxu0 }
 0x4fa   :  { %v4334_v59 = vcombine.low %v4016_v19, %v4108_v37  ;;  %v4335_v2 = vcombine.high %v4016_v19, %v4108_v37 }
 0x4fb   :  { %v11277_v13 = vpop.f32.mrf.mxu0 }
 0x4fc   :  { %v4342_v10 = vrot.slane %v4334_v59, %v12075_v35  ;;  %v4349_v43 = vrot.slane %v4335_v2, %v12075_v35 }
 0x4fd   :  { %v4111_v12 = vpop.f32.mrf.mxu0 }
 0x4fe   :  { %v11641_v12 = vld [vmem:[%s14306_s3] sm:$0xff]  }
 0x4ff   :  { %v11278_v45 = vpop.f32.mrf.mxu0  ;;  %11281 = vmatprep.subr.bf16.mxu1 %v11641_v12 }
 0x500   :  { %11282 = vmatpush3.bf16.msra.mxu1 %v11641_v12 }
 0x51c   :  { %v4062_v62 = vpop.f32.mrf.mxu1 }
 0x51d   :  { %v4318_v34 = vcombine.low %v3970_v25, %v4062_v62  ;;  %v4319_v56 = vcombine.high %v3970_v25, %v4062_v62 }
 0x51e   :  { %v11271_v33 = vpop.f32.mrf.mxu1 }
 0x51f   :  { %v4326_v6 = vrot.slane %v4318_v34, %v12075_v35  ;;  %v4333_v7 = vrot.slane %v4319_v56, %v12075_v35 }
 0x520   :  { %v4065_v31 = vpop.f32.mrf.mxu1 }
 0x521   :  { %v4350_v54 = vcombine.low %v4326_v6, %v4342_v10  ;;  %v4351_v11 = vcombine.high %v4326_v6, %v4342_v10  ;;  %v4366_v51 = vcombine.low %v4333_v7, %v4349_v43  ;;  %v4367_v38 = vcombine.high %v4333_v7, %v4349_v43 }
 0x522   :  { %v11272_v23 = vpop.f32.mrf.mxu1 }
 0x523   :  { %v4358_v22 = vrot.slane %v4350_v54, %v12094_v47  ;;  %v4365_v8 = vrot.slane %v4351_v11, %v12094_v47  ;;  %v4374_v49 = vrot.slane %v4366_v51, %v12094_v47  ;;  %v4381_v9 = vrot.slane %v4367_v38, %v12094_v47 }
 0x525   :  { %v4590_v5 = vcombine.low %v4358_v22, %v4365_v8  ;;  %v10736_v52 = vcombine.high %v4358_v22, %v4365_v8  ;;  %v4606_v14 = vcombine.low %v4374_v49, %v4381_v9  ;;  %v10737_v53 = vcombine.high %v4374_v49, %v4381_v9 }
 0x527   :  { %v4597_v44 = vrot.slane %v4590_v5, %v12075_v35  ;;  %v4605_v18 = vrot.slane %v10736_v52, %v12075_v35  ;;  %v4613_v26 = vrot.slane %v4606_v14, %v12075_v35  ;;  %v4621_v57 = vrot.slane %v10737_v53, %v12075_v35 }
 0x529   :  { %v4622_v24 = vcombine.low %v4597_v44, %v4605_v18  ;;  %v4638_v25 = vcombine.low %v4613_v26, %v4621_v57  ;;  %v4623_v19 = vcombine.high %v4597_v44, %v4605_v18  ;;  %v4639_v40 = vcombine.high %v4613_v26, %v4621_v57 }
 0x52b   :  { %v4630_v30 = vrot.slane %v4622_v24, %v12094_v47  ;;  %v4646_v39 = vrot.slane %v4638_v25, %v12094_v47  ;;  %v4637_v42 = vrot.slane %v4623_v19, %v12094_v47  ;;  %v4653_v0 = vrot.slane %v4639_v40, %v12094_v47  ;;  %v11856_v25 = vld [vmem:[%s14303_s0 + $0x8] sm:$0xff]  }
 0x52c   :  { %v40_v19 = vunpack.c.l.bf16 %v11856_v25 }
 0x52d   :  { %v4655_v37 = vcombine.high %v4630_v30, %v4646_v39  ;;  %v4654_v13 = vcombine.low %v4630_v30, %v4646_v39  ;;  %v4656_v59 = vcombine.low %v4637_v42, %v4653_v0  ;;  %v11578_v2 = vpop.permute.xlu0 %11577  ;;  %v4657_v34 = vcombine.high %v4637_v42, %v4653_v0 }
 0x52e   :  { %v11580_v33 = vunpack.i.h.bf16 %v11578_v2  ;;  %v11579_v10 = vunpack.i.l.bf16 %v11578_v2  ;;  %v41_v42 = vunpack.c.h.bf16 %v11856_v25 }
 0x52f   :  { %v11591_v45 = vpack.i.bf16 %v4655_v37, %v4587_v1  ;;  %v11596_v62 = vpack.i.bf16 %v4656_v59, %v4588_v28  ;;  %v11601_v1 = vpack.i.bf16 %v4657_v34, %v4589_v4 }
 0x530   :  { %v4707_v28 = vsel %vm1952_vm2, %v4518_v61, %v11580_v33  ;;  %v4706_v31 = vsel %vm1952_vm2, %v4450_v20, %v11579_v10 }
 0x531   :  { %11592 = vrot.lane.b32.xlu1 %v11591_v45, %s11890_s26  ;;  %v11583_v56 = vpop.permute.xlu0 %11582 }
 0x532   :  { %v11585_v43 = vunpack.i.h.bf16 %v11583_v56  ;;  %v11584_v6 = vunpack.i.l.bf16 %v11583_v56 }
 0x534   :  { %v4711_v51 = vsel %vm4710_vm4, %v4706_v31, %v11584_v6  ;;  %v4712_v41 = vsel %vm4710_vm4, %v4707_v28, %v11585_v43 }
 0x535   :  { %11597 = vrot.lane.b32.xlu1 %v11596_v62, %s11891_s27  ;;  %v11588_v7 = vpop.permute.xlu0 %11587 }
 0x536   :  { %v11590_v54 = vunpack.i.h.bf16 %v11588_v7  ;;  %v11589_v11 = vunpack.i.l.bf16 %v11588_v7 }
 0x538   :  { %v4716_v58 = vsel %vm4715_vm5, %v4711_v51, %v11589_v11  ;;  %v4717_v4 = vsel %vm4715_vm5, %v4712_v41, %v11590_v54 }
 0x539   :  { %11602 = vrot.lane.b32.xlu1 %v11601_v1, %s11892_s28  ;;  %v4720_v63 = vpack.c.bf16 %v4717_v4, %v4716_v58 }
 0x53b   :  { %11283 = vmatprep.mubr.msk.bf16.mxu1 %vm108_vm0, %v4720_v63 }
 0x5a3   :  { %v11593_v55 = vpop.permute.xlu1 %11592 }
 0x5a4   :  { %v11595_v46 = vunpack.i.h.bf16 %v11593_v55  ;;  %v11594_v27 = vunpack.i.l.bf16 %v11593_v55 }
 0x5a6   :  { %v4708_v22 = vsel %vm1952_vm2, %v4586_v32, %v11594_v27  ;;  %v4709_v8 = vsel %vm1952_vm2, %v4654_v13, %v11595_v46  ;;  %v38_v32 = vunpack.c.l.bf16 %v11855_v16 }
 0x5a7   :  { %v11598_v61 = vpop.permute.xlu1 %11597 }
 0x5a8   :  { %v11600_v20 = vunpack.i.h.bf16 %v11598_v61  ;;  %v11599_v38 = vunpack.i.l.bf16 %v11598_v61 }
 0x5aa   :  { %v4713_v5 = vsel %vm4710_vm4, %v4708_v22, %v11599_v38  ;;  %v4714_v52 = vsel %vm4710_vm4, %v4709_v8, %v11600_v20  ;;  %v11642_v20 = vld [vmem:[%s14307_s4 + $0x8] sm:$0xff]   ;;  %v11643_v38 = vld [vmem:[%s14307_s4] sm:$0xff]  }
 0x5ab   :  { %v11603_v23 = vpop.permute.xlu1 %11602  ;;  %11287 = vmatprep.subr.bf16.mxu0 %v11642_v20 }
 0x5ac   :  { %v11605_v49 = vunpack.i.h.bf16 %v11603_v23  ;;  %v11604_v9 = vunpack.i.l.bf16 %v11603_v23  ;;  %11288 = vmatpush3.bf16.msra.mxu0 %v11642_v20 }
 0x5ad   :  { %11289 = vmatprep.subr.bf16.mxu0 %v11643_v38 }
 0x5ae   :  { %v4718_v14 = vsel %vm4715_vm5, %v4713_v5, %v11604_v9  ;;  %v4719_v53 = vsel %vm4715_vm5, %v4714_v52, %v11605_v49 }
 0x5af   :  { %v4721_v44 = vpack.c.bf16 %v4719_v53, %v4718_v14 }
 0x5b0   :  { %11290 = vmatpush3.bf16.msra.mxu0 %v11643_v38 }
 0x5b1   :  { %11284 = vmatmul.mubr.msk.bf16.vlgmr.msra.gmra.mxu1 %vm108_vm0, %v4721_v44 }
 0x671   :  { %v11285_v18 = vpop.f32.mrf.mxu1 }
 0x672   :  { %v4791_v57 = vadd.f32 %v11285_v18, %v10738_v48 }
 0x673   :  { %v4782_v26 = vpop.f32.mrf.mxu1 }
 0x674   :  { %v4783_v24 = vadd.f32 %v10738_v48, %v4782_v26  ;;  %v4799_v12 = vadd.f32 %v4791_v57, %v40_v19  ;;  %v10743_v26 = vld [vmem:[%s14309_s6 + $0x2] ss:$0 sm:$0xff] }
 0x675   :  { %v11286_v40 = vpop.f32.mrf.mxu1 }
 0x676   :  { %v4797_v30 = vadd.f32 %v4783_v24, %v38_v32  ;;  %v4794_v0 = vadd.f32 %v11286_v40, %v10738_v48  ;;  %v4807_v2 = vsel %vm108_vm0, %v4799_v12, 0.0 }
 0x677   :  { %v4785_v39 = vpop.f32.mrf.mxu1 }
 0x678   :  { %v4786_v37 = vadd.f32 %v10738_v48, %v4785_v39  ;;  %v4801_v13 = vsel %vm108_vm0, %v4797_v30, 0.0  ;;  %v4800_v62 = vadd.f32 %v4794_v0, %v41_v42 }
 0x679   :  { %4802 = vadd.xlane.f32.xlu0 %v4801_v13 }
 0x67a   :  { %v4798_v45 = vadd.f32 %v4786_v37, %v39_v15  ;;  %v4810_v34 = vsel %vm108_vm0, %v4800_v62, 0.0  ;;  %v10744_v15 = vld [vmem:[%s14309_s6 + $0x3] ss:$0 sm:$0xff] }
 0x67c   :  { %v4804_v59 = vsel %vm108_vm0, %v4798_v45, 0.0 }
 0x67d   :  { %4805 = vadd.xlane.f32.xlu1 %v4804_v59  ;;  %4808 = vadd.xlane.f32.xlu0 %v4807_v2 }
 0x681   :  { %4811 = vadd.xlane.f32.xlu0 %v4810_v34  ;;  %v11644_v34 = vld [vmem:[%s14308_s5 + $0x18] sm:$0xff]  }
 0x682   :  { %11295 = vmatprep.subr.bf16.mxu1 %v11644_v34 }
 0x683   :  { %11296 = vmatpush3.bf16.msra.mxu1 %v11644_v34 }
 0x702   :  { %v4803_v56 = vpop.xlane.xlu0 %4802 }
 0x703   :  { %v4814_v33 = vmul.f32 0.03125, %v4803_v56  ;;  %v11645_v56 = vld [vmem:[%s14308_s5 + $0x10] sm:$0xff]  }
 0x704   :  { %11297 = vmatprep.subr.bf16.mxu1 %v11645_v56 }
 0x705   :  { %v4818_v10 = vsub.f32 %v4797_v30, %v4814_v33  ;;  %11298 = vmatpush3.bf16.msra.mxu1 %v11645_v56  ;;  %v11646_v33 = vld [vmem:[%s14308_s5 + $0x8] sm:$0xff]   ;;  %v10750_v56 = vld [vmem:[%s14309_s6 + $0x5] ss:$0 sm:$0xff] }
 0x706   :  { %v4806_v43 = vpop.xlane.xlu1 %4805  ;;  %v4809_v6 = vpop.xlane.xlu0 %4808  ;;  %11299 = vmatprep.subr.bf16.mxu1 %v11646_v33 }
 0x707   :  { %v4815_v1 = vmul.f32 0.03125, %v4806_v43  ;;  %v4816_v7 = vmul.f32 0.03125, %v4809_v6  ;;  %v4822_v28 = vmul.f32 %v4818_v10, %v4818_v10  ;;  %v10745_v43 = vld [vmem:[%s14309_s6 + $0x4] ss:$0 sm:$0xff] }
 0x709   :  { %v4819_v31 = vsub.f32 %v4798_v45, %v4815_v1  ;;  %v4820_v54 = vsub.f32 %v4799_v12, %v4816_v7  ;;  %v4826_v11 = vsel %vm108_vm0, %v4822_v28, 0.0  ;;  %11300 = vmatpush3.bf16.msra.mxu1 %v11646_v33 }
 0x70a   :  { %4827 = vadd.xlane.f32.xlu1 %v4826_v11  ;;  %v4812_v51 = vpop.xlane.xlu0 %4811 }
 0x70b   :  { %v4817_v41 = vmul.f32 0.03125, %v4812_v51  ;;  %v4823_v58 = vmul.f32 %v4819_v31, %v4819_v31  ;;  %v4824_v4 = vmul.f32 %v4820_v54, %v4820_v54 }
 0x70d   :  { %v4821_v63 = vsub.f32 %v4800_v62, %v4817_v41  ;;  %v4829_v55 = vsel %vm108_vm0, %v4823_v58, 0.0  ;;  %v4832_v61 = vsel %vm108_vm0, %v4824_v4, 0.0 }
 0x70e   :  { %4830 = vadd.xlane.f32.xlu0 %v4829_v55  ;;  %4833 = vadd.xlane.f32.xlu1 %v4832_v61 }
 0x70f   :  { %v4825_v46 = vmul.f32 %v4821_v63, %v4821_v63 }
 0x711   :  { %v4835_v27 = vsel %vm108_vm0, %v4825_v46, 0.0 }
 0x712   :  { %4836 = vadd.xlane.f32.xlu0 %v4835_v27 }
 0x793   :  { %v4828_v23 = vpop.xlane.xlu1 %4827 }
 0x794   :  { %v4838_v22 = vmul.f32 0.03125, %v4828_v23 }
 0x796   :  { %v4842_v8 = vadd.f32 1e-05, %v4838_v22 }
 0x797   :  { %v4834_v49 = vpop.xlane.xlu1 %4833  ;;  %v4831_v9 = vpop.xlane.xlu0 %4830 }
 0x798   :  { %11737 = vrsqrt.f32 %v4842_v8  ;;  %v4840_v5 = vmul.f32 0.03125, %v4834_v49  ;;  %v4839_v52 = vmul.f32 0.03125, %v4831_v9 }
 0x79a   :  { %v4844_v14 = vadd.f32 1e-05, %v4840_v5  ;;  %v4843_v53 = vadd.f32 1e-05, %v4839_v52 }
 0x79b   :  { %v4837_v44 = vpop.xlane.xlu0 %4836 }
 0x79c   :  { %11739 = vrsqrt.f32 %v4844_v14  ;;  %v4841_v18 = vmul.f32 0.03125, %v4837_v44 }
 0x79d   :  { %11741 = vrsqrt.f32 %v4843_v53 }
 0x79e   :  { %v4845_v48 = vadd.f32 1e-05, %v4841_v18 }
 0x7a0   :  { %11743 = vrsqrt.f32 %v4845_v48 }
 0x7a5   :  { %v11738_v16 = vpop.eup %11737 }
 0x7a6   :  { %v4850_v32 = vmul.f32 %v11738_v16, %v4818_v10  ;;  %v11647_v10 = vld [vmem:[%s14308_s5] sm:$0xff]  }
 0x7a7   :  { %11301 = vmatprep.subr.bf16.mxu1 %v11647_v10 }
 0x7a8   :  { %v4858_v40 = vmul.f32 %v10743_v26, %v4850_v32  ;;  %11302 = vmatpush3.bf16.msra.mxu1 %v11647_v10 }
 0x7a9   :  { %v11740_v57 = vpop.eup %11739  ;;  %11325 = vmatprep.subr.mxu1 %v11884_v21 }
 0x7aa   :  { %v11742_v24 = vpop.eup %11741  ;;  %v4852_v25 = vmul.f32 %v11740_v57, %v4820_v54  ;;  %v13073_v37 = vadd.f32 %v10744_v15, %v4858_v40 }
 0x7ab   :  { %v4851_v19 = vmul.f32 %v11742_v24, %v4819_v31 }
 0x7ac   :  { %v4860_v0 = vmul.f32 %v10743_v26, %v4852_v25 }
 0x7ad   :  { %v11744_v30 = vpop.eup %11743  ;;  %v4859_v39 = vmul.f32 %v10743_v26, %v4851_v19 }
 0x7ae   :  { %v4853_v42 = vmul.f32 %v11744_v30, %v4821_v63  ;;  %v13079_v59 = vadd.f32 %v10744_v15, %v4860_v0 }
 0x7af   :  { %v13075_v13 = vadd.f32 %v10744_v15, %v4859_v39 }
 0x7b0   :  { %v4861_v12 = vmul.f32 %v10743_v26, %v4853_v42 }
 0x7b1   :  { %v4870_v45 = vpack.c.bf16 %v13075_v13, %v13073_v37 }
 0x7b2   :  { %v13081_v2 = vadd.f32 %v10744_v15, %v4861_v12 }
 0x7b3   :  { %11291 = vmatprep.mubr.msk.bf16.mxu0 %vm108_vm0, %v4870_v45 }
 0x7b4   :  { %v4871_v62 = vpack.c.bf16 %v13081_v2, %v13079_v59 }
 0x7b6   :  { %11292 = vmatmul.mubr.msk.bf16.vlgmr.msra.gmra.mxu0 %vm108_vm0, %v4871_v62 }
 0x876   :  { %v11293_v6 = vpop.f32.mrf.mxu0 }
 0x877   :  { %v4941_v1 = vadd.f32 %v11293_v6, %v10745_v43 }
 0x878   :  { %v4932_v7 = vpop.f32.mrf.mxu0 }
 0x879   :  { %v4949_v28 = vmul.f32 %v4941_v1, %v4941_v1  ;;  %v4933_v31 = vadd.f32 %v10745_v43, %v4932_v7 }
 0x87a   :  { %v11294_v54 = vpop.f32.mrf.mxu0 }
 0x87b   :  { %v4953_v11 = vmul.f32 %v4949_v28, %v4941_v1  ;;  %v4947_v51 = vmul.f32 %v4933_v31, %v4933_v31  ;;  %v4944_v41 = vadd.f32 %v11294_v54, %v10745_v43 }
 0x87c   :  { %v4935_v58 = vpop.f32.mrf.mxu0 }
 0x87d   :  { %v4957_v4 = vmul.f32 0.044715, %v4953_v11  ;;  %v4951_v63 = vmul.f32 %v4947_v51, %v4933_v31  ;;  %v4950_v55 = vmul.f32 %v4944_v41, %v4944_v41  ;;  %v4936_v61 = vadd.f32 %v10745_v43, %v4935_v58 }
 0x87f   :  { %v4961_v46 = vadd.f32 %v4957_v4, %v4941_v1  ;;  %v4955_v27 = vmul.f32 0.044715, %v4951_v63  ;;  %v4954_v20 = vmul.f32 %v4950_v55, %v4944_v41  ;;  %v4948_v38 = vmul.f32 %v4936_v61, %v4936_v61 }
 0x881   :  { %v4965_v23 = vmul.f32 0.7978846, %v4961_v46  ;;  %v4959_v22 = vadd.f32 %v4955_v27, %v4933_v31  ;;  %v4958_v8 = vmul.f32 0.044715, %v4954_v20  ;;  %v4952_v49 = vmul.f32 %v4948_v38, %v4936_v61 }
 0x883   :  { %v4963_v9 = vmul.f32 0.7978846, %v4959_v22  ;;  %v4962_v5 = vadd.f32 %v4958_v8, %v4944_v41  ;;  %v4956_v52 = vmul.f32 0.044715, %v4952_v49  ;;  %11745 = vtanh.f32 %v4965_v23 }
 0x885   :  { %11747 = vtanh.f32 %v4963_v9  ;;  %v4966_v14 = vmul.f32 0.7978846, %v4962_v5  ;;  %v4960_v53 = vadd.f32 %v4956_v52, %v4936_v61 }
 0x887   :  { %11749 = vtanh.f32 %v4966_v14  ;;  %v4964_v44 = vmul.f32 0.7978846, %v4960_v53 }
 0x889   :  { %11751 = vtanh.f32 %v4964_v44 }
 0x890   :  { %v11746_v18 = vpop.eup %11745 }
 0x891   :  { %v4973_v26 = vadd.f32 1.0, %v11746_v18  ;;  %v11648_v18 = vld [vmem:[%s14305_s2 + $0x18] sm:$0xff]  }
 0x892   :  { %v11748_v48 = vpop.eup %11747  ;;  %11307 = vmatprep.subr.bf16.mxu0 %v11648_v18 }
 0x893   :  { %v4971_v16 = vadd.f32 1.0, %v11748_v48  ;;  %v4977_v15 = vmul.f32 0.5, %v4973_v26  ;;  %v11649_v48 = vld [vmem:[%s14305_s2 + $0x10] sm:$0xff]   ;;  %11308 = vmatpush3.bf16.msra.mxu0 %v11648_v18 }
 0x894   :  { %v11750_v32 = vpop.eup %11749  ;;  %11309 = vmatprep.subr.bf16.mxu0 %v11649_v48 }
 0x895   :  { %v4974_v57 = vadd.f32 1.0, %v11750_v32  ;;  %v4975_v25 = vmul.f32 0.5, %v4971_v16  ;;  %v4981_v12 = vmul.f32 %v4977_v15, %v4941_v1 }
 0x896   :  { %v11752_v24 = vpop.eup %11751 }
 0x897   :  { %v4978_v19 = vmul.f32 0.5, %v4974_v57  ;;  %v4972_v40 = vadd.f32 1.0, %v11752_v24  ;;  %v4979_v42 = vmul.f32 %v4975_v25, %v4933_v31  ;;  %11310 = vmatpush3.bf16.msra.mxu0 %v11649_v48 }
 0x898   :  { %11315 = vmatprep.subr.mxu0 %v11884_v21 }
 0x899   :  { %v4976_v30 = vmul.f32 0.5, %v4972_v40  ;;  %v4982_v39 = vmul.f32 %v4978_v19, %v4944_v41 }
 0x89b   :  { %v4980_v0 = vmul.f32 %v4976_v30, %v4936_v61  ;;  %v4984_v62 = vpack.c.bf16 %v4982_v39, %v4981_v12 }
 0x89d   :  { %v4983_v45 = vpack.c.bf16 %v4980_v0, %v4979_v42 }
 0x89f   :  { %11303 = vmatprep.mubr.msk.bf16.mxu1 %vm5021_vm6, %v4983_v45  ;;  %v10757_v45 = vld [vmem:[%s14309_s6 + $0x6] ss:$0 sm:$0xff] }
 0x8a0   :  { %11304 = vmatmul.mubr.msk.bf16.vlgmr.msra.gmra.mxu1 %vm5021_vm6, %v4984_v62 }
 0x8a1   :  { %11327 = vmatprep.mubr.msk.f32.mxu1 %vm11885_vm1, %v11884_v21 }
 0x960   :  { %v11305_v34 = vpop.f32.mrf.mxu1 }
 0x961   :  { %v5071_v10 = vadd.f32 %v11305_v34, %v10750_v56 }
 0x962   :  { %v5062_v33 = vpop.f32.mrf.mxu1 }
 0x963   :  { %v5063_v43 = vadd.f32 %v10750_v56, %v5062_v33  ;;  %v5079_v11 = vadd.f32 %v5071_v10, %v13079_v59 }
 0x964   :  { %v11306_v6 = vpop.f32.mrf.mxu1 }
 0x965   :  { %v5077_v1 = vadd.f32 %v5063_v43, %v13073_v37  ;;  %v5074_v28 = vadd.f32 %v11306_v6, %v10750_v56  ;;  %v5087_v58 = vsel %vm108_vm0, %v5079_v11, 0.0  ;;  %v10758_v43 = vld [vmem:[%s14309_s6 + $0x7] ss:$0 sm:$0xff] }
 0x966   :  { %v5065_v7 = vpop.f32.mrf.mxu1 }
 0x967   :  { %v5066_v31 = vadd.f32 %v10750_v56, %v5065_v7  ;;  %v5081_v54 = vsel %vm108_vm0, %v5077_v1, 0.0  ;;  %v5080_v4 = vadd.f32 %v5074_v28, %v13081_v2 }
 0x968   :  { %5082 = vadd.xlane.f32.xlu1 %v5081_v54 }
 0x969   :  { %v5078_v51 = vadd.f32 %v5066_v31, %v13075_v13  ;;  %v5090_v37 = vsel %vm108_vm0, %v5080_v4, 0.0 }
 0x96b   :  { %v5084_v41 = vsel %vm108_vm0, %v5078_v51, 0.0 }
 0x96c   :  { %5085 = vadd.xlane.f32.xlu0 %v5084_v41  ;;  %5088 = vadd.xlane.f32.xlu1 %v5087_v58 }
 0x970   :  { %5091 = vadd.xlane.f32.xlu0 %v5090_v37 }
 0x9f1   :  { %v5083_v63 = vpop.xlane.xlu1 %5082 }
 0x9f2   :  { %v5093_v55 = vmul.f32 0.03125, %v5083_v63  ;;  %v10771_v63 = vld [vmem:[%s14309_s6 + $0x8] ss:$0 sm:$0xff] }
 0x9f4   :  { %v5097_v61 = vsub.f32 %v5077_v1, %v5093_v55 }
 0x9f5   :  { %v5086_v46 = vpop.xlane.xlu0 %5085  ;;  %v5089_v27 = vpop.xlane.xlu1 %5088 }
 0x9f6   :  { %v5094_v59 = vmul.f32 0.03125, %v5086_v46  ;;  %v5095_v20 = vmul.f32 0.03125, %v5089_v27  ;;  %v5101_v38 = vmul.f32 %v5097_v61, %v5097_v61 }
 0x9f8   :  { %v5098_v13 = vsub.f32 %v5078_v51, %v5094_v59  ;;  %v5099_v23 = vsub.f32 %v5079_v11, %v5095_v20  ;;  %v5105_v22 = vsel %vm108_vm0, %v5101_v38, 0.0 }
 0x9f9   :  { %v5092_v8 = vpop.xlane.xlu0 %5091  ;;  %5106 = vadd.xlane.f32.xlu1 %v5105_v22 }
 0x9fa   :  { %v5096_v2 = vmul.f32 0.03125, %v5092_v8  ;;  %v5102_v49 = vmul.f32 %v5098_v13, %v5098_v13  ;;  %v5103_v9 = vmul.f32 %v5099_v23, %v5099_v23 }
 0x9fc   :  { %v5100_v5 = vsub.f32 %v5080_v4, %v5096_v2  ;;  %v5108_v52 = vsel %vm108_vm0, %v5102_v49, 0.0  ;;  %v5111_v14 = vsel %vm108_vm0, %v5103_v9, 0.0 }
 0x9fd   :  { %5109 = vadd.xlane.f32.xlu0 %v5108_v52  ;;  %5112 = vadd.xlane.f32.xlu1 %v5111_v14 }
 0x9fe   :  { %v5104_v53 = vmul.f32 %v5100_v5, %v5100_v5 }
 0xa00   :  { %v5114_v44 = vsel %vm108_vm0, %v5104_v53, 0.0 }
 0xa01   :  { %5115 = vadd.xlane.f32.xlu0 %v5114_v44 }
 0xa82   :  { %v5107_v16 = vpop.xlane.xlu1 %5106 }
 0xa83   :  { %v5117_v32 = vmul.f32 0.03125, %v5107_v16 }
 0xa85   :  { %v5121_v26 = vadd.f32 1e-05, %v5117_v32 }
 0xa86   :  { %v5110_v57 = vpop.xlane.xlu0 %5109  ;;  %v5113_v24 = vpop.xlane.xlu1 %5112 }
 0xa87   :  { %11753 = vrsqrt.f32 %v5121_v26  ;;  %v5118_v25 = vmul.f32 0.03125, %v5110_v57  ;;  %v5119_v19 = vmul.f32 0.03125, %v5113_v24 }
 0xa89   :  { %v5122_v40 = vadd.f32 1e-05, %v5118_v25  ;;  %v5123_v15 = vadd.f32 1e-05, %v5119_v19 }
 0xa8a   :  { %v5116_v30 = vpop.xlane.xlu0 %5115 }
 0xa8b   :  { %11755 = vrsqrt.f32 %v5122_v40  ;;  %v5120_v39 = vmul.f32 0.03125, %v5116_v30 }
 0xa8c   :  { %11757 = vrsqrt.f32 %v5123_v15 }
 0xa8d   :  { %v5124_v42 = vadd.f32 1e-05, %v5120_v39 }
 0xa8f   :  { %11759 = vrsqrt.f32 %v5124_v42 }
 0xa94   :  { %v11754_v0 = vpop.eup %11753 }
 0xa95   :  { %v5129_v12 = vmul.f32 %v11754_v0, %v5097_v61 }
 0xa97   :  { %v5137_v33 = vmul.f32 %v10757_v45, %v5129_v12 }
 0xa98   :  { %v11756_v62 = vpop.eup %11755 }
 0xa99   :  { %v11758_v34 = vpop.eup %11757  ;;  %v5130_v56 = vmul.f32 %v11756_v62, %v5098_v13  ;;  %v13135_v28 = vadd.f32 %v10758_v43, %v5137_v33 }
 0xa9a   :  { %v5131_v10 = vmul.f32 %v11758_v34, %v5099_v23 }
 0xa9b   :  { %v5138_v6 = vmul.f32 %v10757_v45, %v5130_v56 }
 0xa9c   :  { %v11760_v1 = vpop.eup %11759  ;;  %v5139_v54 = vmul.f32 %v10757_v45, %v5131_v10 }
 0xa9d   :  { %v5132_v7 = vmul.f32 %v11760_v1, %v5100_v5  ;;  %v13137_v31 = vadd.f32 %v10758_v43, %v5138_v6 }
 0xa9e   :  { %v13142_v41 = vadd.f32 %v10758_v43, %v5139_v54 }
 0xa9f   :  { %v5158_v11 = vpack.c.bf16 %v13137_v31, %v13135_v28  ;;  %v5140_v51 = vmul.f32 %v10757_v45, %v5132_v7 }
 0xaa1   :  { %11311 = vmatprep.mubr.msk.bf16.mxu0 %vm108_vm0, %v5158_v11  ;;  %v13144_v58 = vadd.f32 %v10758_v43, %v5140_v51 }
 0xaa3   :  { %v5159_v4 = vpack.c.bf16 %v13144_v58, %v13142_v41 }
 0xaa5   :  { %11312 = vmatmul.mubr.msk.bf16.vlgmr.msra.gmra.mxu0 %vm108_vm0, %v5159_v4 }
 0xaa6   :  { %11317 = vmatprep.mubr.msk.f32.mxu0 %vm11885_vm1, %v11884_v21 }
 0xb65   :  { %v11313_v37 = vpop.f32.mrf.mxu0 }
 0xb66   :  { %v13166_v20 = vadd.f32 %v11313_v37, %v10771_v63 }
 0xb67   :  { %v5221_v55 = vpop.f32.mrf.mxu0 }
 0xb68   :  { %v13154_v61 = vadd.f32 %v10771_v63, %v5221_v55 }
 0xb69   :  { %v11314_v46 = vpop.f32.mrf.mxu0 }
 0xb6a   :  { %5252 = vrot.lane.b32.xlu0 %v13154_v61, %s11882_s21  ;;  %5240 = vrot.lane.b32.xlu1 %v13154_v61, %s11881_s20  ;;  %v13176_v38 = vadd.f32 %v11314_v46, %v10771_v63 }
 0xb6b   :  { %v5224_v27 = vpop.f32.mrf.mxu0 }
 0xb6c   :  { %v13160_v59 = vadd.f32 %v10771_v63, %v5224_v27 }
 0xb6e   :  { %5254 = vrot.lane.b32.xlu0 %v13160_v59, %s11882_s21  ;;  %5264 = vrot.lane.b32.xlu1 %v13154_v61, %s11880_s19 }
 0xb72   :  { %5244 = vrot.lane.b32.xlu0 %v13166_v20, %s11881_s20  ;;  %5242 = vrot.lane.b32.xlu1 %v13160_v59, %s11881_s20 }
 0xb76   :  { %5268 = vrot.lane.b32.xlu0 %v13166_v20, %s11880_s19  ;;  %5266 = vrot.lane.b32.xlu1 %v13160_v59, %s11880_s19 }
 0xb7a   :  { %5258 = vrot.lane.b32.xlu0 %v13176_v38, %s11882_s21  ;;  %5256 = vrot.lane.b32.xlu1 %v13166_v20, %s11882_s21 }
 0xb7e   :  { %5820 = vrot.lane.b32.xlu0 %v13154_v61, %s11883_s22  ;;  %5246 = vrot.lane.b32.xlu1 %v13176_v38, %s11881_s20 }
 0xb82   :  { %5270 = vrot.lane.b32.xlu1 %v13176_v38, %s11880_s19 }
 0xbdc   :  { %v5253_v13 = vpop.permute.xlu0 %5252  ;;  %v5241_v23 = vpop.permute.xlu1 %5240 }
 0xbdd   :  { %5836 = vrot.lane.b32.xlu0 %v5253_v13, %s11883_s22  ;;  %5828 = vrot.lane.b32.xlu1 %v5241_v23, %s11883_s22  ;;  %v5276_v48 = vcombine.low %v13154_v61, %v5253_v13  ;;  %v5277_v26 = vcombine.high %v13154_v61, %v5253_v13 }
 0xbdf   :  { %v5284_v57 = vrot.slane %v5276_v48, %v12075_v35  ;;  %v5291_v40 = vrot.slane %v5277_v26, %v12075_v35 }
 0xbe0   :  { %v5265_v22 = vpop.permute.xlu1 %5264  ;;  %v5255_v8 = vpop.permute.xlu0 %5254 }
 0xbe1   :  { %5822 = vrot.lane.b32.xlu0 %v13160_v59, %s11883_s22  ;;  %5844 = vrot.lane.b32.xlu1 %v5265_v22, %s11883_s22  ;;  %v5292_v18 = vcombine.low %v5241_v23, %v5265_v22  ;;  %v5293_v16 = vcombine.high %v5241_v23, %v5265_v22  ;;  %v5344_v39 = vcombine.low %v13160_v59, %v5255_v8 }
 0xbe2   :  { %v5345_v42 = vcombine.high %v13160_v59, %v5255_v8 }
 0xbe3   :  { %v5300_v32 = vrot.slane %v5292_v18, %v12075_v35  ;;  %v5307_v24 = vrot.slane %v5293_v16, %v12075_v35  ;;  %v5352_v33 = vrot.slane %v5344_v39, %v12075_v35 }
 0xbe4   :  { %v5243_v2 = vpop.permute.xlu1 %5242  ;;  %v13195_v49 = vpop.permute.xlu0 %5244  ;;  %v5359_v43 = vrot.slane %v5345_v42, %v12075_v35 }
 0xbe5   :  { %5838 = vrot.lane.b32.xlu0 %v5255_v8, %s11883_s22  ;;  %5830 = vrot.lane.b32.xlu1 %v5243_v2, %s11883_s22  ;;  %v5308_v25 = vcombine.low %v5284_v57, %v5300_v32  ;;  %v5309_v19 = vcombine.high %v5284_v57, %v5300_v32  ;;  %v5324_v45 = vcombine.low %v5291_v40, %v5307_v24 }
 0xbe6   :  { %v5325_v62 = vcombine.high %v5291_v40, %v5307_v24 }
 0xbe7   :  { %v5316_v0 = vrot.slane %v5308_v25, %v12094_v47  ;;  %v5323_v12 = vrot.slane %v5309_v19, %v12094_v47  ;;  %v5332_v6 = vrot.slane %v5324_v45, %v12094_v47 }
 0xbe8   :  { %v5267_v9 = vpop.permute.xlu1 %5266  ;;  %v13204_v52 = vpop.permute.xlu0 %5268  ;;  %v5339_v1 = vrot.slane %v5325_v62, %v12094_v47 }
 0xbe9   :  { %5824 = vrot.lane.b32.xlu0 %v13166_v20, %s11883_s22  ;;  %5846 = vrot.lane.b32.xlu1 %v5267_v9, %s11883_s22  ;;  %v5360_v15 = vcombine.low %v5243_v2, %v5267_v9  ;;  %v5361_v30 = vcombine.high %v5243_v2, %v5267_v9  ;;  %v5548_v7 = vcombine.low %v5316_v0, %v5323_v12 }
 0xbea   :  { %v5428_v54 = vcombine.low %v13195_v49, %v13204_v52  ;;  %v10776_v55 = vcombine.high %v5316_v0, %v5323_v12 }
 0xbeb   :  { %v5368_v34 = vrot.slane %v5360_v15, %v12075_v35  ;;  %v5375_v56 = vrot.slane %v5361_v30, %v12075_v35 }
 0xbec   :  { %v13200_v5 = vpop.permute.xlu1 %5256  ;;  %v13214_v53 = vpop.permute.xlu0 %5258  ;;  %v5563_v40 = vrot.slane %v10776_v55, %v12075_v35 }
 0xbed   :  { %5840 = vrot.lane.b32.xlu0 %v13200_v5, %s11883_s22  ;;  %5832 = vrot.lane.b32.xlu1 %v13195_v49, %s11883_s22  ;;  %v5412_v10 = vcombine.low %v13166_v20, %v13200_v5  ;;  %v5413_v11 = vcombine.high %v13166_v20, %v13200_v5  ;;  %v5376_v51 = vcombine.low %v5352_v33, %v5368_v34 }
 0xbee   :  { %v5377_v4 = vcombine.high %v5352_v33, %v5368_v34  ;;  %v5392_v37 = vcombine.low %v5359_v43, %v5375_v56  ;;  %v5393_v63 = vcombine.high %v5359_v43, %v5375_v56 }
 0xbef   :  { %v5420_v46 = vrot.slane %v5412_v10, %v12075_v35  ;;  %v5384_v18 = vrot.slane %v5376_v51, %v12094_v47 }
 0xbf0   :  { %v13212_v14 = vpop.permute.xlu1 %5246  ;;  %v5391_v48 = vrot.slane %v5377_v4, %v12094_v47  ;;  %v5400_v16 = vrot.slane %v5392_v37, %v12094_v47  ;;  %v5407_v32 = vrot.slane %v5393_v63, %v12094_v47 }
 0xbf1   :  { %5826 = vrot.lane.b32.xlu0 %v13176_v38, %s11883_s22  ;;  %5848 = vrot.lane.b32.xlu1 %v13204_v52, %s11883_s22 }
 0xbf2   :  { %v5616_v45 = vcombine.low %v5384_v18, %v5391_v48  ;;  %v10778_v62 = vcombine.high %v5384_v18, %v5391_v48  ;;  %v5632_v34 = vcombine.low %v5400_v16, %v5407_v32  ;;  %v10779_v56 = vcombine.high %v5400_v16, %v5407_v32  ;;  %v5821_v48 = vpop.permute.xlu0 %5820 }
 0xbf4   :  { %v13220_v44 = vpop.permute.xlu1 %5270  ;;  %v5623_v37 = vrot.slane %v5616_v45, %v12075_v35  ;;  %v5631_v63 = vrot.slane %v10778_v62, %v12075_v35  ;;  %v5639_v55 = vrot.slane %v5632_v34, %v12075_v35 }
 0xbf5   :  { %5842 = vrot.lane.b32.xlu0 %v13214_v53, %s11883_s22  ;;  %5834 = vrot.lane.b32.xlu1 %v13212_v14, %s11883_s22  ;;  %v5496_v27 = vcombine.low %v13212_v14, %v13220_v44 }
 0xbf7   :  { %v5504_v25 = vrot.slane %v5496_v27, %v12075_v35 }
 0xbf9   :  { %6420 = vrot.lane.b32.xlu0 %v5241_v23, %s11886_s23  ;;  %5850 = vrot.lane.b32.xlu1 %v13220_v44, %s11883_s22  ;;  %v5497_v23 = vcombine.high %v13212_v14, %v13220_v44 }
 0xbfb   :  { %v5511_v19 = vrot.slane %v5497_v23, %v12075_v35 }
 0xbfd   :  { %6422 = vrot.lane.b32.xlu0 %v5243_v2, %s11886_s23  ;;  %6412 = vrot.lane.b32.xlu1 %v13154_v61, %s11886_s23  ;;  %v5429_v61 = vcombine.high %v13195_v49, %v13204_v52  ;;  %v5481_v2 = vcombine.high %v13176_v38, %v13214_v53 }
 0xbff   :  { %v5443_v26 = vrot.slane %v5429_v61, %v12075_v35  ;;  %v5495_v42 = vrot.slane %v5481_v2, %v12075_v35  ;;  %v5647_v61 = vrot.slane %v10779_v56, %v12075_v35 }
 0xc01   :  { %6428 = vrot.lane.b32.xlu1 %v5253_v13, %s11886_s23  ;;  %v10777_v13 = vcombine.high %v5332_v6, %v5339_v1 }
 0xc03   :  { %v5579_v30 = vrot.slane %v10777_v13, %v12075_v35 }
 0xc05   :  { %6436 = vrot.lane.b32.xlu1 %v5265_v22, %s11886_s23  ;;  %v5436_v22 = vrot.slane %v5428_v54, %v12075_v35 }
 0xc07   :  { %v5444_v57 = vcombine.low %v5420_v46, %v5436_v22  ;;  %v5445_v24 = vcombine.high %v5420_v46, %v5436_v22 }
 0xc09   :  { %6414 = vrot.lane.b32.xlu1 %v13160_v59, %s11886_s23  ;;  %v5564_v59 = vcombine.low %v5332_v6, %v5339_v1  ;;  %v5452_v33 = vrot.slane %v5444_v57, %v12094_v47  ;;  %v5459_v10 = vrot.slane %v5445_v24, %v12094_v47  ;;  %v5528_v1 = vcombine.low %v5495_v42, %v5511_v19 }
 0xc0a   :  { %v5664_v57 = vcombine.low %v5639_v55, %v5647_v61 }
 0xc0b   :  { %v5571_v15 = vrot.slane %v5564_v59, %v12075_v35  ;;  %v5684_v46 = vcombine.low %v5452_v33, %v5459_v10  ;;  %v10780_v27 = vcombine.high %v5452_v33, %v5459_v10  ;;  %v5536_v23 = vrot.slane %v5528_v1, %v12094_v47 }
 0xc0c   :  { %v13320_v33 = vrot.slane %v5664_v57, %v12094_v47 }
 0xc0d   :  { %6416 = vrot.lane.b32.xlu1 %v13166_v20, %s11886_s23  ;;  %v13266_v20 = vrot.slane %v5548_v7, %v12075_v35  ;;  %v5529_v7 = vcombine.high %v5495_v42, %v5511_v19  ;;  %v5596_v4 = vcombine.low %v5571_v15, %v5579_v30  ;;  %v5597_v18 = vcombine.high %v5571_v15, %v5579_v30 }
 0xc0e   :  { %v5691_v24 = vrot.slane %v5684_v46, %v12075_v35 }
 0xc0f   :  { %v5580_v51 = vcombine.low %v13266_v20, %v5563_v40  ;;  %v5543_v22 = vrot.slane %v5529_v7, %v12094_v47  ;;  %v13304_v32 = vrot.slane %v5596_v4, %v12094_v47  ;;  %v13314_v45 = vrot.slane %v5597_v18, %v12094_v47 }
 0xc11   :  { %6430 = vrot.lane.b32.xlu1 %v5255_v8, %s11886_s23  ;;  %v5480_v8 = vcombine.low %v13176_v38, %v13214_v53  ;;  %v13301_v16 = vrot.slane %v5580_v51, %v12094_v47  ;;  %v5768_v42 = vcombine.low %v5536_v23, %v5543_v22 }
 0xc13   :  { %v5488_v39 = vrot.slane %v5480_v8, %v12075_v35  ;;  %v5775_v1 = vrot.slane %v5768_v42, %v12075_v35 }
 0xc15   :  { %6438 = vrot.lane.b32.xlu1 %v5267_v9, %s11886_s23  ;;  %v5427_v9 = vrot.slane %v5413_v11, %v12075_v35  ;;  %v5512_v43 = vcombine.low %v5488_v39, %v5504_v25  ;;  %v5513_v6 = vcombine.high %v5488_v39, %v5504_v25  ;;  %v5699_v25 = vrot.slane %v10780_v27, %v12075_v35 }
 0xc17   :  { %v5460_v0 = vcombine.low %v5427_v9, %v5443_v26  ;;  %v5461_v12 = vcombine.high %v5427_v9, %v5443_v26  ;;  %v5520_v59 = vrot.slane %v5512_v43, %v12094_v47  ;;  %v5527_v13 = vrot.slane %v5513_v6, %v12094_v47 }
 0xc18   :  { %v5581_v9 = vcombine.high %v13266_v20, %v5563_v40  ;;  %v5648_v26 = vcombine.low %v5623_v37, %v5631_v63  ;;  %v5665_v20 = vcombine.high %v5639_v55, %v5647_v61  ;;  %v5612_v6 = vcombine.low %v13301_v16, %v13304_v32 }
 0xc19   :  { %v5468_v54 = vrot.slane %v5460_v0, %v12094_v47  ;;  %v5475_v11 = vrot.slane %v5461_v12, %v12094_v47  ;;  %v5752_v19 = vcombine.low %v5520_v59, %v5527_v13  ;;  %v10782_v39 = vcombine.high %v5520_v59, %v5527_v13 }
 0xc1a   :  { %v10783_v0 = vcombine.high %v5536_v23, %v5543_v22  ;;  %v5649_v12 = vcombine.high %v5623_v37, %v5631_v63  ;;  %v13311_v30 = vrot.slane %v5581_v9, %v12094_v47  ;;  %v13317_v56 = vrot.slane %v5648_v26, %v12094_v47 }
 0xc1b   :  { %v5700_v8 = vcombine.low %v5468_v54, %v5475_v11  ;;  %v10781_v2 = vcombine.high %v5468_v54, %v5475_v11  ;;  %v5759_v10 = vrot.slane %v5752_v19, %v12075_v35  ;;  %v5767_v43 = vrot.slane %v10782_v39, %v12075_v35 }
 0xc1c   :  { %v5783_v7 = vrot.slane %v10783_v0, %v12075_v35  ;;  %v13329_v54 = vrot.slane %v5649_v12, %v12094_v47  ;;  %v13332_v11 = vrot.slane %v5665_v20, %v12094_v47  ;;  %v5716_v37 = vcombine.low %v5691_v24, %v5699_v25 }
 0xc1d   :  { %v5707_v40 = vrot.slane %v5700_v8, %v12075_v35  ;;  %v5715_v15 = vrot.slane %v10781_v2, %v12075_v35  ;;  %v5717_v22 = vcombine.high %v5691_v24, %v5699_v25  ;;  %v5784_v2 = vcombine.low %v5759_v10, %v5767_v43 }
 0xc1e   :  { %v13347_v57 = vrot.slane %v5716_v37, %v12094_v47  ;;  %v5785_v39 = vcombine.high %v5759_v10, %v5767_v43  ;;  %v5801_v42 = vcombine.high %v5775_v1, %v5783_v7 }
 0xc1f   :  { %v5732_v63 = vcombine.low %v5707_v40, %v5715_v15  ;;  %v5733_v8 = vcombine.high %v5707_v40, %v5715_v15  ;;  %v13365_v10 = vrot.slane %v5784_v2, %v12094_v47 }
 0xc21   :  { %v13350_v19 = vrot.slane %v5732_v63, %v12094_v47 }
 0xc4f   :  { %v5837_v62 = vpop.permute.xlu0 %5836  ;;  %v5829_v34 = vpop.permute.xlu1 %5828 }
 0xc50   :  { %v5868_v55 = vcombine.low %v5821_v48, %v5837_v62  ;;  %v5869_v61 = vcombine.high %v5821_v48, %v5837_v62  ;;  %v5800_v48 = vcombine.low %v5775_v1, %v5783_v7  ;;  %v13359_v62 = vrot.slane %v5717_v22, %v12094_v47 }
 0xc52   :  { %v5876_v0 = vrot.slane %v5868_v55, %v12075_v35  ;;  %v5883_v24 = vrot.slane %v5869_v61, %v12075_v35  ;;  %v13370_v55 = vrot.slane %v5800_v48, %v12094_v47  ;;  %v13373_v61 = vrot.slane %v5785_v39, %v12094_v47 }
 0xc53   :  { %v5823_v46 = vpop.permute.xlu0 %5822  ;;  %v5845_v13 = vpop.permute.xlu1 %5844 }
 0xc54   :  { %v5884_v9 = vcombine.low %v5829_v34, %v5845_v13  ;;  %v5885_v18 = vcombine.high %v5829_v34, %v5845_v13  ;;  %v13362_v34 = vrot.slane %v5733_v8, %v12094_v47  ;;  %v13376_v13 = vrot.slane %v5801_v42, %v12094_v47 }
 0xc56   :  { %v5892_v25 = vrot.slane %v5884_v9, %v12075_v35  ;;  %v5899_v12 = vrot.slane %v5885_v18, %v12075_v35 }
 0xc57   :  { %v5839_v20 = vpop.permute.xlu0 %5838  ;;  %v5831_v40 = vpop.permute.xlu1 %5830 }
 0xc58   :  { %v5900_v43 = vcombine.low %v5876_v0, %v5892_v25  ;;  %v5901_v1 = vcombine.high %v5876_v0, %v5892_v25  ;;  %v5916_v7 = vcombine.low %v5883_v24, %v5899_v12  ;;  %v5917_v37 = vcombine.high %v5883_v24, %v5899_v12 }
 0xc59   :  { %v5936_v0 = vcombine.low %v5823_v46, %v5839_v20  ;;  %v5937_v24 = vcombine.high %v5823_v46, %v5839_v20 }
 0xc5a   :  { %v5908_v22 = vrot.slane %v5900_v43, %v12094_v47  ;;  %v5915_v8 = vrot.slane %v5901_v1, %v12094_v47  ;;  %v5924_v2 = vrot.slane %v5916_v7, %v12094_v47  ;;  %v5931_v9 = vrot.slane %v5917_v37, %v12094_v47 }
 0xc5b   :  { %v5825_v18 = vpop.permute.xlu0 %5824  ;;  %v5847_v25 = vpop.permute.xlu1 %5846 }
 0xc5c   :  { %v6140_v42 = vcombine.low %v5908_v22, %v5915_v8  ;;  %v10784_v12 = vcombine.high %v5908_v22, %v5915_v8  ;;  %v6156_v63 = vcombine.low %v5924_v2, %v5931_v9  ;;  %v10785_v43 = vcombine.high %v5924_v2, %v5931_v9 }
 0xc5d   :  { %v5952_v15 = vcombine.low %v5831_v40, %v5847_v25  ;;  %v5953_v1 = vcombine.high %v5831_v40, %v5847_v25  ;;  %v5944_v22 = vrot.slane %v5936_v0, %v12075_v35  ;;  %v5951_v8 = vrot.slane %v5937_v24, %v12075_v35 }
 0xc5e   :  { %v6147_v46 = vrot.slane %v6140_v42, %v12075_v35  ;;  %v6155_v20 = vrot.slane %v10784_v12, %v12075_v35  ;;  %v6163_v48 = vrot.slane %v6156_v63, %v12075_v35  ;;  %v6171_v39 = vrot.slane %v10785_v43, %v12075_v35 }
 0xc5f   :  { %v5841_v26 = vpop.permute.xlu0 %5840  ;;  %v5960_v40 = vrot.slane %v5952_v15, %v12075_v35  ;;  %v5967_v2 = vrot.slane %v5953_v1, %v12075_v35  ;;  %v5833_v9 = vpop.permute.xlu1 %5832 }
 0xc60   :  { %v6172_v25 = vcombine.low %v6147_v46, %v6155_v20  ;;  %v6188_v37 = vcombine.low %v6163_v48, %v6171_v39  ;;  %v6004_v7 = vcombine.low %v5825_v18, %v5841_v26  ;;  %v6005_v42 = vcombine.high %v5825_v18, %v5841_v26 }
 0xc61   :  { %v5968_v23 = vcombine.low %v5944_v22, %v5960_v40  ;;  %v5969_v12 = vcombine.high %v5944_v22, %v5960_v40  ;;  %v5984_v59 = vcombine.low %v5951_v8, %v5967_v2  ;;  %v5985_v63 = vcombine.high %v5951_v8, %v5967_v2 }
 0xc62   :  { %v6173_v27 = vcombine.high %v6147_v46, %v6155_v20  ;;  %v6189_v43 = vcombine.high %v6163_v48, %v6171_v39  ;;  %v6180_v0 = vrot.slane %v6172_v25, %v12094_v47  ;;  %v6196_v24 = vrot.slane %v6188_v37, %v12094_v47 }
 0xc63   :  { %v13398_v51 = vpop.permute.xlu0 %5826  ;;  %v5976_v15 = vrot.slane %v5968_v23, %v12094_v47  ;;  %v5983_v1 = vrot.slane %v5969_v12, %v12094_v47  ;;  %v5992_v4 = vrot.slane %v5984_v59, %v12094_v47  ;;  %v5999_v26 = vrot.slane %v5985_v63, %v12094_v47  ;;  %v5849_v18 = vpop.permute.xlu1 %5848 }
 0xc64   :  { %v6012_v22 = vrot.slane %v6004_v7, %v12075_v35  ;;  %v6020_v8 = vcombine.low %v5833_v9, %v5849_v18  ;;  %v6021_v46 = vcombine.high %v5833_v9, %v5849_v18  ;;  %v6204_v48 = vcombine.low %v6180_v0, %v6196_v24 }
 0xc65   :  { %v6208_v39 = vcombine.low %v5976_v15, %v5983_v1  ;;  %v10786_v20 = vcombine.high %v5976_v15, %v5983_v1  ;;  %v6224_v40 = vcombine.low %v5992_v4, %v5999_v26  ;;  %v10787_v2 = vcombine.high %v5992_v4, %v5999_v26 }
 0xc66   :  { %v6019_v37 = vrot.slane %v6005_v42, %v12075_v35  ;;  %v6028_v23 = vrot.slane %v6020_v8, %v12075_v35  ;;  %v6035_v25 = vrot.slane %v6021_v46, %v12075_v35  ;;  %11316 = vmatpush3.xpose.msk.msra.mxu0 %vm1952_vm2, %v6204_v48  ;;  %v6187_v59 = vrot.slane %v6173_v27, %v12094_v47 }
 0xc67   :  { %v6215_v12 = vrot.slane %v6208_v39, %v12075_v35  ;;  %v6223_v7 = vrot.slane %v10786_v20, %v12075_v35  ;;  %v6203_v9 = vrot.slane %v6189_v43, %v12094_v47  ;;  %v5835_v63 = vpop.permute.xlu1 %5834  ;;  %11320 = vmatprep.subr.mxu0 %v11884_v21  ;;  %v6205_v4 = vcombine.high %v6180_v0, %v6196_v24  ;;  %v5843_v18 = vpop.permute.xlu0 %5842 }
 0xc68   :  { %v6036_v15 = vcombine.low %v6012_v22, %v6028_v23  ;;  %v6037_v42 = vcombine.high %v6012_v22, %v6028_v23  ;;  %v6052_v1 = vcombine.low %v6019_v37, %v6035_v25  ;;  %v6053_v26 = vcombine.high %v6019_v37, %v6035_v25 }
 0xc69   :  { %v6231_v8 = vrot.slane %v6224_v40, %v12075_v35  ;;  %v6239_v46 = vrot.slane %v10787_v2, %v12075_v35  ;;  %v6240_v27 = vcombine.low %v6215_v12, %v6223_v7  ;;  %v6241_v48 = vcombine.high %v6215_v12, %v6223_v7  ;;  %11318 = vmatmul.mubr.msk.f32.vlgmr.msra.gmra.mxu0 %vm1952_vm2, %v5612_v6 }
 0xc6a   :  { %v6044_v43 = vrot.slane %v6036_v15, %v12094_v47  ;;  %v6051_v0 = vrot.slane %v6037_v42, %v12094_v47  ;;  %v6060_v24 = vrot.slane %v6052_v1, %v12094_v47  ;;  %v6067_v22 = vrot.slane %v6053_v26, %v12094_v47  ;;  %11321 = vmatpush3.xpose.msk.msra.mxu0 %vm1952_vm2, %v6205_v4 }
 0xc6b   :  { %v6206_v39 = vcombine.low %v6187_v59, %v6203_v9  ;;  %v6072_v20 = vcombine.low %v13398_v51, %v5843_v18  ;;  %v6073_v40 = vcombine.high %v13398_v51, %v5843_v18  ;;  %v5851_v2 = vpop.permute.xlu1 %5850  ;;  %11322 = vmatprep.mubr.msk.f32.mxu0 %vm11885_vm1, %v11884_v21  ;;  %11330 = vmatprep.subr.mxu0 %v11884_v21 }
 0xc6c   :  { %v6276_v6 = vcombine.low %v6044_v43, %v6051_v0  ;;  %v10788_v37 = vcombine.high %v6044_v43, %v6051_v0  ;;  %v6292_v23 = vcombine.low %v6060_v24, %v6067_v22  ;;  %v10789_v25 = vcombine.high %v6060_v24, %v6067_v22 }
 0xc6d   :  { %v6256_v12 = vcombine.low %v6231_v8, %v6239_v46  ;;  %11326 = vmatpush3.xpose.msk.msra.mxu1 %vm1952_vm2, %v6206_v39  ;;  %v6080_v7 = vrot.slane %v6072_v20, %v12075_v35  ;;  %v6088_v4 = vcombine.low %v5835_v63, %v5851_v2  ;;  %v6089_v15 = vcombine.high %v5835_v63, %v5851_v2 }
 0xc6e   :  { %v13435_v42 = vrot.slane %v6276_v6, %v12075_v35  ;;  %v13438_v51 = vrot.slane %v10788_v37, %v12075_v35  ;;  %v13441_v1 = vrot.slane %v6292_v23, %v12075_v35  ;;  %v13444_v26 = vrot.slane %v10789_v25, %v12075_v35  ;;  %11335 = vmatprep.subr.mxu1 %v11884_v21 }
 0xc6f   :  { %v14315_v18 = vcombine.high %v13301_v16, %v13304_v32  ;;  %v6087_v43 = vrot.slane %v6073_v40, %v12075_v35  ;;  %v6096_v63 = vrot.slane %v6088_v4, %v12075_v35  ;;  %v6103_v0 = vrot.slane %v6089_v15, %v12075_v35  ;;  %v6413_v22 = vpop.permute.xlu1 %6412 }
 0xc70   :  { %v6207_v24 = vcombine.high %v6187_v59, %v6203_v9  ;;  %v6257_v39 = vcombine.high %v6231_v8, %v6239_v46  ;;  %v6308_v20 = vcombine.low %v13435_v42, %v13438_v51  ;;  %v14316_v2 = vcombine.low %v13311_v30, %v13314_v45 }
 0xc71   :  { %11323 = vmatmul.mubr.msk.f32.vlgmr.msra.gmra.mxu0 %vm1952_vm2, %v14315_v18  ;;  %v6248_v16 = vrot.slane %v6240_v27, %v12094_v47  ;;  %v5817_v32 = vcombine.high %v13365_v10, %v13370_v55  ;;  %v6104_v40 = vcombine.low %v6080_v7, %v6096_v63  ;;  %v6105_v6 = vcombine.high %v6080_v7, %v6096_v63 }
 0xc72   :  { %11328 = vmatmul.mubr.msk.f32.vlgmr.msra.gmra.mxu1 %vm1952_vm2, %v14316_v2  ;;  %v6120_v37 = vcombine.low %v6087_v43, %v6103_v0  ;;  %v6121_v23 = vcombine.high %v6087_v43, %v6103_v0  ;;  %11331 = vmatpush3.xpose.msk.msra.mxu0 %vm1952_vm2, %v6207_v24  ;;  %v6324_v59 = vcombine.low %v13441_v1, %v13444_v26 }
 0xc73   :  { %v6264_v9 = vrot.slane %v6256_v12, %v12094_v47  ;;  %11332 = vmatprep.mubr.msk.f32.mxu0 %vm11885_vm1, %v11884_v21  ;;  %11337 = vmatprep.mubr.msk.f32.mxu1 %vm11885_vm1, %v11884_v21  ;;  %v6255_v8 = vrot.slane %v6241_v48, %v12094_v47  ;;  %v6112_v46 = vrot.slane %v6104_v40, %v12094_v47  ;;  %v6429_v4 = vpop.permute.xlu1 %6428 }
 0xc74   :  { %v6119_v27 = vrot.slane %v6105_v6, %v12094_v47  ;;  %v6128_v25 = vrot.slane %v6120_v37, %v12094_v47  ;;  %v6135_v7 = vrot.slane %v6121_v23, %v12094_v47  ;;  %11340 = vmatprep.subr.mxu0 %v11884_v21  ;;  %v14317_v15 = vcombine.high %v13311_v30, %v13314_v45  ;;  %v6421_v45 = vpop.permute.xlu0 %6420 }
 0xc75   :  { %v6272_v12 = vcombine.low %v6248_v16, %v6264_v9  ;;  %v6273_v18 = vcombine.high %v6248_v16, %v6264_v9  ;;  %v6271_v48 = vrot.slane %v6257_v39, %v12094_v47  ;;  %v6460_v43 = vcombine.low %v6413_v22, %v6429_v4 }
 0xc76   :  { %11333 = vmatmul.mubr.msk.f32.vlgmr.msra.gmra.mxu0 %vm1952_vm2, %v14317_v15  ;;  %v6344_v63 = vcombine.low %v6112_v46, %v6119_v27  ;;  %v10790_v0 = vcombine.high %v6112_v46, %v6119_v27  ;;  %v6360_v24 = vcombine.low %v6128_v25, %v6135_v7  ;;  %v10791_v2 = vcombine.high %v6128_v25, %v6135_v7 }
 0xc77   :  { %11342 = vmatprep.mubr.msk.f32.mxu0 %vm11885_vm1, %v11884_v21  ;;  %v6309_v40 = vcombine.high %v13435_v42, %v13438_v51  ;;  %v6325_v6 = vcombine.high %v13441_v1, %v13444_v26  ;;  %11336 = vmatpush3.xpose.msk.msra.mxu1 %vm1952_vm2, %v6272_v12  ;;  %v6461_v30 = vcombine.high %v6413_v22, %v6429_v4  ;;  %v6437_v42 = vpop.permute.xlu1 %6436 }
 0xc78   :  { %11341 = vmatpush3.xpose.msk.msra.mxu0 %vm1952_vm2, %v6273_v18  ;;  %v6351_v39 = vrot.slane %v6344_v63, %v12075_v35  ;;  %v6359_v16 = vrot.slane %v10790_v0, %v12075_v35  ;;  %v6367_v37 = vrot.slane %v6360_v24, %v12075_v35  ;;  %v6375_v23 = vrot.slane %v10791_v2, %v12075_v35 }
 0xc79   :  { %11345 = vmatprep.subr.mxu1 %v11884_v21  ;;  %v6274_v51 = vcombine.low %v6255_v8, %v6271_v48  ;;  %11350 = vmatprep.subr.mxu0 %v11884_v21  ;;  %v6316_v1 = vrot.slane %v6308_v20, %v12094_v47  ;;  %v6332_v26 = vrot.slane %v6324_v59, %v12094_v47 }
 0xc7a   :  { %v6476_v22 = vcombine.low %v6421_v45, %v6437_v42  ;;  %v6376_v9 = vcombine.low %v6351_v39, %v6359_v16  ;;  %v14318_v46 = vcombine.low %v13317_v56, %v13320_v33  ;;  %v6468_v27 = vrot.slane %v6460_v43, %v12075_v35 }
 0xc7b   :  { %v6475_v25 = vrot.slane %v6461_v30, %v12075_v35  ;;  %v6275_v7 = vcombine.high %v6255_v8, %v6271_v48  ;;  %v6340_v20 = vcombine.low %v6316_v1, %v6332_v26  ;;  %v6477_v4 = vcombine.high %v6421_v45, %v6437_v42  ;;  %v13515_v48 = vpop.permute.xlu1 %6414 }
 0xc7c   :  { %11338 = vmatmul.mubr.msk.f32.vlgmr.msra.gmra.mxu1 %vm1952_vm2, %v14318_v46  ;;  %v6484_v59 = vrot.slane %v6476_v22, %v12075_v35  ;;  %v6392_v12 = vcombine.low %v6367_v37, %v6375_v23  ;;  %v14319_v15 = vcombine.high %v13317_v56, %v13320_v33  ;;  %v6323_v18 = vrot.slane %v6309_v40, %v12094_v47 }
 0xc7d   :  { %11346 = vmatpush3.xpose.msk.msra.mxu1 %vm1952_vm2, %v6274_v51  ;;  %11347 = vmatprep.mubr.msk.f32.mxu1 %vm11885_vm1, %v11884_v21  ;;  %v6339_v8 = vrot.slane %v6325_v6, %v12094_v47  ;;  %v6491_v43 = vrot.slane %v6477_v4, %v12075_v35  ;;  %v6377_v56 = vcombine.high %v6351_v39, %v6359_v16 }
 0xc7e   :  { %11343 = vmatmul.mubr.msk.f32.vlgmr.msra.gmra.mxu0 %vm1952_vm2, %v14319_v15  ;;  %11355 = vmatprep.subr.mxu1 %v11884_v21  ;;  %v6492_v63 = vcombine.low %v6468_v27, %v6484_v59  ;;  %v6493_v0 = vcombine.high %v6468_v27, %v6484_v59  ;;  %v6393_v33 = vcombine.high %v6367_v37, %v6375_v23 }
 0xc7f   :  { %11351 = vmatpush3.xpose.msk.msra.mxu0 %vm1952_vm2, %v6275_v7  ;;  %11352 = vmatprep.mubr.msk.f32.mxu0 %vm11885_vm1, %v11884_v21  ;;  %v14320_v24 = vcombine.low %v13329_v54, %v13332_v11  ;;  %v13527_v2 = vrot.slane %v6376_v9, %v12094_v47  ;;  %v6508_v30 = vcombine.low %v6475_v25, %v6491_v43  ;;  %v13539_v42 = vpop.permute.xlu1 %6416 }
 0xc80   :  { %11360 = vmatprep.subr.mxu0 %v11884_v21  ;;  %v6500_v40 = vrot.slane %v6492_v63, %v12094_v47  ;;  %v6507_v6 = vrot.slane %v6493_v0, %v12094_v47  ;;  %v6509_v45 = vcombine.high %v6475_v25, %v6491_v43  ;;  %v14321_v39 = vcombine.high %v13329_v54, %v13332_v11 }
 0xc81   :  { %11348 = vmatmul.mubr.msk.f32.vlgmr.msra.gmra.mxu1 %vm1952_vm2, %v14320_v24  ;;  %v6341_v16 = vcombine.high %v6316_v1, %v6332_v26  ;;  %v6342_v37 = vcombine.low %v6323_v18, %v6339_v8  ;;  %v6400_v23 = vrot.slane %v6392_v12, %v12094_v47  ;;  %v6516_v51 = vrot.slane %v6508_v30, %v12094_v47 }
 0xc82   :  { %11356 = vmatpush3.xpose.msk.msra.mxu1 %vm1952_vm2, %v6340_v20  ;;  %11357 = vmatprep.mubr.msk.f32.mxu1 %vm11885_vm1, %v11884_v21  ;;  %v6523_v22 = vrot.slane %v6509_v45, %v12094_v47  ;;  %v6732_v9 = vcombine.low %v6500_v40, %v6507_v6  ;;  %v10792_v46 = vcombine.high %v6500_v40, %v6507_v6  ;;  %v6423_v40 = vpop.permute.xlu0 %6422 }
 0xc83   :  { %11353 = vmatmul.mubr.msk.f32.vlgmr.msra.gmra.mxu0 %vm1952_vm2, %v14321_v39  ;;  %11365 = vmatprep.subr.mxu1 %v11884_v21  ;;  %v14322_v27 = vcombine.low %v13347_v57, %v13350_v19  ;;  %v6408_v54 = vcombine.low %v13527_v2, %v6400_v23  ;;  %v13551_v11 = vrot.slane %v6377_v56, %v12094_v47  ;;  %v6431_v12 = vpop.permute.xlu1 %6430 }
 0xc84   :  { %11361 = vmatpush3.xpose.msk.msra.mxu0 %vm1952_vm2, %v6341_v16  ;;  %v13554_v1 = vrot.slane %v6393_v33, %v12094_v47  ;;  %v6739_v26 = vrot.slane %v6732_v9, %v12075_v35  ;;  %v6747_v25 = vrot.slane %v10792_v46, %v12075_v35  ;;  %v6748_v7 = vcombine.low %v6516_v51, %v6523_v22 }
 0xc85   :  { %11358 = vmatmul.mubr.msk.f32.vlgmr.msra.gmra.mxu1 %vm1952_vm2, %v14322_v27  ;;  %v10793_v20 = vcombine.high %v6516_v51, %v6523_v22  ;;  %11362 = vmatprep.mubr.msk.f32.mxu0 %vm11885_vm1, %v11884_v21  ;;  %v6343_v4 = vcombine.high %v6323_v18, %v6339_v8  ;;  %v6409_v59 = vcombine.high %v13527_v2, %v6400_v23 }
 0xc86   :  { %11366 = vmatpush3.xpose.msk.msra.mxu1 %vm1952_vm2, %v6342_v37  ;;  %11367 = vmatprep.mubr.msk.f32.mxu1 %vm11885_vm1, %v11884_v21  ;;  %v5818_v15 = vcombine.low %v13373_v61, %v13376_v13  ;;  %v6755_v43 = vrot.slane %v6748_v7, %v12075_v35  ;;  %v14323_v0 = vcombine.high %v13347_v57, %v13350_v19 }
 0xc87   :  { %v6763_v63 = vrot.slane %v10793_v20, %v12075_v35  ;;  %11370 = vmatprep.subr.mxu0 %v11884_v21  ;;  %v6528_v56 = vcombine.low %v13515_v48, %v6431_v12  ;;  %v14324_v18 = vcombine.low %v13359_v62, %v13362_v34  ;;  %11375 = vmatprep.subr.mxu1 %v11884_v21  ;;  %v6439_v6 = vpop.permute.xlu1 %6438 }
 0xc88   :  { %11363 = vmatmul.mubr.msk.f32.vlgmr.msra.gmra.mxu0 %vm1952_vm2, %v14323_v0  ;;  %v6529_v8 = vcombine.high %v13515_v48, %v6431_v12  ;;  %v6764_v33 = vcombine.low %v6739_v26, %v6747_v25  ;;  %v6765_v24 = vcombine.high %v6739_v26, %v6747_v25  ;;  %v6410_v57 = vcombine.low %v13551_v11, %v13554_v1 }
 0xc89   :  { %11368 = vmatmul.mubr.msk.f32.vlgmr.msra.gmra.mxu1 %vm1952_vm2, %v14324_v18  ;;  %11371 = vmatpush3.xpose.msk.msra.mxu0 %vm1952_vm2, %v6343_v4  ;;  %v6780_v19 = vcombine.low %v6755_v43, %v6763_v63  ;;  %v6781_v2 = vcombine.high %v6755_v43, %v6763_v63  ;;  %v6411_v48 = vcombine.high %v13551_v11, %v13554_v1 }
 0xc8a   :  { %11376 = vmatpush3.xpose.msk.msra.mxu1 %vm1952_vm2, %v6408_v54  ;;  %11372 = vmatprep.mubr.msk.f32.mxu0 %vm11885_vm1, %v11884_v21  ;;  %v6772_v30 = vrot.slane %v6764_v33, %v12094_v47  ;;  %v6779_v45 = vrot.slane %v6765_v24, %v12094_v47  ;;  %v6544_v39 = vcombine.low %v6423_v40, %v6439_v6 }
 0xc8b   :  { %11377 = vmatprep.mubr.msk.f32.mxu1 %vm11885_vm1, %v11884_v21  ;;  %11380 = vmatprep.subr.mxu0 %v11884_v21  ;;  %v6545_v16 = vcombine.high %v6423_v40, %v6439_v6  ;;  %v6788_v37 = vrot.slane %v6780_v19, %v12094_v47  ;;  %v14325_v23 = vcombine.high %v13359_v62, %v13362_v34 }
 0xc8c   :  { %11385 = vmatprep.subr.mxu1 %v11884_v21  ;;  %v14326_v51 = vcombine.low %v13365_v10, %v13370_v55  ;;  %v6536_v22 = vrot.slane %v6528_v56, %v12075_v35  ;;  %v6543_v9 = vrot.slane %v6529_v8, %v12075_v35  ;;  %v6795_v46 = vrot.slane %v6781_v2, %v12094_v47 }
 0xc8d   :  { %11373 = vmatmul.mubr.msk.f32.vlgmr.msra.gmra.mxu0 %vm1952_vm2, %v14325_v23  ;;  %v6552_v27 = vrot.slane %v6544_v39, %v12075_v35  ;;  %v6559_v62 = vrot.slane %v6545_v16, %v12075_v35  ;;  %v6796_v34 = vcombine.low %v6772_v30, %v6788_v37  ;;  %v6797_v54 = vcombine.high %v6772_v30, %v6788_v37 }
 0xc8e   :  { %11378 = vmatmul.mubr.msk.f32.vlgmr.msra.gmra.mxu1 %vm1952_vm2, %v14326_v51  ;;  %11381 = vmatpush3.xpose.msk.msra.mxu0 %vm1952_vm2, %v6409_v59  ;;  %v13614_v11 = vcombine.low %v6779_v45, %v6795_v46  ;;  %v13616_v1 = vcombine.high %v6779_v45, %v6795_v46  ;;  %v5819_v10 = vcombine.high %v13373_v61, %v13376_v13 }
 0xc8f   :  { %11386 = vmatpush3.xpose.msk.msra.mxu1 %vm1952_vm2, %v6410_v57  ;;  %11382 = vmatprep.mubr.msk.f32.mxu0 %vm11885_vm1, %v11884_v21  ;;  %v6560_v26 = vcombine.low %v6536_v22, %v6552_v27  ;;  %v6561_v25 = vcombine.high %v6536_v22, %v6552_v27  ;;  %v6576_v7 = vcombine.low %v6543_v9, %v6559_v62 }
 0xc90   :  { %11387 = vmatprep.mubr.msk.f32.mxu1 %vm11885_vm1, %v11884_v21  ;;  %11390 = vmatprep.subr.mxu0 %v11884_v21  ;;  %v6577_v20 = vcombine.high %v6543_v9, %v6559_v62  ;;  %v8412_v4 = vpack.c.bf16 %v6796_v34, %v6796_v34  ;;  %v8413_v59 = vpack.c.bf16 %v6797_v54, %v6797_v54 }
 0xc91   :  { %11383 = vmatmul.mubr.msk.f32.vlgmr.msra.gmra.mxu0 %vm1952_vm2, %v5817_v32  ;;  %v6568_v12 = vrot.slane %v6560_v26, %v12094_v47  ;;  %v6575_v43 = vrot.slane %v6561_v25, %v12094_v47  ;;  %v6584_v63 = vrot.slane %v6576_v7, %v12094_v47  ;;  %11395 = vmatprep.subr.bf16.mxu1 %v11884_v21 }
 0xc92   :  { %11388 = vmatmul.mubr.msk.f32.vlgmr.msra.gmra.mxu1 %vm1952_vm2, %v5818_v15  ;;  %11391 = vmatpush3.xpose.msk.msra.mxu0 %vm1952_vm2, %v6411_v48  ;;  %v6591_v0 = vrot.slane %v6577_v20, %v12094_v47  ;;  %v8432_v55 = vsel %vm3380_vm3, %v8412_v4, 0  ;;  %v8478_v32 = vsel %vm3380_vm3, %v8413_v59, 0 }
 0xc93   :  { %11392 = vmatprep.mubr.msk.f32.mxu0 %vm11885_vm1, %v11884_v21  ;;  %v6800_v15 = vcombine.low %v6568_v12, %v6575_v43  ;;  %v10794_v56 = vcombine.high %v6568_v12, %v6575_v43  ;;  %11401 = vmatprep.subr.bf16.mxu0 %v11884_v21 }
 0xc94   :  { %v6816_v18 = vcombine.low %v6584_v63, %v6591_v0  ;;  %v10795_v8 = vcombine.high %v6584_v63, %v6591_v0  ;;  %11396 = vmatpush3.bf16.msra.mxu1 %v8432_v55  ;;  %11397 = vmatprep.mubr.msk.bf16.mxu1 %vm11885_vm1, %v11884_v21 }
 0xc95   :  { %11393 = vmatmul.mubr.msk.f32.vlgmr.msra.gmra.mxu0 %vm1952_vm2, %v5819_v10  ;;  %v6807_v33 = vrot.slane %v6800_v15, %v12075_v35  ;;  %v6815_v24 = vrot.slane %v10794_v56, %v12075_v35  ;;  %11407 = vmatprep.subr.bf16.mxu1 %v11884_v21 }
 0xc96   :  { %v6823_v61 = vrot.slane %v6816_v18, %v12075_v35  ;;  %v6831_v13 = vrot.slane %v10795_v8, %v12075_v35  ;;  %11402 = vmatpush3.bf16.msra.mxu0 %v8478_v32  ;;  %11403 = vmatprep.mubr.msk.bf16.mxu0 %vm11885_vm1, %v11884_v21 }
 0xc97   :  { %11413 = vmatprep.subr.bf16.mxu0 %v11884_v21  ;;  %v6832_v57 = vcombine.low %v6807_v33, %v6815_v24  ;;  %v6833_v2 = vcombine.high %v6807_v33, %v6815_v24 }
 0xc98   :  { %v6848_v19 = vcombine.low %v6823_v61, %v6831_v13  ;;  %v6849_v40 = vcombine.high %v6823_v61, %v6831_v13 }
 0xc99   :  { %v6840_v48 = vrot.slane %v6832_v57, %v12094_v47  ;;  %v6847_v30 = vrot.slane %v6833_v2, %v12094_v47 }
 0xc9a   :  { %v6856_v6 = vrot.slane %v6848_v19, %v12094_v47  ;;  %v6863_v45 = vrot.slane %v6849_v40, %v12094_v47 }
 0xc9c   :  { %v13652_v39 = vcombine.low %v6840_v48, %v6856_v6  ;;  %v13654_v16 = vcombine.high %v6840_v48, %v6856_v6  ;;  %v13656_v37 = vcombine.low %v6847_v30, %v6863_v45  ;;  %v13658_v23 = vcombine.high %v6847_v30, %v6863_v45 }
 0xd29   :  { %v7076_v51 = vpop.f32.mrf.mxu0 }
 0xd2a   :  { %v13661_v22 = vadd.f32 %v7076_v51, %v12535_v50 }
 0xd2b   :  { %v11319_v9 = vpop.f32.mrf.mxu0 }
 0xd2c   :  { %v8220_v46 = vsel %vm1952_vm2, %v13661_v22, -inf }
 0xd2d   :  { %8221 = vmax.xlane.f32.xlu0 %v8220_v46 }
 0xd31   :  { %v7152_v27 = vpop.f32.mrf.mxu0 }
 0xd32   :  { %v13666_v62 = vadd.f32 %v7152_v27, %v12535_v50  ;;  %v7228_v34 = vpop.f32.mrf.mxu1 }
 0xd33   :  { %v11324_v54 = vpop.f32.mrf.mxu0  ;;  %v13669_v26 = vadd.f32 %v7228_v34, %v12535_v50 }
 0xd34   :  { %v8223_v25 = vsel %vm1952_vm2, %v13666_v62, -inf  ;;  %v11329_v7 = vpop.f32.mrf.mxu1 }
 0xd35   :  { %8224 = vmax.xlane.f32.xlu1 %v8223_v25  ;;  %v8226_v20 = vsel %vm1952_vm2, %v13669_v26, -inf }
 0xd36   :  { %8227 = vmax.xlane.f32.xlu0 %v8226_v20  ;;  %v7304_v4 = vpop.f32.mrf.mxu0 }
 0xd37   :  { %v13676_v59 = vadd.f32 %v7304_v4, %v12535_v50 }
 0xd38   :  { %v11334_v12 = vpop.f32.mrf.mxu0 }
 0xd39   :  { %v8229_v43 = vsel %vm1952_vm2, %v13676_v59, -inf }
 0xd3a   :  { %8230 = vmax.xlane.f32.xlu0 %v8229_v43 }
 0xd3c   :  { %v7380_v63 = vpop.f32.mrf.mxu1 }
 0xd3d   :  { %v13681_v0 = vadd.f32 %v7380_v63, %v12558_v17 }
 0xd3e   :  { %v11339_v10 = vpop.f32.mrf.mxu1  ;;  %v7456_v55 = vpop.f32.mrf.mxu0 }
 0xd3f   :  { %v13684_v32 = vadd.f32 %v7456_v55, %v12558_v17  ;;  %v8232_v15 = vsel %vm1952_vm2, %v13681_v0, -inf }
 0xd40   :  { %8233 = vmax.xlane.f32.xlu1 %v8232_v15  ;;  %v11344_v56 = vpop.f32.mrf.mxu0 }
 0xd41   :  { %v7532_v50 = vpop.f32.mrf.mxu1  ;;  %v8235_v8 = vsel %vm1952_vm2, %v13684_v32, -inf }
 0xd42   :  { %v13689_v18 = vadd.f32 %v7532_v50, %v12558_v17  ;;  %8236 = vmax.xlane.f32.xlu0 %v8235_v8 }
 0xd43   :  { %v11349_v33 = vpop.f32.mrf.mxu1  ;;  %v7608_v24 = vpop.f32.mrf.mxu0 }
 0xd44   :  { %v13694_v61 = vadd.f32 %v7608_v24, %v12558_v17  ;;  %v8238_v13 = vsel %vm1952_vm2, %v13689_v18, -inf }
 0xd45   :  { %8239 = vmax.xlane.f32.xlu1 %v8238_v13  ;;  %v7684_v57 = vpop.f32.mrf.mxu1  ;;  %v11354_v19 = vpop.f32.mrf.mxu0 }
 0xd46   :  { %v13699_v2 = vadd.f32 %v7684_v57, %v12574_v3  ;;  %v8241_v40 = vsel %vm1952_vm2, %v13694_v61, -inf }
 0xd47   :  { %v11359_v48 = vpop.f32.mrf.mxu1  ;;  %8242 = vmax.xlane.f32.xlu0 %v8241_v40 }
 0xd48   :  { %v7760_v6 = vpop.f32.mrf.mxu0  ;;  %v8244_v30 = vsel %vm1952_vm2, %v13699_v2, -inf }
 0xd49   :  { %v13706_v17 = vadd.f32 %v7760_v6, %v12574_v3  ;;  %8245 = vmax.xlane.f32.xlu1 %v8244_v30  ;;  %v7836_v45 = vpop.f32.mrf.mxu1 }
 0xd4a   :  { %v13709_v51 = vadd.f32 %v7836_v45, %v12574_v3  ;;  %v11364_v9 = vpop.f32.mrf.mxu0 }
 0xd4b   :  { %v11369_v46 = vpop.f32.mrf.mxu1  ;;  %v8247_v27 = vsel %vm1952_vm2, %v13706_v17, -inf }
 0xd4c   :  { %8248 = vmax.xlane.f32.xlu0 %v8247_v27  ;;  %v8250_v34 = vsel %vm1952_vm2, %v13709_v51, -inf }
 0xd4d   :  { %v7912_v54 = vpop.f32.mrf.mxu0  ;;  %8251 = vmax.xlane.f32.xlu1 %v8250_v34 }
 0xd4e   :  { %v7988_v25 = vpop.f32.mrf.mxu1  ;;  %v13716_v7 = vadd.f32 %v7912_v54, %v12574_v3 }
 0xd4f   :  { %v13719_v20 = vadd.f32 %v7988_v25, %v12610_v60  ;;  %v11374_v4 = vpop.f32.mrf.mxu0 }
 0xd50   :  { %v11379_v12 = vpop.f32.mrf.mxu1  ;;  %v8253_v43 = vsel %vm1952_vm2, %v13716_v7, -inf }
 0xd51   :  { %v8256_v63 = vsel %vm1952_vm2, %v13719_v20, -inf  ;;  %8254 = vmax.xlane.f32.xlu0 %v8253_v43  ;;  %v8064_v10 = vpop.f32.mrf.mxu0 }
 0xd52   :  { %8257 = vmax.xlane.f32.xlu1 %v8256_v63  ;;  %v8140_v55 = vpop.f32.mrf.mxu1  ;;  %v13732_v8 = vadd.f32 %v8064_v10, %v12610_v60 }
 0xd53   :  { %v11384_v15 = vpop.f32.mrf.mxu0  ;;  %v13735_v33 = vadd.f32 %v8140_v55, %v12610_v60 }
 0xd54   :  { %v11389_v50 = vpop.f32.mrf.mxu1  ;;  %v8259_v13 = vsel %vm1952_vm2, %v13732_v8, -inf }
 0xd55   :  { %v8216_v56 = vpop.f32.mrf.mxu0 }
 0xd56   :  { %v13738_v24 = vadd.f32 %v8216_v56, %v12610_v60 }
 0xd57   :  { %v11394_v3 = vpop.f32.mrf.mxu0 }
 0xd63   :  { %6432 = vrot.lane.b32.xlu1 %v13200_v5, %s11886_s23  ;;  %v8265_v5 = vsel %vm1952_vm2, %v13738_v24, -inf }
 0xd67   :  { %6440 = vrot.lane.b32.xlu1 %v13204_v52, %s11886_s23  ;;  %6424 = vrot.lane.b32.xlu0 %v13195_v49, %s11886_s23  ;;  %v8262_v52 = vsel %vm1952_vm2, %v13735_v33, -inf }
 0xd86   :  { %8260 = vmax.xlane.f32.xlu0 %v8259_v13 }
 0xd8a   :  { %8266 = vmax.xlane.f32.xlu0 %v8265_v5 }
 0xd8b   :  { %8263 = vmax.xlane.f32.xlu1 %v8262_v52 }
 0xd9c   :  { %6418 = vrot.lane.b32.xlu1 %v13176_v38, %s11886_s23 }
 0xdb6   :  { %v8222_v49 = vpop.xlane.xlu0 %8221 }
 0xdb7   :  { %v8268_v57 = vsub.f32 %v13661_v22, %v8222_v49 }
 0xdb9   :  { %v8284_v60 = vmul.f32 1.442695, %v8268_v57 }
 0xdbb   :  { %11761 = vpow2.f32 %v8284_v60 }
 0xdbe   :  { %v8225_v19 = vpop.xlane.xlu1 %8224 }
 0xdbf   :  { %v8269_v40 = vsub.f32 %v13666_v62, %v8225_v19  ;;  %v8228_v48 = vpop.xlane.xlu0 %8227 }
 0xdc0   :  { %v8270_v6 = vsub.f32 %v13669_v26, %v8228_v48 }
 0xdc1   :  { %v8286_v45 = vmul.f32 1.442695, %v8269_v40 }
 0xdc2   :  { %v8288_v30 = vmul.f32 1.442695, %v8270_v6 }
 0xdc3   :  { %v8231_v9 = vpop.xlane.xlu0 %8230 }
 0xdc4   :  { %11763 = vpow2.f32 %v8288_v30  ;;  %v8271_v46 = vsub.f32 %v13676_v59, %v8231_v9 }
 0xdc5   :  { %11765 = vpow2.f32 %v8286_v45 }
 0xdc6   :  { %v8290_v27 = vmul.f32 1.442695, %v8271_v46 }
 0xdc8   :  { %11767 = vpow2.f32 %v8290_v27  ;;  %v13753_v34 = vpop.eup %11761 }
 0xdc9   :  { %v8234_v38 = vpop.xlane.xlu1 %8233  ;;  %v8316_v26 = vsel %vm1952_vm2, %v13753_v34, 0.0 }
 0xdca   :  { %v8272_v22 = vsub.f32 %v13681_v0, %v8234_v38  ;;  %8317 = vadd.xlane.f32.xlu1 %v8316_v26 }
 0xdcb   :  { %v8237_v54 = vpop.xlane.xlu0 %8236 }
 0xdcc   :  { %v8292_v25 = vmul.f32 1.442695, %v8272_v22  ;;  %v8273_v62 = vsub.f32 %v13684_v32, %v8237_v54 }
 0xdce   :  { %v8240_v4 = vpop.xlane.xlu1 %8239  ;;  %11769 = vpow2.f32 %v8292_v25  ;;  %v8294_v12 = vmul.f32 1.442695, %v8273_v62 }
 0xdcf   :  { %v8274_v59 = vsub.f32 %v13689_v18, %v8240_v4 }
 0xdd0   :  { %v8243_v43 = vpop.xlane.xlu0 %8242 }
 0xdd1   :  { %v8296_v63 = vmul.f32 1.442695, %v8274_v59  ;;  %v8275_v10 = vsub.f32 %v13694_v61, %v8243_v43  ;;  %v13760_v55 = vpop.eup %11763 }
 0xdd2   :  { %v8246_v0 = vpop.xlane.xlu1 %8245  ;;  %v8322_v50 = vsel %vm1952_vm2, %v13760_v55, 0.0  ;;  %v13765_v56 = vpop.eup %11765 }
 0xdd3   :  { %11771 = vpow2.f32 %v8296_v63  ;;  %v8298_v15 = vmul.f32 1.442695, %v8275_v10  ;;  %v8276_v32 = vsub.f32 %v13699_v2, %v8246_v0  ;;  %8323 = vadd.xlane.f32.xlu0 %v8322_v50  ;;  %v8319_v49 = vsel %vm1952_vm2, %v13765_v56, 0.0 }
 0xdd4   :  { %11773 = vpow2.f32 %v8294_v12 }
 0xdd5   :  { %11775 = vpow2.f32 %v8298_v15  ;;  %v8300_v18 = vmul.f32 1.442695, %v8276_v32  ;;  %v8249_v3 = vpop.xlane.xlu0 %8248  ;;  %v13767_v5 = vpop.eup %11767 }
 0xdd6   :  { %v8252_v13 = vpop.xlane.xlu1 %8251  ;;  %v8277_v52 = vsub.f32 %v13706_v17, %v8249_v3  ;;  %v8325_v2 = vsel %vm1952_vm2, %v13767_v5, 0.0 }
 0xdd7   :  { %v8278_v61 = vsub.f32 %v13709_v51, %v8252_v13  ;;  %11777 = vpow2.f32 %v8300_v18  ;;  %8326 = vadd.xlane.f32.xlu1 %v8325_v2  ;;  %8320 = vadd.xlane.f32.xlu0 %v8319_v49 }
 0xdd8   :  { %v8302_v6 = vmul.f32 1.442695, %v8277_v52 }
 0xdd9   :  { %v8304_v57 = vmul.f32 1.442695, %v8278_v61 }
 0xdda   :  { %v8255_v60 = vpop.xlane.xlu0 %8254 }
 0xddb   :  { %v8258_v19 = vpop.xlane.xlu1 %8257  ;;  %v8279_v40 = vsub.f32 %v13716_v7, %v8255_v60  ;;  %v13776_v48 = vpop.eup %11769  ;;  %11779 = vpow2.f32 %v8304_v57 }
 0xddc   :  { %v8280_v17 = vsub.f32 %v13719_v20, %v8258_v19  ;;  %v8328_v30 = vsel %vm1952_vm2, %v13776_v48, 0.0 }
 0xddd   :  { %v8306_v51 = vmul.f32 1.442695, %v8279_v40  ;;  %8329 = vadd.xlane.f32.xlu0 %v8328_v30 }
 0xdde   :  { %v8308_v46 = vmul.f32 1.442695, %v8280_v17  ;;  %v6425_v10 = vpop.permute.xlu0 %6424 }
 0xddf   :  { %11781 = vpow2.f32 %v8306_v51 }
 0xde0   :  { %v13781_v45 = vpop.eup %11771  ;;  %11783 = vpow2.f32 %v8302_v6 }
 0xde1   :  { %v13783_v9 = vpop.eup %11773  ;;  %v8334_v7 = vsel %vm1952_vm2, %v13781_v45, 0.0  ;;  %11785 = vpow2.f32 %v8308_v46 }
 0xde2   :  { %v13787_v27 = vpop.eup %11775  ;;  %8335 = vadd.xlane.f32.xlu0 %v8334_v7  ;;  %v8331_v38 = vsel %vm1952_vm2, %v13783_v9, 0.0 }
 0xde3   :  { %v8337_v20 = vsel %vm1952_vm2, %v13787_v27, 0.0 }
 0xde4   :  { %8338 = vadd.xlane.f32.xlu1 %v8337_v20  ;;  %v13793_v22 = vpop.eup %11777 }
 0xde5   :  { %v8340_v54 = vsel %vm1952_vm2, %v13793_v22, 0.0 }
 0xde6   :  { %8332 = vadd.xlane.f32.xlu0 %v8331_v38 }
 0xde8   :  { %v13797_v25 = vpop.eup %11779 }
 0xde9   :  { %v8346_v26 = vsel %vm1952_vm2, %v13797_v25, 0.0 }
 0xdea   :  { %8341 = vadd.xlane.f32.xlu0 %v8340_v54 }
 0xdec   :  { %v13799_v62 = vpop.eup %11781 }
 0xded   :  { %v13803_v4 = vpop.eup %11783  ;;  %v8349_v59 = vsel %vm1952_vm2, %v13799_v62, 0.0 }
 0xdee   :  { %8347 = vadd.xlane.f32.xlu0 %v8346_v26  ;;  %8350 = vadd.xlane.f32.xlu1 %v8349_v59  ;;  %v8343_v12 = vsel %vm1952_vm2, %v13803_v4, 0.0  ;;  %v13809_v43 = vpop.eup %11785 }
 0xdef   :  { %v8352_v63 = vsel %vm1952_vm2, %v13809_v43, 0.0 }
 0xdf2   :  { %8344 = vadd.xlane.f32.xlu0 %v8343_v12 }
 0xdf6   :  { %8353 = vadd.xlane.f32.xlu0 %v8352_v63 }
 0xdff   :  { %6434 = vrot.lane.b32.xlu1 %v13214_v53, %s11886_s23 }
 0xe03   :  { %6442 = vrot.lane.b32.xlu1 %v13220_v44, %s11886_s23 }
 0xe0f   :  { %v8261_v0 = vpop.xlane.xlu0 %8260 }
 0xe10   :  { %v8281_v15 = vsub.f32 %v13732_v8, %v8261_v0  ;;  %v6433_v8 = vpop.permute.xlu1 %6432  ;;  %v8414_v0 = vpack.c.bf16 %v13614_v11, %v13614_v11 }
 0xe11   :  { %v6596_v17 = vcombine.low %v13539_v42, %v6433_v8 }
 0xe12   :  { %v8310_v32 = vmul.f32 1.442695, %v8281_v15 }
 0xe13   :  { %v8267_v50 = vpop.xlane.xlu0 %8266  ;;  %v6604_v7 = vrot.slane %v6596_v17, %v12075_v35 }
 0xe14   :  { %11787 = vpow2.f32 %v8310_v32  ;;  %v8283_v18 = vsub.f32 %v13738_v24, %v8267_v50  ;;  %v6441_v52 = vpop.permute.xlu1 %6440 }
 0xe15   :  { %v6612_v6 = vcombine.low %v6425_v10, %v6441_v52  ;;  %v6613_v51 = vcombine.high %v6425_v10, %v6441_v52 }
 0xe16   :  { %v8314_v3 = vmul.f32 1.442695, %v8283_v18 }
 0xe17   :  { %v6627_v30 = vrot.slane %v6613_v51, %v12075_v35 }
 0xe18   :  { %11789 = vpow2.f32 %v8314_v3  ;;  %v8264_v24 = vpop.xlane.xlu1 %8263 }
 0xe19   :  { %v8282_v2 = vsub.f32 %v13735_v33, %v8264_v24  ;;  %v6620_v33 = vrot.slane %v6612_v6, %v12075_v35 }
 0xe1b   :  { %v8312_v49 = vmul.f32 1.442695, %v8282_v2  ;;  %v6628_v38 = vcombine.low %v6604_v7, %v6620_v33  ;;  %v6629_v54 = vcombine.high %v6604_v7, %v6620_v33 }
 0xe1c   :  { %v13830_v57 = vpop.permute.xlu1 %6418 }
 0xe1d   :  { %11791 = vpow2.f32 %v8312_v49  ;;  %v6643_v15 = vrot.slane %v6629_v54, %v12094_v47 }
 0xe21   :  { %v13819_v13 = vpop.eup %11787 }
 0xe22   :  { %v8355_v61 = vsel %vm1952_vm2, %v13819_v13, 0.0 }
 0xe23   :  { %8356 = vadd.xlane.f32.xlu0 %v8355_v61 }
 0xe25   :  { %v13823_v53 = vpop.eup %11789 }
 0xe26   :  { %v8361_v44 = vsel %vm1952_vm2, %v13823_v53, 0.0 }
 0xe27   :  { %8362 = vadd.xlane.f32.xlu1 %v8361_v44  ;;  %v8524_v44 = vsel %vm3380_vm3, %v8414_v0, 0 }
 0xe2a   :  { %v13832_v60 = vpop.eup %11791 }
 0xe2b   :  { %v8358_v19 = vsel %vm1952_vm2, %v13832_v60, 0.0 }
 0xe39   :  { %6426 = vrot.lane.b32.xlu0 %v13212_v14, %s11886_s23  ;;  %v6597_v14 = vcombine.high %v13539_v42, %v6433_v8  ;;  %v6636_v42 = vrot.slane %v6628_v38, %v12094_v47 }
 0xe3b   :  { %v6611_v20 = vrot.slane %v6597_v14, %v12075_v35  ;;  %v6868_v8 = vcombine.low %v6636_v42, %v6643_v15  ;;  %v10796_v52 = vcombine.high %v6636_v42, %v6643_v15 }
 0xe3d   :  { %v6644_v26 = vcombine.low %v6611_v20, %v6627_v30  ;;  %v6645_v59 = vcombine.high %v6611_v20, %v6627_v30  ;;  %v6883_v6 = vrot.slane %v10796_v52, %v12075_v35 }
 0xe3f   :  { %v6652_v32 = vrot.slane %v6644_v26, %v12094_v47  ;;  %v6659_v50 = vrot.slane %v6645_v59, %v12094_v47 }
 0xe41   :  { %v6884_v24 = vcombine.low %v6652_v32, %v6659_v50  ;;  %v10797_v2 = vcombine.high %v6652_v32, %v6659_v50 }
 0xe43   :  { %v6891_v51 = vrot.slane %v6884_v24, %v12075_v35  ;;  %v6899_v17 = vrot.slane %v10797_v2, %v12075_v35 }
 0xe45   :  { %v6916_v20 = vcombine.low %v6891_v51, %v6899_v17 }
 0xe47   :  { %v6924_v42 = vrot.slane %v6916_v20, %v12094_v47 }
 0xe53   :  { %v8318_v40 = vpop.xlane.xlu1 %8317 }
 0xe54   :  { %11793 = vrcp.f32 %v8318_v40  ;;  %v6875_v40 = vrot.slane %v6868_v8, %v12075_v35 }
 0xe56   :  { %v6900_v7 = vcombine.low %v6875_v40, %v6883_v6 }
 0xe58   :  { %8359 = vadd.xlane.f32.xlu0 %v8358_v19  ;;  %v8416_v19 = vpack.c.bf16 %v13652_v39, %v13652_v39 }
 0xe5a   :  { %v8616_v39 = vsel %vm3380_vm3, %v8416_v19, 0  ;;  %v8419_v19 = vpack.c.bf16 %v13658_v23, %v13658_v23 }
 0xe5c   :  { %v8324_v46 = vpop.xlane.xlu0 %8323  ;;  %v8754_v23 = vsel %vm3380_vm3, %v8419_v19, 0 }
 0xe5d   :  { %11795 = vrcp.f32 %v8324_v46 }
 0xe60   :  { %v8321_v12 = vpop.xlane.xlu0 %8320  ;;  %v8327_v63 = vpop.xlane.xlu1 %8326 }
 0xe61   :  { %11797 = vrcp.f32 %v8321_v12  ;;  %v11794_v10 = vpop.eup %11793  ;;  %v8418_v12 = vpack.c.bf16 %v13656_v37, %v13656_v37  ;;  %v8417_v37 = vpack.c.bf16 %v13654_v16, %v13654_v16 }
 0xe62   :  { %v8380_v18 = vmul.f32 %v11794_v10, %v13753_v34  ;;  %11799 = vrcp.f32 %v8327_v63  ;;  %v6908_v10 = vrot.slane %v6900_v7, %v12094_v47 }
 0xe63   :  { %v8662_v16 = vsel %vm3380_vm3, %v8417_v37, 0 }
 0xe64   :  { %v8396_v61 = vpack.c.bf16 %v8380_v18, %v8380_v18  ;;  %v8708_v18 = vsel %vm3380_vm3, %v8418_v12, 0 }
 0xe66   :  { %v8330_v3 = vpop.xlane.xlu0 %8329  ;;  %11398 = vmatmul.mubr.msk.bf16.vlgmr.msra.gmra.mxu1 %vm1952_vm2, %v8396_v61  ;;  %v6917_v61 = vcombine.high %v6891_v51, %v6899_v17 }
 0xe67   :  { %11801 = vrcp.f32 %v8330_v3  ;;  %11408 = vmatpush3.bf16.msra.mxu1 %v8524_v44  ;;  %11409 = vmatprep.mubr.msk.bf16.mxu1 %vm11885_vm1, %v11884_v21  ;;  %v6901_v3 = vcombine.high %v6875_v40, %v6883_v6 }
 0xe68   :  { %11419 = vmatprep.subr.bf16.mxu1 %v11884_v21 }
 0xe69   :  { %v6915_v2 = vrot.slane %v6901_v3, %v12094_v47 }
 0xe6a   :  { %v11796_v49 = vpop.eup %11795 }
 0xe6b   :  { %v8336_v11 = vpop.xlane.xlu0 %8335  ;;  %v8382_v34 = vmul.f32 %v11796_v49, %v13760_v55  ;;  %v8415_v55 = vpack.c.bf16 %v13616_v1, %v13616_v1 }
 0xe6c   :  { %11803 = vrcp.f32 %v8336_v11  ;;  %v6931_v11 = vrot.slane %v6917_v61, %v12094_v47 }
 0xe6d   :  { %v8398_v30 = vpack.c.bf16 %v8382_v34, %v8382_v34  ;;  %v8339_v59 = vpop.xlane.xlu1 %8338  ;;  %v8570_v1 = vsel %vm3380_vm3, %v8415_v55, 0 }
 0xe6e   :  { %v11798_v33 = vpop.eup %11797  ;;  %v6934_v6 = vcombine.low %v6915_v2, %v6931_v11 }
 0xe6f   :  { %v8333_v14 = vpop.xlane.xlu0 %8332  ;;  %v8381_v46 = vmul.f32 %v11798_v33, %v13765_v56  ;;  %11410 = vmatmul.mubr.msk.bf16.vlgmr.msra.gmra.mxu1 %vm1952_vm2, %v8398_v30  ;;  %v11800_v26 = vpop.eup %11799  ;;  %v6933_v33 = vcombine.high %v6908_v10, %v6924_v42 }
 0xe70   :  { %11805 = vrcp.f32 %v8333_v14  ;;  %11420 = vmatpush3.bf16.msra.mxu1 %v8616_v39  ;;  %11421 = vmatprep.mubr.msk.bf16.mxu1 %vm11885_vm1, %v11884_v21  ;;  %v8383_v15 = vmul.f32 %v11800_v26, %v13767_v5  ;;  %v8422_v30 = vpack.c.bf16 %v6934_v6, %v6934_v6  ;;  %v6935_v26 = vcombine.high %v6915_v2, %v6931_v11 }
 0xe71   :  { %v8397_v54 = vpack.c.bf16 %v8381_v46, %v8381_v46  ;;  %11431 = vmatprep.subr.bf16.mxu1 %v11884_v21  ;;  %v8421_v7 = vpack.c.bf16 %v6933_v33, %v6933_v33 }
 0xe72   :  { %v8399_v44 = vpack.c.bf16 %v8383_v15, %v8383_v15 }
 0xe73   :  { %v8342_v38 = vpop.xlane.xlu0 %8341  ;;  %11404 = vmatmul.mubr.msk.bf16.vlgmr.msra.gmra.mxu0 %vm1952_vm2, %v8397_v54 }
 0xe74   :  { %11807 = vrcp.f32 %v8342_v38  ;;  %v11802_v56 = vpop.eup %11801  ;;  %11414 = vmatpush3.bf16.msra.mxu0 %v8570_v1  ;;  %11415 = vmatprep.mubr.msk.bf16.mxu0 %vm11885_vm1, %v11884_v21  ;;  %v8423_v1 = vpack.c.bf16 %v6935_v26, %v6935_v26 }
 0xe75   :  { %v8384_v63 = vmul.f32 %v11802_v56, %v13776_v48  ;;  %11809 = vrcp.f32 %v8339_v59  ;;  %11425 = vmatprep.subr.bf16.mxu0 %v11884_v21  ;;  %v6932_v48 = vcombine.low %v6908_v10, %v6924_v42 }
 0xe77   :  { %v8348_v0 = vpop.xlane.xlu0 %8347  ;;  %v8400_v32 = vpack.c.bf16 %v8384_v63, %v8384_v63  ;;  %v8420_v24 = vpack.c.bf16 %v6932_v48, %v6932_v48  ;;  %v8351_v14 = vpop.xlane.xlu1 %8350  ;;  %v8938_v63 = vsel %vm3380_vm3, %v8423_v1, 0 }
 0xe78   :  { %11811 = vrcp.f32 %v8348_v0 }
 0xe79   :  { %v11804_v50 = vpop.eup %11803  ;;  %11422 = vmatmul.mubr.msk.bf16.vlgmr.msra.gmra.mxu1 %vm1952_vm2, %v8400_v32  ;;  %v8800_v40 = vsel %vm3380_vm3, %v8420_v24, 0 }
 0xe7a   :  { %11432 = vmatpush3.bf16.msra.mxu1 %v8708_v18  ;;  %11433 = vmatprep.mubr.msk.bf16.mxu1 %vm11885_vm1, %v11884_v21  ;;  %v8386_v5 = vmul.f32 %v11804_v50, %v13781_v45 }
 0xe7b   :  { %v8345_v8 = vpop.xlane.xlu0 %8344  ;;  %11443 = vmatprep.subr.bf16.mxu1 %v11884_v21  ;;  %11416 = vmatmul.mubr.msk.bf16.vlgmr.msra.gmra.mxu0 %vm1952_vm2, %v8399_v44  ;;  %v6435_v0 = vpop.permute.xlu1 %6434 }
 0xe7c   :  { %11426 = vmatpush3.bf16.msra.mxu0 %v8662_v16  ;;  %11427 = vmatprep.mubr.msk.bf16.mxu0 %vm11885_vm1, %v11884_v21  ;;  %11813 = vrcp.f32 %v8345_v8  ;;  %v8402_v45 = vpack.c.bf16 %v8386_v5, %v8386_v5  ;;  %v6664_v32 = vcombine.low %v13830_v57, %v6435_v0  ;;  %v6665_v50 = vcombine.high %v13830_v57, %v6435_v0 }
 0xe7d   :  { %v11806_v52 = vpop.eup %11805  ;;  %11437 = vmatprep.subr.bf16.mxu0 %v11884_v21  ;;  %11815 = vrcp.f32 %v8351_v14 }
 0xe7e   :  { %v8385_v49 = vmul.f32 %v11806_v52, %v13783_v9  ;;  %v6679_v61 = vrot.slane %v6665_v50, %v12075_v35 }
 0xe7f   :  { %v8354_v42 = vpop.xlane.xlu0 %8353  ;;  %v6443_v37 = vpop.permute.xlu1 %6442 }
 0xe80   :  { %v8401_v51 = vpack.c.bf16 %v8385_v49, %v8385_v49  ;;  %11817 = vrcp.f32 %v8354_v42 }
 0xe81   :  { %v11808_v34 = vpop.eup %11807  ;;  %11434 = vmatmul.mubr.msk.bf16.vlgmr.msra.gmra.mxu1 %vm1952_vm2, %v8402_v45 }
 0xe82   :  { %11444 = vmatpush3.bf16.msra.mxu1 %v8800_v40  ;;  %11445 = vmatprep.mubr.msk.bf16.mxu1 %vm11885_vm1, %v11884_v21  ;;  %v11810_v17 = vpop.eup %11809  ;;  %v8388_v9 = vmul.f32 %v11808_v34, %v13793_v22  ;;  %v8892_v22 = vsel %vm3380_vm3, %v8422_v30, 0 }
 0xe83   :  { %11455 = vmatprep.subr.bf16.mxu1 %v11884_v21  ;;  %11428 = vmatmul.mubr.msk.bf16.vlgmr.msra.gmra.mxu0 %vm1952_vm2, %v8401_v51  ;;  %v8387_v46 = vmul.f32 %v11810_v17, %v13787_v27  ;;  %v8846_v27 = vsel %vm3380_vm3, %v8421_v7, 0 }
 0xe84   :  { %11438 = vmatpush3.bf16.msra.mxu0 %v8754_v23  ;;  %11439 = vmatprep.mubr.msk.bf16.mxu0 %vm11885_vm1, %v11884_v21  ;;  %v8404_v55 = vpack.c.bf16 %v8388_v9, %v8388_v9 }
 0xe85   :  { %11449 = vmatprep.subr.bf16.mxu0 %v11884_v21  ;;  %v11812_v39 = vpop.eup %11811  ;;  %v8403_v20 = vpack.c.bf16 %v8387_v46, %v8387_v46 }
 0xe86   :  { %v8390_v54 = vmul.f32 %v11812_v39, %v13797_v25 }
 0xe88   :  { %v8406_v56 = vpack.c.bf16 %v8390_v54, %v8390_v54 }
 0xe89   :  { %11446 = vmatmul.mubr.msk.bf16.vlgmr.msra.gmra.mxu1 %vm1952_vm2, %v8404_v55  ;;  %v11814_v38 = vpop.eup %11813 }
 0xe8a   :  { %11456 = vmatpush3.bf16.msra.mxu1 %v8892_v22  ;;  %11457 = vmatprep.mubr.msk.bf16.mxu1 %vm11885_vm1, %v11884_v21  ;;  %v8389_v59 = vmul.f32 %v11814_v38, %v13803_v4  ;;  %v11816_v12 = vpop.eup %11815 }
 0xe8b   :  { %11467 = vmatprep.subr.bf16.mxu1 %v11884_v21  ;;  %11440 = vmatmul.mubr.msk.bf16.vlgmr.msra.gmra.mxu0 %vm1952_vm2, %v8403_v20  ;;  %v8391_v10 = vmul.f32 %v11816_v12, %v13799_v62  ;;  %v6672_v62 = vrot.slane %v6664_v32, %v12075_v35 }
 0xe8c   :  { %11450 = vmatpush3.bf16.msra.mxu0 %v8846_v27  ;;  %11451 = vmatprep.mubr.msk.bf16.mxu0 %vm11885_vm1, %v11884_v21  ;;  %v8405_v25 = vpack.c.bf16 %v8389_v59, %v8389_v59 }
 0xe8d   :  { %11461 = vmatprep.subr.bf16.mxu0 %v11884_v21  ;;  %v8407_v4 = vpack.c.bf16 %v8391_v10, %v8391_v10  ;;  %v11818_v55 = vpop.eup %11817 }
 0xe91   :  { %11458 = vmatmul.mubr.msk.bf16.vlgmr.msra.gmra.mxu1 %vm1952_vm2, %v8406_v56 }
 0xe92   :  { %11469 = vmatprep.mubr.msk.bf16.mxu1 %vm11885_vm1, %v11884_v21 }
 0xe93   :  { %11452 = vmatmul.mubr.msk.bf16.vlgmr.msra.gmra.mxu0 %vm1952_vm2, %v8405_v25  ;;  %v8392_v25 = vmul.f32 %v11818_v55, %v13809_v43 }
 0xe94   :  { %11462 = vmatpush3.bf16.msra.mxu0 %v8938_v63  ;;  %11463 = vmatprep.mubr.msk.bf16.mxu0 %vm11885_vm1, %v11884_v21 }
 0xe95   :  { %11473 = vmatprep.subr.bf16.mxu0 %v11884_v21 }
 0xe9b   :  { %11464 = vmatmul.mubr.msk.bf16.vlgmr.msra.gmra.mxu0 %vm1952_vm2, %v8407_v4 }
 0xe9c   :  { %11475 = vmatprep.mubr.msk.bf16.mxu0 %vm11885_vm1, %v11884_v21 }
 0xeac   :  { %v8357_v15 = vpop.xlane.xlu0 %8356 }
 0xead   :  { %11819 = vrcp.f32 %v8357_v15  ;;  %v8408_v15 = vpack.c.bf16 %v8392_v25, %v8392_v25 }
 0xeb0   :  { %v6427_v18 = vpop.permute.xlu0 %6426  ;;  %v8363_v45 = vpop.xlane.xlu1 %8362 }
 0xeb1   :  { %v6680_v48 = vcombine.low %v6427_v18, %v6443_v37  ;;  %v6681_v3 = vcombine.high %v6427_v18, %v6443_v37  ;;  %11821 = vrcp.f32 %v8363_v45 }
 0xeb3   :  { %v6688_v44 = vrot.slane %v6680_v48, %v12075_v35  ;;  %v6695_v8 = vrot.slane %v6681_v3, %v12075_v35 }
 0xeb5   :  { %v6696_v5 = vcombine.low %v6672_v62, %v6688_v44  ;;  %v6697_v52 = vcombine.high %v6672_v62, %v6688_v44  ;;  %v6712_v16 = vcombine.low %v6679_v61, %v6695_v8  ;;  %v6713_v24 = vcombine.high %v6679_v61, %v6695_v8 }
 0xeb7   :  { %v6704_v57 = vrot.slane %v6696_v5, %v12094_v47  ;;  %v6711_v2 = vrot.slane %v6697_v52, %v12094_v47  ;;  %v6720_v11 = vrot.slane %v6712_v16, %v12094_v47  ;;  %v6727_v49 = vrot.slane %v6713_v24, %v12094_v47 }
 0xeb9   :  { %v6936_v34 = vcombine.low %v6704_v57, %v6711_v2  ;;  %v10798_v19 = vcombine.high %v6704_v57, %v6711_v2  ;;  %v6952_v40 = vcombine.low %v6720_v11, %v6727_v49  ;;  %v10799_v6 = vcombine.high %v6720_v11, %v6727_v49 }
 0xeba   :  { %v11820_v38 = vpop.eup %11819 }
 0xebb   :  { %v6943_v51 = vrot.slane %v6936_v34, %v12075_v35  ;;  %v6951_v17 = vrot.slane %v10798_v19, %v12075_v35  ;;  %v6959_v14 = vrot.slane %v6952_v40, %v12075_v35  ;;  %v6967_v9 = vrot.slane %v10799_v6, %v12075_v35 }
 0xebc   :  { %v8393_v12 = vmul.f32 %v11820_v38, %v13819_v13 }
 0xebd   :  { %v6968_v23 = vcombine.low %v6943_v51, %v6951_v17  ;;  %v6984_v33 = vcombine.low %v6959_v14, %v6967_v9  ;;  %v6969_v30 = vcombine.high %v6943_v51, %v6951_v17  ;;  %v6985_v46 = vcombine.high %v6959_v14, %v6967_v9 }
 0xebe   :  { %v11822_v0 = vpop.eup %11821  ;;  %v8409_v32 = vpack.c.bf16 %v8393_v12, %v8393_v12 }
 0xebf   :  { %v6976_v39 = vrot.slane %v6968_v23, %v12094_v47  ;;  %v6992_v7 = vrot.slane %v6984_v33, %v12094_v47  ;;  %v6983_v22 = vrot.slane %v6969_v30, %v12094_v47  ;;  %v6999_v20 = vrot.slane %v6985_v46, %v12094_v47 }
 0xec0   :  { %v8395_v50 = vmul.f32 %v11822_v0, %v13823_v53 }
 0xec1   :  { %v7000_v54 = vcombine.low %v6976_v39, %v6992_v7  ;;  %v7001_v27 = vcombine.high %v6976_v39, %v6992_v7  ;;  %v7002_v26 = vcombine.low %v6983_v22, %v6999_v20  ;;  %v7003_v59 = vcombine.high %v6983_v22, %v6999_v20 }
 0xec2   :  { %v8411_v37 = vpack.c.bf16 %v8395_v50, %v8395_v50 }
 0xec3   :  { %v8424_v56 = vpack.c.bf16 %v7000_v54, %v7000_v54  ;;  %v8425_v1 = vpack.c.bf16 %v7001_v27, %v7001_v27  ;;  %v8426_v4 = vpack.c.bf16 %v7002_v26, %v7002_v26  ;;  %v8427_v42 = vpack.c.bf16 %v7003_v59, %v7003_v59 }
 0xec5   :  { %v8984_v63 = vsel %vm3380_vm3, %v8424_v56, 0  ;;  %v9030_v10 = vsel %vm3380_vm3, %v8425_v1, 0  ;;  %v9076_v43 = vsel %vm3380_vm3, %v8426_v4, 0  ;;  %v9122_v13 = vsel %vm3380_vm3, %v8427_v42, 0 }
 0xec6   :  { %11468 = vmatpush3.bf16.msra.mxu1 %v8984_v63  ;;  %11474 = vmatpush3.bf16.msra.mxu0 %v9030_v10 }
 0xec7   :  { %11479 = vmatprep.subr.bf16.mxu1 %v11884_v21  ;;  %11485 = vmatprep.subr.bf16.mxu0 %v11884_v21 }
 0xec9   :  { %11470 = vmatmul.mubr.msk.bf16.vlgmr.msra.gmra.mxu1 %vm1952_vm2, %v8408_v15  ;;  %11476 = vmatmul.mubr.msk.bf16.vlgmr.msra.gmra.mxu0 %vm1952_vm2, %v8409_v32 }
 0xeca   :  { %11480 = vmatpush3.bf16.msra.mxu1 %v9076_v43  ;;  %11486 = vmatpush3.bf16.msra.mxu0 %v9122_v13 }
 0xecb   :  { %11487 = vmatprep.mubr.msk.bf16.mxu0 %vm11885_vm1, %v11884_v21  ;;  %11481 = vmatprep.mubr.msk.bf16.mxu1 %vm11885_vm1, %v11884_v21 }
 0xed1   :  { %11488 = vmatmul.mubr.msk.bf16.vlgmr.msra.gmra.mxu0 %vm1952_vm2, %v8411_v37 }
 0xee1   :  { %v8360_v18 = vpop.xlane.xlu0 %8359 }
 0xee2   :  { %11823 = vrcp.f32 %v8360_v18 }
 0xeef   :  { %v11824_v48 = vpop.eup %11823 }
 0xef0   :  { %v8394_v3 = vmul.f32 %v11824_v48, %v13832_v60 }
 0xef2   :  { %v8410_v62 = vpack.c.bf16 %v8394_v3, %v8394_v3 }
 0xef4   :  { %11482 = vmatmul.mubr.msk.bf16.vlgmr.msra.gmra.mxu1 %vm1952_vm2, %v8410_v62 }
 0xf26   :  { %v8468_v61 = vpop.f32.mrf.mxu1 }
 0xf28   :  { %v11399_v44 = vpop.f32.mrf.mxu1 }
 0xf2a   :  { %v8471_v8 = vpop.f32.mrf.mxu1 }
 0xf2c   :  { %v11400_v5 = vpop.f32.mrf.mxu1 }
 0xf2f   :  { %v8560_v52 = vpop.f32.mrf.mxu1 }
 0xf30   :  { %v9164_v34 = vcombine.low %v8468_v61, %v8560_v52  ;;  %v9165_v19 = vcombine.high %v8468_v61, %v8560_v52 }
 0xf31   :  { %v11411_v53 = vpop.f32.mrf.mxu1 }
 0xf32   :  { %v9172_v9 = vrot.slane %v9164_v34, %v12075_v35  ;;  %v9179_v23 = vrot.slane %v9165_v19, %v12075_v35 }
 0xf33   :  { %v8514_v16 = vpop.f32.mrf.mxu0  ;;  %v8563_v24 = vpop.f32.mrf.mxu1 }
 0xf35   :  { %v11405_v57 = vpop.f32.mrf.mxu0  ;;  %v11412_v2 = vpop.f32.mrf.mxu1 }
 0xf37   :  { %v8517_v11 = vpop.f32.mrf.mxu0 }
 0xf39   :  { %v8652_v49 = vpop.f32.mrf.mxu1  ;;  %v11406_v45 = vpop.f32.mrf.mxu0 }
 0xf3b   :  { %v11423_v40 = vpop.f32.mrf.mxu1  ;;  %v8606_v60 = vpop.f32.mrf.mxu0 }
 0xf3c   :  { %v9180_v6 = vcombine.low %v8514_v16, %v8606_v60  ;;  %v9181_v51 = vcombine.high %v8514_v16, %v8606_v60 }
 0xf3d   :  { %v8655_v17 = vpop.f32.mrf.mxu1  ;;  %v11417_v14 = vpop.f32.mrf.mxu0 }
 0xf3e   :  { %v9188_v33 = vrot.slane %v9180_v6, %v12075_v35  ;;  %v9195_v30 = vrot.slane %v9181_v51, %v12075_v35 }
 0xf3f   :  { %v11424_v46 = vpop.f32.mrf.mxu1  ;;  %v8609_v55 = vpop.f32.mrf.mxu0 }
 0xf40   :  { %v9196_v39 = vcombine.low %v9172_v9, %v9188_v33  ;;  %v9197_v7 = vcombine.high %v9172_v9, %v9188_v33  ;;  %v9212_v22 = vcombine.low %v9179_v23, %v9195_v30  ;;  %v9213_v20 = vcombine.high %v9179_v23, %v9195_v30 }
 0xf41   :  { %v8744_v38 = vpop.f32.mrf.mxu1  ;;  %v11418_v54 = vpop.f32.mrf.mxu0 }
 0xf42   :  { %v9204_v27 = vrot.slane %v9196_v39, %v12094_v47  ;;  %v9211_v26 = vrot.slane %v9197_v7, %v12094_v47  ;;  %v9220_v59 = vrot.slane %v9212_v22, %v12094_v47  ;;  %v9227_v56 = vrot.slane %v9213_v20, %v12094_v47 }
 0xf43   :  { %v11435_v1 = vpop.f32.mrf.mxu1  ;;  %v8698_v25 = vpop.f32.mrf.mxu0  ;;  %v9232_v61 = vcombine.low %v8652_v49, %v8744_v38  ;;  %v9233_v44 = vcombine.high %v8652_v49, %v8744_v38 }
 0xf44   :  { %v9436_v12 = vcombine.low %v9204_v27, %v9211_v26  ;;  %v10848_v63 = vcombine.high %v9204_v27, %v9211_v26  ;;  %v9452_v10 = vcombine.low %v9220_v59, %v9227_v56  ;;  %v10849_v4 = vcombine.high %v9220_v59, %v9227_v56 }
 0xf45   :  { %v8747_v42 = vpop.f32.mrf.mxu1  ;;  %v11429_v0 = vpop.f32.mrf.mxu0  ;;  %v9240_v45 = vrot.slane %v9232_v61, %v12075_v35  ;;  %v9247_v34 = vrot.slane %v9233_v44, %v12075_v35 }
 0xf46   :  { %v13979_v15 = vrot.slane %v9436_v12, %v12075_v35  ;;  %v13982_v32 = vrot.slane %v10848_v63, %v12075_v35  ;;  %v13985_v43 = vrot.slane %v9452_v10, %v12075_v35  ;;  %v13988_v13 = vrot.slane %v10849_v4, %v12075_v35 }
 0xf47   :  { %v11436_v50 = vpop.f32.mrf.mxu1  ;;  %v8701_v37 = vpop.f32.mrf.mxu0 }
 0xf48   :  { %v9468_v48 = vcombine.low %v13979_v15, %v13982_v32  ;;  %v9484_v3 = vcombine.low %v13985_v43, %v13988_v13  ;;  %v9469_v42 = vcombine.high %v13979_v15, %v13982_v32  ;;  %v9485_v0 = vcombine.high %v13985_v43, %v13988_v13 }
 0xf49   :  { %v13990_v18 = vpop.f32.mrf.mxu1  ;;  %v11430_v62 = vpop.f32.mrf.mxu0 }
 0xf4a   :  { %v13997_v5 = vrot.slane %v9468_v48, %v12094_v47  ;;  %v14000_v52 = vrot.slane %v9484_v3, %v12094_v47  ;;  %v9483_v15 = vrot.slane %v9469_v42, %v12094_v47  ;;  %v9499_v32 = vrot.slane %v9485_v0, %v12094_v47 }
 0xf4b   :  { %v11447_v8 = vpop.f32.mrf.mxu1  ;;  %v8790_v53 = vpop.f32.mrf.mxu0 }
 0xf4c   :  { %v9248_v16 = vcombine.low %v8698_v25, %v8790_v53  ;;  %v9249_v24 = vcombine.high %v8698_v25, %v8790_v53  ;;  %v9500_v11 = vcombine.low %v13997_v5, %v14000_v52 }
 0xf4d   :  { %v8839_v57 = vpop.f32.mrf.mxu1  ;;  %v11441_v2 = vpop.f32.mrf.mxu0 }
 0xf4e   :  { %v9256_v49 = vrot.slane %v9248_v16, %v12075_v35  ;;  %v9263_v19 = vrot.slane %v9249_v24, %v12075_v35  ;;  %v9501_v16 = vcombine.high %v13997_v5, %v14000_v52 }
 0xf4f   :  { %v11448_v40 = vpop.f32.mrf.mxu1  ;;  %v8793_v60 = vpop.f32.mrf.mxu0 }
 0xf50   :  { %v9264_v6 = vcombine.low %v9240_v45, %v9256_v49  ;;  %v9265_v51 = vcombine.high %v9240_v45, %v9256_v49  ;;  %v9280_v17 = vcombine.low %v9247_v34, %v9263_v19  ;;  %v9281_v14 = vcombine.high %v9247_v34, %v9263_v19 }
 0xf51   :  { %v8928_v9 = vpop.f32.mrf.mxu1  ;;  %v11442_v23 = vpop.f32.mrf.mxu0 }
 0xf52   :  { %v9300_v33 = vcombine.low %v13990_v18, %v8928_v9  ;;  %v9301_v30 = vcombine.high %v13990_v18, %v8928_v9  ;;  %v9272_v46 = vrot.slane %v9264_v6, %v12094_v47  ;;  %v9279_v55 = vrot.slane %v9265_v51, %v12094_v47 }
 0xf53   :  { %v9288_v39 = vrot.slane %v9280_v17, %v12094_v47  ;;  %v9295_v7 = vrot.slane %v9281_v14, %v12094_v47  ;;  %v11459_v22 = vpop.f32.mrf.mxu1  ;;  %v8882_v20 = vpop.f32.mrf.mxu0  ;;  %v9502_v51 = vcombine.low %v9483_v15, %v9499_v32 }
 0xf54   :  { %v9504_v38 = vcombine.low %v9272_v46, %v9279_v55  ;;  %v10850_v54 = vcombine.high %v9272_v46, %v9279_v55  ;;  %v9308_v57 = vrot.slane %v9300_v33, %v12075_v35  ;;  %v9315_v49 = vrot.slane %v9301_v30, %v12075_v35 }
 0xf55   :  { %v9520_v27 = vcombine.low %v9288_v39, %v9295_v7  ;;  %v10851_v26 = vcombine.high %v9288_v39, %v9295_v7  ;;  %v8931_v59 = vpop.f32.mrf.mxu1  ;;  %v11453_v56 = vpop.f32.mrf.mxu0 }
 0xf56   :  { %v9511_v1 = vrot.slane %v9504_v38, %v12075_v35  ;;  %v9519_v25 = vrot.slane %v10850_v54, %v12075_v35 }
 0xf57   :  { %v9527_v12 = vrot.slane %v9520_v27, %v12075_v35  ;;  %v9535_v63 = vrot.slane %v10851_v26, %v12075_v35  ;;  %v11460_v10 = vpop.f32.mrf.mxu1  ;;  %v8885_v4 = vpop.f32.mrf.mxu0 }
 0xf58   :  { %v9536_v50 = vcombine.low %v9511_v1, %v9519_v25  ;;  %v9537_v18 = vcombine.high %v9511_v1, %v9519_v25 }
 0xf59   :  { %v9552_v37 = vcombine.low %v9527_v12, %v9535_v63  ;;  %v9553_v48 = vcombine.high %v9527_v12, %v9535_v63  ;;  %v11454_v3 = vpop.f32.mrf.mxu0 }
 0xf5a   :  { %v14023_v62 = vrot.slane %v9536_v50, %v12094_v47  ;;  %v9551_v44 = vrot.slane %v9537_v18, %v12094_v47 }
 0xf5b   :  { %v14026_v61 = vrot.slane %v9552_v37, %v12094_v47  ;;  %v9567_v8 = vrot.slane %v9553_v48, %v12094_v47  ;;  %v8974_v53 = vpop.f32.mrf.mxu0 }
 0xf5c   :  { %v9316_v43 = vcombine.low %v8882_v20, %v8974_v53  ;;  %v9317_v13 = vcombine.high %v8882_v20, %v8974_v53  ;;  %v9503_v20 = vcombine.high %v9483_v15, %v9499_v32 }
 0xf5d   :  { %v9569_v24 = vcombine.high %v14023_v62, %v14026_v61  ;;  %v11465_v2 = vpop.f32.mrf.mxu0  ;;  %v9570_v45 = vcombine.low %v9551_v44, %v9567_v8  ;;  %v9568_v34 = vcombine.low %v14023_v62, %v14026_v61  ;;  %v9571_v55 = vcombine.high %v9551_v44, %v9567_v8 }
 0xf5e   :  { %v9324_v19 = vrot.slane %v9316_v43, %v12075_v35  ;;  %v9331_v40 = vrot.slane %v9317_v13, %v12075_v35 }
 0xf5f   :  { %v11606_v60 = vpack.i.bf16 %v9569_v24, %v9501_v16  ;;  %v8977_v6 = vpop.f32.mrf.mxu0  ;;  %v11611_v46 = vpack.i.bf16 %v9570_v45, %v9502_v51  ;;  %v11616_v59 = vpack.i.bf16 %v9571_v55, %v9503_v20 }
 0xf60   :  { %v9332_v17 = vcombine.low %v9308_v57, %v9324_v19  ;;  %v9333_v14 = vcombine.high %v9308_v57, %v9324_v19  ;;  %v9348_v9 = vcombine.low %v9315_v49, %v9331_v40  ;;  %v9349_v23 = vcombine.high %v9315_v49, %v9331_v40 }
 0xf61   :  { %11607 = vrot.lane.b32.xlu0 %v11606_v60, %s11890_s26  ;;  %v11466_v33 = vpop.f32.mrf.mxu0 }
 0xf62   :  { %v9340_v39 = vrot.slane %v9332_v17, %v12094_v47  ;;  %v9347_v30 = vrot.slane %v9333_v14, %v12094_v47  ;;  %v9356_v7 = vrot.slane %v9348_v9, %v12094_v47  ;;  %v9363_v22 = vrot.slane %v9349_v23, %v12094_v47 }
 0xf64   :  { %v9572_v38 = vcombine.low %v9340_v39, %v9347_v30  ;;  %v10852_v54 = vcombine.high %v9340_v39, %v9347_v30  ;;  %v9588_v27 = vcombine.low %v9356_v7, %v9363_v22  ;;  %v10853_v26 = vcombine.high %v9356_v7, %v9363_v22 }
 0xf65   :  { %11612 = vrot.lane.b32.xlu0 %v11611_v46, %s11891_s27 }
 0xf66   :  { %v9579_v56 = vrot.slane %v9572_v38, %v12075_v35  ;;  %v9587_v1 = vrot.slane %v10852_v54, %v12075_v35  ;;  %v9595_v25 = vrot.slane %v9588_v27, %v12075_v35  ;;  %v9603_v12 = vrot.slane %v10853_v26, %v12075_v35 }
 0xf68   :  { %v9604_v63 = vcombine.low %v9579_v56, %v9587_v1  ;;  %v9620_v10 = vcombine.low %v9595_v25, %v9603_v12  ;;  %v9605_v4 = vcombine.high %v9579_v56, %v9587_v1  ;;  %v9621_v42 = vcombine.high %v9595_v25, %v9603_v12 }
 0xf69   :  { %11617 = vrot.lane.b32.xlu0 %v11616_v59, %s11892_s28 }
 0xf6a   :  { %v14054_v0 = vrot.slane %v9604_v63, %v12094_v47  ;;  %v14057_v50 = vrot.slane %v9620_v10, %v12094_v47  ;;  %v14060_v37 = vrot.slane %v9605_v4, %v12094_v47  ;;  %v14063_v18 = vrot.slane %v9621_v42, %v12094_v47 }
 0xf6c   :  { %v9637_v48 = vcombine.high %v14054_v0, %v14057_v50  ;;  %v9638_v3 = vcombine.low %v14060_v37, %v14063_v18  ;;  %v9639_v44 = vcombine.high %v14060_v37, %v14063_v18  ;;  %v9636_v8 = vcombine.low %v14054_v0, %v14057_v50  ;;  %v10860_v0 = vld [vmem:[%s14309_s6 + $0x9] ss:$0 sm:$0xff] }
 0xf89   :  { %v9020_v53 = vpop.f32.mrf.mxu1  ;;  %v9066_v15 = vpop.f32.mrf.mxu0 }
 0xf8b   :  { %v11471_v32 = vpop.f32.mrf.mxu1  ;;  %v11477_v43 = vpop.f32.mrf.mxu0 }
 0xf8c   :  { %v11650_v43 = vld [vmem:[%s14306_s3 + $0x18] sm:$0xff]  }
 0xf8d   :  { %v9023_v13 = vpop.f32.mrf.mxu1  ;;  %v9069_v16 = vpop.f32.mrf.mxu0  ;;  %11491 = vmatprep.subr.bf16.mxu1 %v11650_v43 }
 0xf8e   :  { %11492 = vmatpush3.bf16.msra.mxu1 %v11650_v43 }
 0xf8f   :  { %v11472_v24 = vpop.f32.mrf.mxu1  ;;  %v11478_v57 = vpop.f32.mrf.mxu0 }
 0xf91   :  { %v9158_v2 = vpop.f32.mrf.mxu0 }
 0xf92   :  { %v9384_v40 = vcombine.low %v9066_v15, %v9158_v2  ;;  %v9385_v60 = vcombine.high %v9066_v15, %v9158_v2 }
 0xf93   :  { %v11489_v45 = vpop.f32.mrf.mxu0 }
 0xf94   :  { %v9392_v9 = vrot.slane %v9384_v40, %v12075_v35  ;;  %v9399_v23 = vrot.slane %v9385_v60, %v12075_v35 }
 0xf95   :  { %v9161_v49 = vpop.f32.mrf.mxu0 }
 0xf97   :  { %v11490_v19 = vpop.f32.mrf.mxu0 }
 0xfb4   :  { %v9112_v6 = vpop.f32.mrf.mxu1 }
 0xfb5   :  { %v9368_v51 = vcombine.low %v9020_v53, %v9112_v6  ;;  %v9369_v17 = vcombine.high %v9020_v53, %v9112_v6 }
 0xfb6   :  { %v11483_v14 = vpop.f32.mrf.mxu1 }
 0xfb7   :  { %v9376_v33 = vrot.slane %v9368_v51, %v12075_v35  ;;  %v9383_v46 = vrot.slane %v9369_v17, %v12075_v35 }
 0xfb8   :  { %v9115_v55 = vpop.f32.mrf.mxu1 }
 0xfb9   :  { %v9400_v39 = vcombine.low %v9376_v33, %v9392_v9  ;;  %v9401_v30 = vcombine.high %v9376_v33, %v9392_v9  ;;  %v9416_v7 = vcombine.low %v9383_v46, %v9399_v23  ;;  %v9417_v22 = vcombine.high %v9383_v46, %v9399_v23 }
 0xfba   :  { %v11484_v20 = vpop.f32.mrf.mxu1 }
 0xfbb   :  { %v9408_v38 = vrot.slane %v9400_v39, %v12094_v47  ;;  %v9415_v54 = vrot.slane %v9401_v30, %v12094_v47  ;;  %v9424_v27 = vrot.slane %v9416_v7, %v12094_v47  ;;  %v9431_v26 = vrot.slane %v9417_v22, %v12094_v47 }
 0xfbd   :  { %v9640_v59 = vcombine.low %v9408_v38, %v9415_v54  ;;  %v10854_v56 = vcombine.high %v9408_v38, %v9415_v54  ;;  %v9656_v1 = vcombine.low %v9424_v27, %v9431_v26  ;;  %v10855_v25 = vcombine.high %v9424_v27, %v9431_v26 }
 0xfbf   :  { %v9647_v12 = vrot.slane %v9640_v59, %v12075_v35  ;;  %v9655_v63 = vrot.slane %v10854_v56, %v12075_v35  ;;  %v9663_v10 = vrot.slane %v9656_v1, %v12075_v35  ;;  %v9671_v4 = vrot.slane %v10855_v25, %v12075_v35  ;;  %v11651_v35 = vld [vmem:[%s14306_s3 + $0x10] sm:$0xff]  }
 0xfc0   :  { %11493 = vmatprep.subr.bf16.mxu1 %v11651_v35 }
 0xfc1   :  { %v9672_v42 = vcombine.low %v9647_v12, %v9655_v63  ;;  %v9688_v53 = vcombine.low %v9663_v10, %v9671_v4  ;;  %v9673_v15 = vcombine.high %v9647_v12, %v9655_v63  ;;  %v9689_v32 = vcombine.high %v9663_v10, %v9671_v4  ;;  %11494 = vmatpush3.bf16.msra.mxu1 %v11651_v35 }
 0xfc3   :  { %v9680_v13 = vrot.slane %v9672_v42, %v12094_v47  ;;  %v9696_v16 = vrot.slane %v9688_v53, %v12094_v47  ;;  %v9687_v24 = vrot.slane %v9673_v15, %v12094_v47  ;;  %v9703_v57 = vrot.slane %v9689_v32, %v12094_v47 }
 0xfc5   :  { %v9705_v2 = vcombine.high %v9680_v13, %v9696_v16  ;;  %v9704_v45 = vcombine.low %v9680_v13, %v9696_v16  ;;  %v9706_v19 = vcombine.low %v9687_v24, %v9703_v57  ;;  %v9707_v60 = vcombine.high %v9687_v24, %v9703_v57 }
 0xfc7   :  { %v11621_v49 = vpack.i.bf16 %v9705_v2, %v9637_v48  ;;  %v11626_v40 = vpack.i.bf16 %v9706_v19, %v9638_v3  ;;  %v11631_v47 = vpack.i.bf16 %v9707_v60, %v9639_v44 }
 0xfc9   :  { %11622 = vrot.lane.b32.xlu1 %v11621_v49, %s11890_s26 }
 0xfcd   :  { %11627 = vrot.lane.b32.xlu1 %v11626_v40, %s11891_s27 }
 0xfd1   :  { %11632 = vrot.lane.b32.xlu1 %v11631_v47, %s11892_s28 }
 0xfd3   :  { %v11608_v6 = vpop.permute.xlu0 %11607 }
 0xfd4   :  { %v11610_v17 = vunpack.i.h.bf16 %v11608_v6  ;;  %v11609_v14 = vunpack.i.l.bf16 %v11608_v6 }
 0xfd6   :  { %v9756_v3 = vsel %vm1952_vm2, %v9500_v11, %v11609_v14  ;;  %v9757_v37 = vsel %vm1952_vm2, %v9568_v34, %v11610_v17 }
 0xfd7   :  { %v11613_v51 = vpop.permute.xlu0 %11612 }
 0xfd8   :  { %v11615_v48 = vunpack.i.h.bf16 %v11613_v51  ;;  %v11614_v9 = vunpack.i.l.bf16 %v11613_v51 }
 0xfda   :  { %v9760_v33 = vsel %vm4710_vm4, %v9756_v3, %v11614_v9  ;;  %v9761_v46 = vsel %vm4710_vm4, %v9757_v37, %v11615_v48  ;;  %v11652_v37 = vld [vmem:[%s14307_s4 + $0x18] sm:$0xff]  }
 0xfdb   :  { %v11618_v23 = vpop.permute.xlu0 %11617  ;;  %11499 = vmatprep.subr.bf16.mxu0 %v11652_v37 }
 0xfdc   :  { %v11620_v18 = vunpack.i.h.bf16 %v11618_v23  ;;  %v11619_v44 = vunpack.i.l.bf16 %v11618_v23  ;;  %11500 = vmatpush3.bf16.msra.mxu0 %v11652_v37 }
 0xfde   :  { %v9764_v55 = vsel %vm4715_vm5, %v9760_v33, %v11619_v44  ;;  %v9765_v39 = vsel %vm4715_vm5, %v9761_v46, %v11620_v18  ;;  %v11653_v18 = vld [vmem:[%s14307_s4 + $0x10] sm:$0xff]  }
 0xfdf   :  { %v9768_v30 = vpack.c.bf16 %v9765_v39, %v9764_v55  ;;  %11501 = vmatprep.subr.bf16.mxu0 %v11653_v18 }
 0xfe0   :  { %11502 = vmatpush3.bf16.msra.mxu0 %v11653_v18 }
 0xfe1   :  { %11495 = vmatprep.mubr.msk.bf16.mxu1 %vm108_vm0, %v9768_v30  ;;  %11519 = vmatprep.subr.bf16.mxu0 %v11884_v21 }
0x103b   :  { %v11623_v5 = vpop.permute.xlu1 %11622 }
0x103c   :  { %v11625_v11 = vunpack.i.h.bf16 %v11623_v5  ;;  %v11624_v7 = vunpack.i.l.bf16 %v11623_v5 }
0x103e   :  { %v9758_v22 = vsel %vm1952_vm2, %v9636_v8, %v11624_v7  ;;  %v9759_v20 = vsel %vm1952_vm2, %v9704_v45, %v11625_v11 }
0x103f   :  { %v11628_v52 = vpop.permute.xlu1 %11627 }
0x1040   :  { %v11630_v62 = vunpack.i.h.bf16 %v11628_v52  ;;  %v11629_v61 = vunpack.i.l.bf16 %v11628_v52 }
0x1042   :  { %v9762_v27 = vsel %vm4710_vm4, %v9758_v22, %v11629_v61  ;;  %v9763_v26 = vsel %vm4710_vm4, %v9759_v20, %v11630_v62  ;;  %v10865_v20 = vld [vmem:[%s14309_s6 + $0xa] ss:$0 sm:$0xff] }
0x1043   :  { %v11633_v34 = vpop.permute.xlu1 %11632 }
0x1044   :  { %v11635_v38 = vunpack.i.h.bf16 %v11633_v34  ;;  %v11634_v54 = vunpack.i.l.bf16 %v11633_v34 }
0x1046   :  { %v9766_v59 = vsel %vm4715_vm5, %v9762_v27, %v11634_v54  ;;  %v9767_v56 = vsel %vm4715_vm5, %v9763_v26, %v11635_v38 }
0x1047   :  { %v9769_v1 = vpack.c.bf16 %v9767_v56, %v9766_v59  ;;  %v10866_v56 = vld [vmem:[%s14309_s6 + $0xb] ss:$0 sm:$0xff] }
0x1049   :  { %11496 = vmatmul.mubr.msk.bf16.vlgmr.msra.gmra.mxu1 %vm108_vm0, %v9769_v1 }
0x1109   :  { %v11497_v25 = vpop.f32.mrf.mxu1 }
0x110a   :  { %v9840_v8 = vadd.f32 %v11497_v25, %v10860_v0 }
0x110b   :  { %v9831_v50 = vpop.f32.mrf.mxu1 }
0x110c   :  { %v9832_v12 = vadd.f32 %v10860_v0, %v9831_v50  ;;  %v9848_v42 = vadd.f32 %v9840_v8, %v13142_v41 }
0x110d   :  { %v11498_v63 = vpop.f32.mrf.mxu1 }
0x110e   :  { %v9846_v10 = vadd.f32 %v9832_v12, %v13135_v28  ;;  %v9843_v53 = vadd.f32 %v11498_v63, %v10860_v0  ;;  %v9856_v24 = vsel %vm108_vm0, %v9848_v42, 0.0 }
0x110f   :  { %v9834_v4 = vpop.f32.mrf.mxu1 }
0x1110   :  { %v9835_v15 = vadd.f32 %v10860_v0, %v9834_v4  ;;  %v9850_v32 = vsel %vm108_vm0, %v9846_v10, 0.0  ;;  %v9849_v13 = vadd.f32 %v9843_v53, %v13144_v58 }
0x1111   :  { %9851 = vadd.xlane.f32.xlu0 %v9850_v32  ;;  %v11655_v32 = vld [vmem:[%s14308_s5 + $0x30] sm:$0xff]  }
0x1112   :  { %v9847_v43 = vadd.f32 %v9835_v15, %v13137_v31  ;;  %v9859_v28 = vsel %vm108_vm0, %v9849_v13, 0.0  ;;  %v11654_v15 = vld [vmem:[%s14308_s5 + $0x38] sm:$0xff]  }
0x1113   :  { %11507 = vmatprep.subr.bf16.mxu1 %v11654_v15 }
0x1114   :  { %v9853_v16 = vsel %vm108_vm0, %v9847_v43, 0.0  ;;  %11508 = vmatpush3.bf16.msra.mxu1 %v11654_v15 }
0x1115   :  { %9854 = vadd.xlane.f32.xlu1 %v9853_v16  ;;  %9857 = vadd.xlane.f32.xlu0 %v9856_v24  ;;  %v10871_v16 = vld [vmem:[%s14309_s6 + $0xc] ss:$0 sm:$0xff] }
0x1116   :  { %11509 = vmatprep.subr.bf16.mxu1 %v11655_v32 }
0x1118   :  { %11510 = vmatpush3.bf16.msra.mxu1 %v11655_v32 }
0x1119   :  { %9860 = vadd.xlane.f32.xlu0 %v9859_v28 }
0x119a   :  { %v9852_v57 = vpop.xlane.xlu0 %9851 }
0x119b   :  { %v9862_v41 = vmul.f32 0.03125, %v9852_v57 }
0x119d   :  { %v9866_v2 = vsub.f32 %v9846_v10, %v9862_v41 }
0x119e   :  { %v9855_v45 = vpop.xlane.xlu1 %9854  ;;  %v9858_v35 = vpop.xlane.xlu0 %9857 }
0x119f   :  { %v9863_v49 = vmul.f32 0.03125, %v9855_v45  ;;  %v9864_v19 = vmul.f32 0.03125, %v9858_v35  ;;  %v9870_v40 = vmul.f32 %v9866_v2, %v9866_v2 }
0x11a1   :  { %v9867_v31 = vsub.f32 %v9847_v43, %v9863_v49  ;;  %v9868_v60 = vsub.f32 %v9848_v42, %v9864_v19  ;;  %v9874_v58 = vsel %vm108_vm0, %v9870_v40, 0.0  ;;  %v11656_v43 = vld [vmem:[%s14308_s5 + $0x28] sm:$0xff]  }
0x11a2   :  { %9875 = vadd.xlane.f32.xlu1 %v9874_v58  ;;  %v9861_v47 = vpop.xlane.xlu0 %9860  ;;  %11511 = vmatprep.subr.bf16.mxu1 %v11656_v43 }
0x11a3   :  { %v9865_v6 = vmul.f32 0.03125, %v9861_v47  ;;  %v9871_v51 = vmul.f32 %v9867_v31, %v9867_v31  ;;  %v9872_v17 = vmul.f32 %v9868_v60, %v9868_v60  ;;  %11512 = vmatpush3.bf16.msra.mxu1 %v11656_v43 }
0x11a5   :  { %v9869_v14 = vsub.f32 %v9849_v13, %v9865_v6  ;;  %v9877_v48 = vsel %vm108_vm0, %v9871_v51, 0.0  ;;  %v9880_v9 = vsel %vm108_vm0, %v9872_v17, 0.0  ;;  %v11657_v13 = vld [vmem:[%s14308_s5 + $0x20] sm:$0xff]  }
0x11a6   :  { %9878 = vadd.xlane.f32.xlu0 %v9877_v48  ;;  %9881 = vadd.xlane.f32.xlu1 %v9880_v9 }
0x11a7   :  { %v9873_v23 = vmul.f32 %v9869_v14, %v9869_v14  ;;  %11513 = vmatprep.subr.bf16.mxu1 %v11657_v13 }
0x11a8   :  { %11514 = vmatpush3.bf16.msra.mxu1 %v11657_v13 }
0x11a9   :  { %v9883_v3 = vsel %vm108_vm0, %v9873_v23, 0.0  ;;  %11531 = vmatprep.subr.bf16.mxu1 %v11884_v21 }
0x11aa   :  { %9884 = vadd.xlane.f32.xlu0 %v9883_v3 }
0x122b   :  { %v9876_v44 = vpop.xlane.xlu1 %9875 }
0x122c   :  { %v9886_v33 = vmul.f32 0.03125, %v9876_v44 }
0x122e   :  { %v9890_v46 = vadd.f32 1e-05, %v9886_v33 }
0x122f   :  { %v9882_v55 = vpop.xlane.xlu1 %9881  ;;  %v9879_v39 = vpop.xlane.xlu0 %9878 }
0x1230   :  { %11825 = vrsqrt.f32 %v9890_v46  ;;  %v9888_v30 = vmul.f32 0.03125, %v9882_v55  ;;  %v9887_v5 = vmul.f32 0.03125, %v9879_v39 }
0x1232   :  { %v9892_v52 = vadd.f32 1e-05, %v9888_v30  ;;  %v9891_v11 = vadd.f32 1e-05, %v9887_v5 }
0x1233   :  { %v9885_v7 = vpop.xlane.xlu0 %9884 }
0x1234   :  { %11827 = vrsqrt.f32 %v9892_v52  ;;  %v9889_v62 = vmul.f32 0.03125, %v9885_v7 }
0x1235   :  { %11829 = vrsqrt.f32 %v9891_v11 }
0x1236   :  { %v9893_v61 = vadd.f32 1e-05, %v9889_v62 }
0x1238   :  { %11831 = vrsqrt.f32 %v9893_v61 }
0x123d   :  { %v11826_v34 = vpop.eup %11825 }
0x123e   :  { %v9898_v22 = vmul.f32 %v11826_v34, %v9866_v2 }
0x1240   :  { %v9906_v59 = vmul.f32 %v10865_v20, %v9898_v22 }
0x1241   :  { %v11828_v38 = vpop.eup %11827 }
0x1242   :  { %v11830_v54 = vpop.eup %11829  ;;  %v9900_v27 = vmul.f32 %v11828_v38, %v9868_v60  ;;  %v14152_v8 = vadd.f32 %v10866_v56, %v9906_v59 }
0x1243   :  { %v9899_v26 = vmul.f32 %v11830_v54, %v9867_v31 }
0x1244   :  { %v9908_v50 = vmul.f32 %v10865_v20, %v9900_v27 }
0x1245   :  { %v11832_v1 = vpop.eup %11831  ;;  %v9907_v25 = vmul.f32 %v10865_v20, %v9899_v26 }
0x1246   :  { %v9901_v0 = vmul.f32 %v11832_v1, %v9869_v14  ;;  %v14158_v4 = vadd.f32 %v10866_v56, %v9908_v50 }
0x1247   :  { %v14154_v12 = vadd.f32 %v10866_v56, %v9907_v25  ;;  %v10884_v25 = vld [vmem:[%s14309_s6 + $0xd] ss:$0 sm:$0xff] }
0x1248   :  { %v9909_v63 = vmul.f32 %v10865_v20, %v9901_v0 }
0x1249   :  { %v9918_v10 = vpack.c.bf16 %v14154_v12, %v14152_v8 }
0x124a   :  { %v14160_v42 = vadd.f32 %v10866_v56, %v9909_v63 }
0x124b   :  { %11503 = vmatprep.mubr.msk.bf16.mxu0 %vm108_vm0, %v9918_v10 }
0x124c   :  { %v9919_v53 = vpack.c.bf16 %v14160_v42, %v14158_v4 }
0x124e   :  { %11504 = vmatmul.mubr.msk.bf16.vlgmr.msra.gmra.mxu0 %vm108_vm0, %v9919_v53 }
0x124f   :  { %11527 = vmatprep.mubr.msk.bf16.mxu0 %vm11885_vm1, %v11884_v21 }
0x130e   :  { %v11505_v24 = vpop.f32.mrf.mxu0 }
0x130f   :  { %v9990_v28 = vadd.f32 %v11505_v24, %v10871_v16 }
0x1310   :  { %v9981_v57 = vpop.f32.mrf.mxu0 }
0x1311   :  { %v9998_v41 = vmul.f32 %v9990_v28, %v9990_v28  ;;  %v9982_v2 = vadd.f32 %v10871_v16, %v9981_v57 }
0x1312   :  { %v11506_v45 = vpop.f32.mrf.mxu0 }
0x1313   :  { %v10002_v35 = vmul.f32 %v9998_v41, %v9990_v28  ;;  %v9996_v49 = vmul.f32 %v9982_v2, %v9982_v2  ;;  %v9993_v19 = vadd.f32 %v11506_v45, %v10871_v16 }
0x1314   :  { %v9984_v40 = vpop.f32.mrf.mxu0 }
0x1315   :  { %v10006_v31 = vmul.f32 0.044715, %v10002_v35  ;;  %v10000_v60 = vmul.f32 %v9996_v49, %v9982_v2  ;;  %v9999_v58 = vmul.f32 %v9993_v19, %v9993_v19  ;;  %v9985_v47 = vadd.f32 %v10871_v16, %v9984_v40 }
0x1317   :  { %v10010_v6 = vadd.f32 %v10006_v31, %v9990_v28  ;;  %v10004_v51 = vmul.f32 0.044715, %v10000_v60  ;;  %v10003_v17 = vmul.f32 %v9999_v58, %v9993_v19  ;;  %v9997_v14 = vmul.f32 %v9985_v47, %v9985_v47 }
0x1319   :  { %v10014_v48 = vmul.f32 0.7978846, %v10010_v6  ;;  %v10008_v9 = vadd.f32 %v10004_v51, %v9982_v2  ;;  %v10007_v23 = vmul.f32 0.044715, %v10003_v17  ;;  %v10001_v3 = vmul.f32 %v9997_v14, %v9985_v47 }
0x131b   :  { %v10012_v37 = vmul.f32 0.7978846, %v10008_v9  ;;  %v10011_v18 = vadd.f32 %v10007_v23, %v9993_v19  ;;  %v10005_v44 = vmul.f32 0.044715, %v10001_v3  ;;  %11833 = vtanh.f32 %v10014_v48  ;;  %v11857_v23 = vld [vmem:[%s14304_s1] sm:$0xf] }
0x131c   :  { %v10259_v3 = vsel %vm10258_vm7, %v11857_v23, 0.0 }
0x131d   :  { %11835 = vtanh.f32 %v10012_v37  ;;  %v10015_v33 = vmul.f32 0.7978846, %v10011_v18  ;;  %v10009_v46 = vadd.f32 %v10005_v44, %v9985_v47  ;;  %v10207_v44 = vsub.s32 1, %v12070_v29 }
0x131f   :  { %11837 = vtanh.f32 %v10015_v33  ;;  %v10013_v55 = vmul.f32 0.7978846, %v10009_v46  ;;  %v10208_v33 = vrot.slane %v11857_v23, %v10207_v44  ;;  %v10221_v46 = vsub.s32 3, %v12070_v29 }
0x1321   :  { %11839 = vtanh.f32 %v10013_v55  ;;  %v10222_v55 = vrot.slane %v11857_v23, %v10221_v46 }
0x1328   :  { %v11834_v39 = vpop.eup %11833 }
0x1329   :  { %v10022_v11 = vadd.f32 1.0, %v11834_v39  ;;  %v10214_v39 = vsub.s32 2, %v12070_v29 }
0x132a   :  { %v11836_v30 = vpop.eup %11835 }
0x132b   :  { %v10020_v5 = vadd.f32 1.0, %v11836_v30  ;;  %v10026_v20 = vmul.f32 0.5, %v10022_v11  ;;  %v10215_v30 = vrot.slane %v11857_v23, %v10214_v39 }
0x132c   :  { %v11838_v52 = vpop.eup %11837 }
0x132d   :  { %v10023_v7 = vadd.f32 1.0, %v11838_v52  ;;  %v10024_v61 = vmul.f32 0.5, %v10020_v5  ;;  %v10030_v59 = vmul.f32 %v10026_v20, %v9990_v28  ;;  %v10201_v5 = vrot.slane %v11857_v23, %v12532_v36  ;;  %v10891_v36 = vld [vmem:[%s14309_s6 + $0xe] ss:$0 sm:$0xff] }
0x132e   :  { %v11840_v62 = vpop.eup %11839 }
0x132f   :  { %v10027_v34 = vmul.f32 0.5, %v10023_v7  ;;  %v10021_v22 = vadd.f32 1.0, %v11840_v62  ;;  %v10028_v27 = vmul.f32 %v10024_v61, %v9982_v2 }
0x1331   :  { %v10025_v38 = vmul.f32 0.5, %v10021_v22  ;;  %v10031_v54 = vmul.f32 %v10027_v34, %v9993_v19 }
0x1333   :  { %v10029_v26 = vmul.f32 %v10025_v38, %v9985_v47  ;;  %v10033_v1 = vpack.c.bf16 %v10031_v54, %v10030_v59 }
0x1335   :  { %v10032_v56 = vpack.c.bf16 %v10029_v26, %v10028_v27 }
0x1337   :  { %11515 = vmatprep.mubr.msk.bf16.mxu1 %vm5021_vm6, %v10032_v56  ;;  %v10892_v56 = vld [vmem:[%s14309_s6 + $0xf] ss:$0 sm:$0xff] }
0x1338   :  { %11516 = vmatmul.mubr.msk.bf16.vlgmr.msra.gmra.mxu1 %vm5021_vm6, %v10033_v1 }
0x1339   :  { %11537 = vmatprep.mubr.msk.bf16.mxu1 %vm11885_vm1, %v11884_v21 }
0x13f8   :  { %v11517_v0 = vpop.f32.mrf.mxu1 }
0x13f9   :  { %v10120_v50 = vadd.f32 %v11517_v0, %v10884_v25 }
0x13fa   :  { %v10111_v63 = vpop.f32.mrf.mxu1 }
0x13fb   :  { %v10128_v10 = vadd.f32 %v10120_v50, %v14158_v4  ;;  %v10112_v13 = vadd.f32 %v10884_v25, %v10111_v63 }
0x13fc   :  { %v11518_v53 = vpop.f32.mrf.mxu1 }
0x13fd   :  { %v10123_v15 = vadd.f32 %v11518_v53, %v10884_v25  ;;  %v10136_v32 = vsel %vm108_vm0, %v10128_v10, 0.0  ;;  %v10126_v41 = vadd.f32 %v10112_v13, %v14152_v8 }
0x13fe   :  { %10137 = vadd.xlane.f32.xlu0 %v10136_v32  ;;  %v10114_v43 = vpop.f32.mrf.mxu1 }
0x13ff   :  { %v10129_v16 = vadd.f32 %v10123_v15, %v14160_v42  ;;  %v10115_v24 = vadd.f32 %v10884_v25, %v10114_v43  ;;  %v10130_v4 = vsel %vm108_vm0, %v10126_v41, 0.0 }
0x1401   :  { %v10127_v28 = vadd.f32 %v10115_v24, %v14154_v12  ;;  %v10139_v57 = vsel %vm108_vm0, %v10129_v16, 0.0 }
0x1402   :  { %10140 = vadd.xlane.f32.xlu0 %v10139_v57 }
0x1403   :  { %v10133_v2 = vsel %vm108_vm0, %v10127_v28, 0.0 }
0x1404   :  { %10134 = vadd.xlane.f32.xlu1 %v10133_v2 }
0x1408   :  { %10131 = vadd.xlane.f32.xlu1 %v10130_v4 }
0x1487   :  { %v10138_v45 = vpop.xlane.xlu0 %10137 }
0x1488   :  { %v10144_v35 = vmul.f32 0.03125, %v10138_v45 }
0x148a   :  { %v10148_v49 = vsub.f32 %v10128_v10, %v10144_v35 }
0x148b   :  { %v10141_v19 = vpop.xlane.xlu0 %10140 }
0x148c   :  { %v10145_v40 = vmul.f32 0.03125, %v10141_v19  ;;  %v10152_v42 = vmul.f32 %v10148_v49, %v10148_v49 }
0x148d   :  { %v10135_v31 = vpop.xlane.xlu1 %10134 }
0x148e   :  { %v10149_v60 = vsub.f32 %v10129_v16, %v10145_v40  ;;  %v10160_v12 = vsel %vm108_vm0, %v10152_v42, 0.0  ;;  %v10143_v51 = vmul.f32 0.03125, %v10135_v31 }
0x148f   :  { %10161 = vadd.xlane.f32.xlu0 %v10160_v12 }
0x1490   :  { %v10153_v58 = vmul.f32 %v10149_v60, %v10149_v60  ;;  %v14201_v48 = vsub.f32 %v10127_v28, %v10143_v51 }
0x1491   :  { %v10132_v47 = vpop.xlane.xlu1 %10131 }
0x1492   :  { %v10142_v8 = vmul.f32 0.03125, %v10132_v47  ;;  %v10163_v6 = vsel %vm108_vm0, %v10153_v58, 0.0  ;;  %v10151_v37 = vmul.f32 %v14201_v48, %v14201_v48 }
0x1493   :  { %10164 = vadd.xlane.f32.xlu0 %v10163_v6 }
0x1494   :  { %v10146_v17 = vsub.f32 %v10126_v41, %v10142_v8  ;;  %v10157_v18 = vsel %vm108_vm0, %v10151_v37, 0.0 }
0x1496   :  { %v10150_v14 = vmul.f32 %v10146_v17, %v10146_v17 }
0x1498   :  { %v10154_v9 = vsel %vm108_vm0, %v10150_v14, 0.0 }
0x1499   :  { %10155 = vadd.xlane.f32.xlu1 %v10154_v9 }
0x149d   :  { %10260 = vadd.xlane.f32.xlu1 %v10259_v3 }
0x14a1   :  { %10158 = vadd.xlane.f32.xlu1 %v10157_v18 }
0x14a9   :  { %10210 = vbcast.lane.b32.xlu0 %v10208_v33, 256 }
0x14ad   :  { %10224 = vbcast.lane.b32.xlu0 %v10222_v55, 256 }
0x14b2   :  { %10217 = vbcast.lane.b32.xlu1 %v10215_v30, 256 }
0x14b6   :  { %10203 = vbcast.lane.b32.xlu1 %v10201_v5, 256 }
0x1518   :  { %v10162_v52 = vpop.xlane.xlu0 %10161 }
0x1519   :  { %v10168_v11 = vmul.f32 0.03125, %v10162_v52 }
0x151b   :  { %v10172_v7 = vadd.f32 1e-05, %v10168_v11 }
0x151c   :  { %v10165_v62 = vpop.xlane.xlu0 %10164 }
0x151d   :  { %11841 = vrsqrt.f32 %v10172_v7  ;;  %v10169_v61 = vmul.f32 0.03125, %v10165_v62 }
0x151f   :  { %v10173_v34 = vadd.f32 1e-05, %v10169_v61 }
0x1520   :  { %v10211_v1 = vpop.permute.xlu0 %10210 }
0x1521   :  { %11843 = vrsqrt.f32 %v10173_v34 }
0x1522   :  { %v10156_v22 = vpop.xlane.xlu1 %10155 }
0x1523   :  { %v10166_v20 = vmul.f32 0.03125, %v10156_v22 }
0x1524   :  { %v10225_v43 = vpop.permute.xlu0 %10224 }
0x1525   :  { %v10170_v38 = vadd.f32 1e-05, %v10166_v20 }
0x1526   :  { %v10261_v54 = vpop.xlane.xlu1 %10260 }
0x1527   :  { %11845 = vrsqrt.f32 %v10170_v38  ;;  %v10262_v35 = vmax.f32 %v10261_v54, 1e-09 }
0x152a   :  { %v11842_v29 = vpop.eup %11841  ;;  %v10159_v27 = vpop.xlane.xlu1 %10158 }
0x152b   :  { %v10167_v26 = vmul.f32 0.03125, %v10159_v27  ;;  %v10180_v59 = vmul.f32 %v11842_v29, %v10148_v49 }
0x152d   :  { %v10171_v25 = vadd.f32 1e-05, %v10167_v26  ;;  %v10188_v0 = vmul.f32 %v10891_v36, %v10180_v59 }
0x152e   :  { %v11844_v50 = vpop.eup %11843  ;;  %v10218_v63 = vpop.permute.xlu1 %10217 }
0x152f   :  { %11847 = vrsqrt.f32 %v10171_v25  ;;  %v10196_v10 = vadd.f32 %v10892_v56, %v10188_v0  ;;  %v10181_v53 = vmul.f32 %v11844_v50, %v10149_v60 }
0x1530   :  { %11849 = vrcp.f32 %v10262_v35 }
0x1531   :  { %v10228_v15 = vmul.f32 %v10218_v63, %v10196_v10  ;;  %v10189_v32 = vmul.f32 %v10891_v36, %v10181_v53 }
0x1532   :  { %v10204_v49 = vpop.permute.xlu1 %10203 }
0x1533   :  { %v10197_v13 = vadd.f32 %v10892_v56, %v10189_v32  ;;  %v10244_v24 = vsel %vm108_vm0, %v10228_v15, 0.0  ;;  %v11658_v32 = vld [vmem:[%s14310_s7 + $0x18] sm:$0xff]  }
0x1534   :  { %v11846_v16 = vpop.eup %11845  ;;  %v10245_v41 = vrot.slane %v10244_v24, 4  ;;  %11520 = vmatpush3.bf16.msra.mxu0 %v11658_v32 }
0x1535   :  { %v10229_v28 = vmul.f32 %v10225_v43, %v10197_v13  ;;  %v10178_v57 = vmul.f32 %v11846_v16, %v10146_v17  ;;  %v11659_v43 = vld [vmem:[%s14310_s7 + $0x10] sm:$0xff]   ;;  %11521 = vmatprep.subr.bf16.mxu0 %v11884_v21  ;;  %v11660_v13 = vld [vmem:[%s14310_s7 + $0x8] sm:$0xff]  }
0x1536   :  { %v10246_v40 = vadd.f32 %v10245_v41, %v10244_v24 }
0x1537   :  { %v10251_v2 = vsel %vm108_vm0, %v10229_v28, 0.0  ;;  %v10186_v45 = vmul.f32 %v10891_v36, %v10178_v57  ;;  %v11661_v28 = vld [vmem:[%s14310_s7] sm:$0xff]   ;;  %v11662_v57 = vld [vmem:[%s14310_s7 + $0x30] sm:$0xff]  }
0x1538   :  { %v10252_v4 = vrot.slane %v10251_v2, 4  ;;  %v10247_v8 = vrot.slane %v10246_v40, 2  ;;  %11522 = vmatpush3.bf16.msra.mxu0 %v11659_v43  ;;  %11532 = vmatpush3.bf16.msra.mxu1 %v11662_v57 }
0x1539   :  { %v10194_v19 = vadd.f32 %v10892_v56, %v10186_v45  ;;  %11523 = vmatprep.subr.bf16.mxu0 %v11884_v21  ;;  %11533 = vmatprep.subr.bf16.mxu1 %v11884_v21 }
0x153a   :  { %v10253_v31 = vadd.f32 %v10252_v4, %v10251_v2  ;;  %v10248_v23 = vadd.f32 %v10247_v8, %v10246_v40 }
0x153b   :  { %v10226_v60 = vmul.f32 %v10204_v49, %v10194_v19 }
0x153c   :  { %v11848_v42 = vpop.eup %11847  ;;  %v10254_v51 = vrot.slane %v10253_v31, 2  ;;  %v10249_v46 = vrot.slane %v10248_v23, 1  ;;  %11524 = vmatpush3.bf16.msra.mxu0 %v11660_v13 }
0x153d   :  { %v10179_v12 = vmul.f32 %v11848_v42, %v14201_v48  ;;  %v10230_v58 = vsel %vm108_vm0, %v10226_v60, 0.0  ;;  %v11850_v48 = vpop.eup %11849  ;;  %11525 = vmatprep.subr.bf16.mxu0 %v11884_v21 }
0x153e   :  { %v10231_v6 = vrot.slane %v10230_v58, 4  ;;  %v10255_v37 = vadd.f32 %v10254_v51, %v10253_v31  ;;  %v10250_v52 = vadd.f32 %v10249_v46, %v10248_v23  ;;  %v10266_v62 = vrot.slane %v11850_v48, 2  ;;  %v11664_v51 = vld [vmem:[%s14310_s7 + $0x20] sm:$0xff]  }
0x153f   :  { %v10187_v47 = vmul.f32 %v10891_v36, %v10179_v12  ;;  %v10267_v34 = vrot.slane %v11850_v48, 3  ;;  %v10265_v54 = vrot.slane %v11850_v48, 1 }
0x1540   :  { %v10232_v14 = vadd.f32 %v10231_v6, %v10230_v58  ;;  %v10256_v39 = vrot.slane %v10255_v37, 1  ;;  %v10274_v20 = vmul.f32 %v10266_v62, %v10250_v52  ;;  %11526 = vmatpush3.bf16.msra.mxu0 %v11661_v28  ;;  %v11663_v6 = vld [vmem:[%s14310_s7 + $0x28] sm:$0xff]  }
0x1541   :  { %v10195_v17 = vadd.f32 %v10892_v56, %v10187_v47  ;;  %11541 = vmatprep.subr.bf16.mxu0 %v11884_v21  ;;  %11534 = vmatpush3.bf16.msra.mxu1 %v11663_v6 }
0x1542   :  { %v10233_v3 = vrot.slane %v10232_v14, 2  ;;  %v10257_v7 = vadd.f32 %v10256_v39, %v10255_v37  ;;  %v10278_v26 = vmul.f32 %v10274_v20, %v10274_v20  ;;  %11535 = vmatprep.subr.bf16.mxu1 %v11884_v21  ;;  %v11667_v39 = vld [vmem:[%s14310_s7 + $0x38] sm:$0xff]  }
0x1543   :  { %v10227_v9 = vmul.f32 %v10211_v1, %v10195_v17  ;;  %v11665_v17 = vld [vmem:[%s14310_s7 + $0x48] ss:$0 sps:$4 sm:$0xff]  }
0x1544   :  { %v10234_v33 = vadd.f32 %v10233_v3, %v10232_v14  ;;  %v10275_v29 = vmul.f32 %v10267_v34, %v10257_v7  ;;  %v10287_v0 = vrot.slane %v10278_v26, 6  ;;  %v10519_v14 = vsel %vm3380_vm3, %v11665_v17, 0 }
0x1545   :  { %v10237_v18 = vsel %vm108_vm0, %v10227_v9, 0.0  ;;  %11536 = vmatpush3.bf16.msra.mxu1 %v11664_v51  ;;  %v10893_v9 = vld [vmem:[%s14311_s8] ss:$0 sm:$0xff] }
0x1546   :  { %v10238_v44 = vrot.slane %v10237_v18, 4  ;;  %v10235_v5 = vrot.slane %v10234_v33, 1  ;;  %v10279_v56 = vmul.f32 %v10275_v29, %v10275_v29  ;;  %11551 = vmatprep.subr.bf16.mxu1 %v11884_v21 }
0x1548   :  { %v10239_v55 = vadd.f32 %v10238_v44, %v10237_v18  ;;  %v10236_v22 = vadd.f32 %v10235_v5, %v10234_v33  ;;  %v10290_v63 = vrot.slane %v10279_v56, 5  ;;  %v10899_v5 = vld [vmem:[%s14311_s8 + $0x1] ss:$0 sm:$0xff] }
0x154a   :  { %v10240_v30 = vrot.slane %v10239_v55, 2  ;;  %v10272_v36 = vmul.f32 %v11850_v48, %v10236_v22  ;;  %v11668_v48 = vld [vmem:[%s14310_s7 + $0x5c] ss:$0 sps:$4 sm:$0xff]  }
0x154c   :  { %v10241_v11 = vadd.f32 %v10240_v30, %v10239_v55  ;;  %v10276_v1 = vmul.f32 %v10272_v36, %v10272_v36  ;;  %v11666_v55 = vld [vmem:[%s14310_s7 + $0x40] sm:$0xff]   ;;  %v10586_v30 = vsel %vm3380_vm3, %v11668_v48, 0 }
0x154e   :  { %v10242_v61 = vrot.slane %v10241_v11, 1 }
0x1550   :  { %v10243_v38 = vadd.f32 %v10242_v61, %v10241_v11 }
0x1552   :  { %v10273_v27 = vmul.f32 %v10265_v54, %v10243_v38  ;;  %v11670_v38 = vld [vmem:[%s14310_s7 + $0x4c] sm:$0xff]   ;;  %v10904_v54 = vld [vmem:[%s14311_s8 + $0x2] ss:$0 sm:$0xff] }
0x1554   :  { %v10277_v59 = vmul.f32 %v10273_v27, %v10273_v27 }
0x1556   :  { %v10284_v25 = vrot.slane %v10277_v59, 7 }
0x1558   :  { %v10286_v50 = vsel %vm10285_vm8, %v10284_v25, %v10276_v1 }
0x1559   :  { %v10289_v10 = vsel %vm10288_vm9, %v10287_v0, %v10286_v50 }
0x155a   :  { %v10292_v53 = vsel %vm10291_vm10, %v10290_v63, %v10289_v10 }
0x155b   :  { %v10295_v15 = vsel %vm10294_vm11, %v10292_v53, 0.0 }
0x155c   :  { %10296 = vadd.xlane.f32.xlu1 %v10295_v15 }
0x15e5   :  { %v10297_v16 = vpop.xlane.xlu1 %10296 }
0x15e6   :  { %v10298_v24 = vadd.f32 1e-24, %v10297_v16 }
0x15e8   :  { %11851 = vrsqrt.f32 %v10298_v24 }
0x15f5   :  { %v11852_v41 = vpop.eup %11851 }
0x15f6   :  { %v10302_v2 = vrot.slane %v11852_v41, 2  ;;  %v10303_v4 = vrot.slane %v11852_v41, 3  ;;  %v10301_v40 = vrot.slane %v11852_v41, 1  ;;  %v10308_v60 = vmul.f32 %v11852_v41, %v10272_v36 }
0x15f8   :  { %v10311_v45 = vmul.f32 %v10303_v4, %v10275_v29  ;;  %v10310_v35 = vmul.f32 %v10302_v2, %v10274_v20  ;;  %v10309_v42 = vmul.f32 %v10301_v40, %v10273_v27  ;;  %v11669_v20 = vld [vmem:[%s14310_s7 + $0x54] sm:$0xff]   ;;  %s11894_s7 = smov [#allocation2]  }
0x15f9   :  { %s10643_s24 = sshll.u32 %s11894_s7, 4  ;;  %s10644_s24 = int_to_ptr.vmem [resolvable:$true] %s10643_s24 }
0x15fa   :  { %v10319_v49 = vrot.slane %v10311_v45, 7  ;;  %v10314_v31 = vrot.slane %v10309_v42, 7  ;;  %s11858_s25 = scalar_lea.vmem %s10644_s24, 32  ;;  %p11863_p1 = scmp.lt.s32.totalorder %s10644_s24, %s10644_s24 }
0x15fb   :  { %p11859_p0 = scmp.ne.s32.totalorder %s10644_s24, %s11858_s25  ;;  %p11864_p2 = scmp.lt.s32.totalorder %s11858_s25, %s11858_s25 }
0x15fc   :  { %v10320_v19 = vsel %vm10285_vm8, %v10319_v49, %v10310_v35  ;;  %v10315_v58 = vsel %vm10285_vm8, %v10314_v31, %v10308_v60 }
0x15fd   :  { %10321 = vrot.lane.b32.xlu0 %v10320_v19, %s11893_s30  ;;  %p11865_p3 = por %p11864_p2, %p11863_p1 }
0x15ff   :  { %p11866_p4 = pnand %p11865_p3, %p11859_p0 }
0x166f   :  { %v10322_v12 = vpop.permute.xlu0 %10321 }
0x1670   :  { %v10324_v47 = vsel %vm108_vm0, %v10315_v58, %v10322_v12 }
0x1671   :  { %v10325_v8 = vpack.c.bf16 %v10324_v47, %v10324_v47 }
0x1673   :  { %11528 = vmatmul.mubr.msk.bf16.vlgmr.msra.gmra.mxu0 %vm5021_vm6, %v10325_v8 }
0x1674   :  { %11547 = vmatprep.mubr.msk.bf16.mxu0 %vm11885_vm1, %v11884_v21  ;;  %11542 = vmatpush3.bf16.msra.mxu0 %v10519_v14 }
0x1675   :  { %11543 = vmatprep.subr.bf16.mxu0 %v11884_v21 }
0x1678   :  { %11544 = vmatpush3.bf16.msra.mxu0 %v11666_v55 }
0x1679   :  { %11545 = vmatprep.subr.bf16.mxu0 %v11884_v21 }
0x167c   :  { %11546 = vmatpush3.bf16.msra.mxu0 %v11667_v39 }
0x1733   :  { %v10419_v23 = vpop.f32.mrf.mxu0 }
0x1734   :  { %v10420_v3 = vadd.f32 %v10893_v9, %v10419_v23 }
0x1735   :  { %v11529_v37 = vpop.f32.mrf.mxu0 }
0x1736   :  { %v10425_v18 = vmax.f32 %v10420_v3, 0.0 }
0x1737   :  { %v10422_v44 = vpop.f32.mrf.mxu0 }
0x1738   :  { %v10426_v33 = vpack.c.bf16 %v10425_v18, %v10425_v18 }
0x1739   :  { %v11530_v46 = vpop.f32.mrf.mxu0 }
0x173a   :  { %11538 = vmatmul.mubr.msk.bf16.vlgmr.msra.gmra.mxu1 %vm10449_vm12, %v10426_v33 }
0x173b   :  { %11557 = vmatprep.mubr.msk.bf16.mxu1 %vm11885_vm1, %v11884_v21  ;;  %11552 = vmatpush3.bf16.msra.mxu1 %v10586_v30 }
0x173c   :  { %11553 = vmatprep.subr.bf16.mxu1 %v11884_v21 }
0x173f   :  { %11554 = vmatpush3.bf16.msra.mxu1 %v11669_v20 }
0x1740   :  { %11555 = vmatprep.subr.bf16.mxu1 %v11884_v21  ;;  %v10909_v21 = vld [vmem:[%s14311_s8 + $0x3] ss:$0 sm:$0xff] }
0x1743   :  { %11556 = vmatpush3.bf16.msra.mxu1 %v11670_v38 }
0x17fa   :  { %v10487_v52 = vpop.f32.mrf.mxu1 }
0x17fb   :  { %v10488_v11 = vadd.f32 %v10899_v5, %v10487_v52 }
0x17fc   :  { %v11539_v7 = vpop.f32.mrf.mxu1 }
0x17fd   :  { %v10493_v62 = vmax.f32 %v10488_v11, 0.0 }
0x17fe   :  { %v10490_v61 = vpop.f32.mrf.mxu1 }
0x17ff   :  { %v10494_v34 = vpack.c.bf16 %v10493_v62, %v10493_v62 }
0x1800   :  { %v11540_v22 = vpop.f32.mrf.mxu1 }
0x1801   :  { %11548 = vmatmul.mubr.msk.bf16.vlgmr.msra.gmra.mxu0 %vm10514_vm13, %v10494_v34 }
0x18c1   :  { %v10555_v29 = vpop.f32.mrf.mxu0 }
0x18c2   :  { %v10556_v27 = vadd.f32 %v10904_v54, %v10555_v29 }
0x18c3   :  { %v11549_v36 = vpop.f32.mrf.mxu0 }
0x18c4   :  { %v10561_v26 = vmax.f32 %v10556_v27, 0.0 }
0x18c5   :  { %v10558_v59 = vpop.f32.mrf.mxu0 }
0x18c6   :  { %v10562_v56 = vpack.c.bf16 %v10561_v26, %v10561_v26 }
0x18c7   :  { %v11550_v1 = vpop.f32.mrf.mxu0 }
0x18c8   :  { %11558 = vmatmul.mubr.msk.bf16.vlgmr.msra.gmra.mxu1 %vm10514_vm13, %v10562_v56 }
0x1988   :  { %v10622_v25 = vpop.f32.mrf.mxu1 }
0x1989   :  { %v10623_v0 = vadd.f32 %v10909_v21, %v10622_v25 }
0x198a   :  { %v11559_v50 = vpop.f32.mrf.mxu1 }
0x198b   :  { %v10628_v63 = vmul.f32 %v10623_v0, %v10623_v0 }
0x198c   :  { %v10625_v10 = vpop.f32.mrf.mxu1 }
0x198d   :  { %v10630_v53 = vsel %vm10629_vm14, %v10628_v63, 0.0 }
0x198e   :  { %10631 = vadd.xlane.f32.xlu0 %v10630_v53  ;;  %v11560_v15 = vpop.f32.mrf.mxu1 }
0x1a17   :  { %v10632_v32 = vpop.xlane.xlu0 %10631 }
0x1a18   :  { %v10633_v43 = vadd.f32 1e-24, %v10632_v32 }
0x1a1a   :  { %11853 = vrsqrt.f32 %v10633_v43 }
0x1a27   :  { %v11854_v13 = vpop.eup %11853 }
0x1a28   :  { %v10635_v16 = vmul.f32 %v11854_v13, %v10623_v0 }
0x1a2a   :  { %10636 = vst.msk [vmem:[#allocation2] sm:$0x3] %vm10629_vm14, %v10635_v16 }
0x1a2b   :  { %11869 = shalt.err (!%p11866_p4)
}
0x1a2c   :  { %10646 = dma.vmem_to_hbm [thread:$0]  %s10644_s24, 32, %s14312_s9, [#allocation3]  }
0x1a2d   :  { %11878 = dma.done.wait [#allocation3], 32  }
0x1a2e   :  { %11879 = vsyncadd [#allocation3], 4294967264 }
0x1a2f   :  { %10650 = vsyncpa [#allocation3], 1 }

</bundles_post_ra>
